<compile_context>
chip_gen: v7x
topology: tpu7x:2x2x1
jax: 0.10.0
libtpu: 0.0.40
codegen_flags: <defaults>
</compile_context>

<pallas_src>
import functools

import jax
import jax.numpy as jnp
import numpy as np
from jax import lax
from jax.experimental import pallas as pl
from jax.experimental.pallas import tpu as pltpu


# ----------------------------------------------------------------------------
# Fused kernel: (conv3x3 + folded-BN + ReLU) x2  +  MaxPool2d(2,2), one image.
# ----------------------------------------------------------------------------
def _unet_down_kernel(x_ref, w1_ref, s1_ref, w2_ref, s2_ref,
                      ft_ref, y_ref, h1f, ftf,
                      *, H, W, K, Cin, Cout):
    # x_ref : (1, H*W, Cin)      row-major flattened NHWC image
    # w1_ref: (K*K*Cin,  Cout)   conv1 weight with BN scale folded in
    # s1_ref: (1, Cout)          folded conv1 bias + BN shift
    # w2_ref: (K*K*Cout, Cout)   conv2 weight with BN scale folded in
    # s2_ref: (1, Cout)
    # ft_ref: (1, H2, W2, Cout)  pre-pool activation (returned by the module)
    # y_ref : (1, H2//2, W2//2, Cout)  pooled output
    # h1f   : (M1, Cout) f32 VMEM scratch -- flat conv1 output (wrap cols = junk)
    # ftf   : (M2, Cout) f32 VMEM scratch -- flat conv2 output (wrap cols = junk)
    H1, W1 = H - K + 1, W - K + 1
    H2, W2 = H1 - K + 1, W1 - K + 1
    Hp, Wp = H2 // 2, W2 // 2
    M1 = H1 * W - (K - 1)        # last tap read ends exactly at H*W - 1
    M2 = H2 * W - 2 * (K - 1)    # last tap read ends exactly at M1 - 1

    # ---- conv1 + BN + ReLU : flat im2col -> one MXU dot (K-dim = K*K*Cin) ----
    taps = [x_ref[0, pl.ds(dy * W + dx, M1), :]
            for dy in range(K) for dx in range(K)]
    patch = jnp.concatenate(taps, axis=-1)                        # (M1, K*K*Cin)
    h1 = jnp.dot(patch.astype(w1_ref.dtype), w1_ref[...],
                 preferred_element_type=jnp.float32)
    h1f[...] = jnp.maximum(h1 + s1_ref[...], 0.0)

    # ---- conv2 + BN + ReLU (valid outputs never read h1's wrap columns) -----
    taps = [h1f[pl.ds(dy * W + dx, M2), :]
            for dy in range(K) for dx in range(K)]
    patch = jnp.concatenate(taps, axis=-1)                        # (M2, K*K*Cout)
    ft = jnp.dot(patch.astype(w2_ref.dtype), w2_ref[...],
                 preferred_element_type=jnp.float32)
    ftf[...] = jnp.maximum(ft + s2_ref[...], 0.0)

    # ---- emit ft in NHWC (drop the K-1 wrap columns of each flat row) -------
    for h2 in range(H2):                      # static: fully unrolled
        ft_ref[0, h2] = ftf[pl.ds(h2 * W, W2), :].astype(ft_ref.dtype)

    # ---- fused 2x2/2 max-pool via sublane-strided reads of the flat result --
    for hp in range(Hp):                      # static: fully unrolled
        base = 2 * hp * W
        t00 = ftf[pl.ds(base,         Wp, 2), :]   # row 2hp,   even cols
        t01 = ftf[pl.ds(base + 1,     Wp, 2), :]   # row 2hp,   odd cols
        t10 = ftf[pl.ds(base + W,     Wp, 2), :]   # row 2hp+1, even cols
        t11 = ftf[pl.ds(base + W + 1, Wp, 2), :]   # row 2hp+1, odd cols
        y_ref[0, hp] = jnp.maximum(jnp.maximum(t00, t01),
                                   jnp.maximum(t10, t11)).astype(y_ref.dtype)


# ----------------------------------------------------------------------------
# Wrapper: fold BN into weights, flatten spatial dims, call the fused kernel.
# ----------------------------------------------------------------------------
def _fold_conv_bn(w, b, gamma, beta, rmean, rvar, eps):
    # (x*w + b - rmean) * gamma/sqrt(var+eps) + beta  ==  x*(w*scale) + shift
    scale = gamma / jnp.sqrt(rvar + eps)                   # (Cout,)
    w_folded = w * scale                                   # broadcast over Cout
    shift = (b - rmean) * scale + beta
    KH, KW, Cin, Cout = w.shape
    return w_folded.reshape(KH * KW * Cin, Cout), shift.reshape(1, Cout)


def unet_down_forward(x_nchw, params, *, eps=1e-5, compute_dtype=jnp.float32):
    """UnetDown forward (eval mode). NCHW in, returns (pooled NCHW, ft NCHW)."""
    w1 = params["w1"]
    K, _, Cin, Cout = w1.shape
    w1f, s1 = _fold_conv_bn(w1, params["b1"], params["gamma1"], params["beta1"],
                            params["rmean1"], params["rvar1"], eps)
    w2f, s2 = _fold_conv_bn(params["w2"], params["b2"], params["gamma2"],
                            params["beta2"], params["rmean2"], params["rvar2"], eps)

    x = jnp.transpose(x_nchw, (0, 2, 3, 1))                # NCHW -> NHWC
    N, H, W, _ = x.shape
    H1, W1 = H - K + 1, W - K + 1
    H2, W2 = H1 - K + 1, W1 - K + 1
    assert H2 > 0 and W2 > 0 and H2 % 2 == 0 and W2 % 2 == 0, \
        "fused kernel assumes even pre-pool spatial dims (MaxPool2d(2,2))"
    Hp, Wp = H2 // 2, W2 // 2
    M1 = H1 * W - (K - 1)
    M2 = H2 * W - 2 * (K - 1)

    # bf16 operand feeds (compute_dtype=jnp.bfloat16) ~2x MXU rate on v6e/v7x;
    # accumulation stays f32 inside the kernel.  Default f32 for exactness.
    x_flat = x.reshape(N, H * W, Cin).astype(compute_dtype)
    w1f = w1f.astype(compute_dtype)
    w2f = w2f.astype(compute_dtype)

    kernel = functools.partial(_unet_down_kernel,
                               H=H, W=W, K=K, Cin=Cin, Cout=Cout)
    ft, y = pl.pallas_call(
        kernel,
        out_shape=(jax.ShapeDtypeStruct((N, H2, W2, Cout), jnp.float32),
                   jax.ShapeDtypeStruct((N, Hp, Wp, Cout), jnp.float32)),
        grid=(N,),
        in_specs=[
            pl.BlockSpec((1, H * W, Cin), lambda n: (n, 0, 0)),
            pl.BlockSpec((K * K * Cin, Cout), lambda n: (0, 0)),
            pl.BlockSpec((1, Cout), lambda n: (0, 0)),
            pl.BlockSpec((K * K * Cout, Cout), lambda n: (0, 0)),
            pl.BlockSpec((1, Cout), lambda n: (0, 0)),
        ],
        out_specs=(pl.BlockSpec((1, H2, W2, Cout), lambda n: (n, 0, 0, 0)),
                   pl.BlockSpec((1, Hp, Wp, Cout), lambda n: (n, 0, 0, 0))),
        scratch_shapes=[pltpu.VMEM((M1, Cout), jnp.float32),
                        pltpu.VMEM((M2, Cout), jnp.float32)],
        compiler_params=pltpu.CompilerParams(dimension_semantics=("parallel",)),
    )(x_flat, w1f, s1, w2f, s2)
    # TODO(synk): for large images (e.g. 512x512x64) the per-image block exceeds
    #             v7x's 64 MiB VMEM -- tile the grid over haloed row strips then.

    return jnp.transpose(y, (0, 3, 1, 2)), jnp.transpose(ft, (0, 3, 1, 2))


# ----------------------------------------------------------------------------
# Deterministic parameters (matches module __init__ shapes; non-trivial BN
# running stats so the folding path is actually exercised).
# ----------------------------------------------------------------------------
def make_params(key, in_channels, out_channels, kernel_size=3):
    ks = jax.random.split(key, 12)
    std1 = np.sqrt(2.0 / (kernel_size * kernel_size * in_channels))
    std2 = np.sqrt(2.0 / (kernel_size * kernel_size * out_channels))
    w1 = std1 * jax.random.normal(
        ks[0], (kernel_size, kernel_size, in_channels, out_channels), jnp.float32)
    w2 = std2 * jax.random.normal(
        ks[1], (kernel_size, kernel_size, out_channels, out_channels), jnp.float32)
    bound1 = 1.0 / np.sqrt(kernel_size * kernel_size * in_channels)
    bound2 = 1.0 / np.sqrt(kernel_size * kernel_size * out_channels)
    b1 = jax.random.uniform(ks[2], (out_channels,), jnp.float32, -bound1, bound1)
    b2 = jax.random.uniform(ks[3], (out_channels,), jnp.float32, -bound2, bound2)
    return dict(
        w1=w1, b1=b1,
        gamma1=jax.random.uniform(ks[4], (out_channels,), jnp.float32, 0.5, 1.5),
        beta1=0.1 * jax.random.normal(ks[5], (out_channels,), jnp.float32),
        rmean1=0.1 * jax.random.normal(ks[6], (out_channels,), jnp.float32),
        rvar1=jax.random.uniform(ks[7], (out_channels,), jnp.float32, 0.5, 1.5),
        w2=w2, b2=b2,
        gamma2=jax.random.uniform(ks[8], (out_channels,), jnp.float32, 0.5, 1.5),
        beta2=0.1 * jax.random.normal(ks[9], (out_channels,), jnp.float32),
        rmean2=0.1 * jax.random.normal(ks[10], (out_channels,), jnp.float32),
        rvar2=jax.random.uniform(ks[11], (out_channels,), jnp.float32, 0.5, 1.5),
    )


# ----------------------------------------------------------------------------
# Pure-JAX reference (unfolded BN) for validation
# ----------------------------------------------------------------------------
def _ref_forward(x_nchw, p, eps=1e-5):
    def conv_bn_relu(x, w, b, gamma, beta, rmean, rvar):
        y = lax.conv_general_dilated(
            x, w, window_strides=(1, 1), padding="VALID",
            dimension_numbers=("NHWC", "HWIO", "NHWC"))
        y = y + b.reshape(1, 1, 1, -1)
        y = (y - rmean) / jnp.sqrt(rvar + eps) * gamma + beta
        return jnp.maximum(y, 0.0)

    x = jnp.transpose(x_nchw, (0, 2, 3, 1))
    h1 = conv_bn_relu(x, p["w1"], p["b1"], p["gamma1"], p["beta1"],
                      p["rmean1"], p["rvar1"])
    ft = conv_bn_relu(h1, p["w2"], p["b2"], p["gamma2"], p["beta2"],
                      p["rmean2"], p["rvar2"])
    N, H, W, C = ft.shape
    y = ft.reshape(N, H // 2, 2, W // 2, 2, C).max(axis=(2, 4))
    return jnp.transpose(y, (0, 3, 1, 2)), jnp.transpose(ft, (0, 3, 1, 2))


if __name__ == "__main__":
    key = jax.random.PRNGKey(0)
    kx, kp = jax.random.split(key)

    N, Cin, H, W = 2, 4, 16, 16
    Cout = 8
    x = jax.random.normal(kx, (N, Cin, H, W), jnp.float32)      # NCHW like torch
    params = make_params(kp, Cin, Cout)

    fwd = jax.jit(unet_down_forward)
    y, ft = fwd(x, params)
    y = jax.block_until_ready(y)
    ft = jax.block_until_ready(ft)

    assert y.shape == (N, Cout, 6, 6), y.shape
    assert ft.shape == (N, Cout, 12, 12), ft.shape

    y_ref, ft_ref = _ref_forward(x, params)
    np.testing.assert_allclose(np.asarray(ft), np.asarray(ft_ref),
                               rtol=1e-4, atol=1e-4)
    np.testing.assert_allclose(np.asarray(y), np.asarray(y_ref),
                               rtol=1e-4, atol=1e-4)

    print("KERNEL_OK")
</pallas_src>

<mosaic_0001>
module attributes {stable_mosaic.version = 11 : i64} {
  func.func @_unet_down_kernel(%arg0: i32, %arg1: memref<1x256x4xf32, #tpu.memory_space<vmem>>, %arg2: memref<36x8xf32, #tpu.memory_space<vmem>>, %arg3: memref<1x8xf32, #tpu.memory_space<vmem>>, %arg4: memref<72x8xf32, #tpu.memory_space<vmem>>, %arg5: memref<1x8xf32, #tpu.memory_space<vmem>>, %arg6: memref<1x12x12x8xf32, #tpu.memory_space<vmem>>, %arg7: memref<1x6x6x8xf32, #tpu.memory_space<vmem>>, %arg8: memref<222x8xf32, #tpu.memory_space<vmem>>, %arg9: memref<188x8xf32, #tpu.memory_space<vmem>>) attributes {dimension_semantics = [#tpu.dimension_semantics<parallel>], iteration_bounds = array<i64: 2>, scalar_prefetch = 0 : i64, scratch_operands = 2 : i64, tpu.core_type = #tpu.core_type<tc>, window_params = [{transform_indices = @transform_0, window_bounds = array<i64: 1, 256, 4>}, {pipeline_mode = #tpu.pipeline_mode<synchronous>, transform_indices = @transform_1, window_bounds = array<i64: 36, 8>}, {pipeline_mode = #tpu.pipeline_mode<synchronous>, transform_indices = @transform_2, window_bounds = array<i64: 1, 8>}, {pipeline_mode = #tpu.pipeline_mode<synchronous>, transform_indices = @transform_3, window_bounds = array<i64: 72, 8>}, {pipeline_mode = #tpu.pipeline_mode<synchronous>, transform_indices = @transform_4, window_bounds = array<i64: 1, 8>}, {transform_indices = @transform_5, window_bounds = array<i64: 1, 12, 12, 8>}, {transform_indices = @transform_6, window_bounds = array<i64: 1, 6, 6, 8>}]} {
    %c0 = arith.constant 0 : index
    %c0_0 = arith.constant 0 : index
    %c0_1 = arith.constant 0 : index
    %0 = vector.load %arg1[%c0, %c0_0, %c0_1] : memref<1x256x4xf32, #tpu.memory_space<vmem>>, vector<1x222x4xf32>
    %1 = vector.shape_cast %0 : vector<1x222x4xf32> to vector<222x4xf32>
    %c0_2 = arith.constant 0 : index
    %c1 = arith.constant 1 : index
    %c0_3 = arith.constant 0 : index
    %2 = vector.load %arg1[%c0_2, %c1, %c0_3] : memref<1x256x4xf32, #tpu.memory_space<vmem>>, vector<1x222x4xf32>
    %3 = vector.shape_cast %2 : vector<1x222x4xf32> to vector<222x4xf32>
    %c0_4 = arith.constant 0 : index
    %c2 = arith.constant 2 : index
    %c0_5 = arith.constant 0 : index
    %4 = vector.load %arg1[%c0_4, %c2, %c0_5] : memref<1x256x4xf32, #tpu.memory_space<vmem>>, vector<1x222x4xf32>
    %5 = vector.shape_cast %4 : vector<1x222x4xf32> to vector<222x4xf32>
    %c0_6 = arith.constant 0 : index
    %c16 = arith.constant 16 : index
    %c0_7 = arith.constant 0 : index
    %6 = vector.load %arg1[%c0_6, %c16, %c0_7] : memref<1x256x4xf32, #tpu.memory_space<vmem>>, vector<1x222x4xf32>
    %7 = vector.shape_cast %6 : vector<1x222x4xf32> to vector<222x4xf32>
    %c0_8 = arith.constant 0 : index
    %c17 = arith.constant 17 : index
    %c0_9 = arith.constant 0 : index
    %8 = vector.load %arg1[%c0_8, %c17, %c0_9] : memref<1x256x4xf32, #tpu.memory_space<vmem>>, vector<1x222x4xf32>
    %9 = vector.shape_cast %8 : vector<1x222x4xf32> to vector<222x4xf32>
    %c0_10 = arith.constant 0 : index
    %c18 = arith.constant 18 : index
    %c0_11 = arith.constant 0 : index
    %10 = vector.load %arg1[%c0_10, %c18, %c0_11] : memref<1x256x4xf32, #tpu.memory_space<vmem>>, vector<1x222x4xf32>
    %11 = vector.shape_cast %10 : vector<1x222x4xf32> to vector<222x4xf32>
    %c0_12 = arith.constant 0 : index
    %c32 = arith.constant 32 : index
    %c0_13 = arith.constant 0 : index
    %12 = vector.load %arg1[%c0_12, %c32, %c0_13] : memref<1x256x4xf32, #tpu.memory_space<vmem>>, vector<1x222x4xf32>
    %13 = vector.shape_cast %12 : vector<1x222x4xf32> to vector<222x4xf32>
    %c0_14 = arith.constant 0 : index
    %c33 = arith.constant 33 : index
    %c0_15 = arith.constant 0 : index
    %14 = vector.load %arg1[%c0_14, %c33, %c0_15] : memref<1x256x4xf32, #tpu.memory_space<vmem>>, vector<1x222x4xf32>
    %15 = vector.shape_cast %14 : vector<1x222x4xf32> to vector<222x4xf32>
    %c0_16 = arith.constant 0 : index
    %c34 = arith.constant 34 : index
    %c0_17 = arith.constant 0 : index
    %16 = vector.load %arg1[%c0_16, %c34, %c0_17] : memref<1x256x4xf32, #tpu.memory_space<vmem>>, vector<1x222x4xf32>
    %17 = vector.shape_cast %16 : vector<1x222x4xf32> to vector<222x4xf32>
    %18 = tpu.concatenate %1, %3, %5, %7, %9, %11, %13, %15, %17 in 1 : vector<222x4xf32>, vector<222x4xf32>, vector<222x4xf32>, vector<222x4xf32>, vector<222x4xf32>, vector<222x4xf32>, vector<222x4xf32>, vector<222x4xf32>, vector<222x4xf32> -> vector<222x36xf32>
    %c0_18 = arith.constant 0 : index
    %c0_19 = arith.constant 0 : index
    %19 = vector.load %arg2[%c0_18, %c0_19] : memref<36x8xf32, #tpu.memory_space<vmem>>, vector<36x8xf32>
    %cst = arith.constant dense<0.000000e+00> : vector<222x8xf32>
    %20 = tpu.matmul %18, %19, %cst {dimension_numbers = #tpu.dot_dimension_numbers<[1], [0], [0], [1], [0, 0, 1, 1], [], []>} : vector<222x36xf32>, vector<36x8xf32>, vector<222x8xf32> -> vector<222x8xf32>
    %c0_20 = arith.constant 0 : index
    %c0_21 = arith.constant 0 : index
    %21 = vector.load %arg3[%c0_20, %c0_21] : memref<1x8xf32, #tpu.memory_space<vmem>>, vector<1x8xf32>
    %22 = vector.broadcast %21 : vector<1x8xf32> to vector<222x8xf32>
    %23 = arith.addf %20, %22 : vector<222x8xf32>
    %cst_22 = arith.constant 0.000000e+00 : f32
    %24 = vector.broadcast %cst_22 : f32 to vector<222x8xf32>
    %25 = arith.maximumf %23, %24 : vector<222x8xf32>
    %c0_23 = arith.constant 0 : index
    %c0_24 = arith.constant 0 : index
    %26 = vector.load %arg8[%c0_23, %c0_24] : memref<222x8xf32, #tpu.memory_space<vmem>>, vector<222x8xf32>
    tpu.vector_store %arg8[%c0_23, %c0_24], %25 {strides = array<i32>} : memref<222x8xf32, #tpu.memory_space<vmem>>, vector<222x8xf32>,
    %c0_25 = arith.constant 0 : index
    %c0_26 = arith.constant 0 : index
    %27 = vector.load %arg8[%c0_25, %c0_26] : memref<222x8xf32, #tpu.memory_space<vmem>>, vector<188x8xf32>
    %c1_27 = arith.constant 1 : index
    %c0_28 = arith.constant 0 : index
    %28 = vector.load %arg8[%c1_27, %c0_28] : memref<222x8xf32, #tpu.memory_space<vmem>>, vector<188x8xf32>
    %c2_29 = arith.constant 2 : index
    %c0_30 = arith.constant 0 : index
    %29 = vector.load %arg8[%c2_29, %c0_30] : memref<222x8xf32, #tpu.memory_space<vmem>>, vector<188x8xf32>
    %c16_31 = arith.constant 16 : index
    %c0_32 = arith.constant 0 : index
    %30 = vector.load %arg8[%c16_31, %c0_32] : memref<222x8xf32, #tpu.memory_space<vmem>>, vector<188x8xf32>
    %c17_33 = arith.constant 17 : index
    %c0_34 = arith.constant 0 : index
    %31 = vector.load %arg8[%c17_33, %c0_34] : memref<222x8xf32, #tpu.memory_space<vmem>>, vector<188x8xf32>
    %c18_35 = arith.constant 18 : index
    %c0_36 = arith.constant 0 : index
    %32 = vector.load %arg8[%c18_35, %c0_36] : memref<222x8xf32, #tpu.memory_space<vmem>>, vector<188x8xf32>
    %c32_37 = arith.constant 32 : index
    %c0_38 = arith.constant 0 : index
    %33 = vector.load %arg8[%c32_37, %c0_38] : memref<222x8xf32, #tpu.memory_space<vmem>>, vector<188x8xf32>
    %c33_39 = arith.constant 33 : index
    %c0_40 = arith.constant 0 : index
    %34 = vector.load %arg8[%c33_39, %c0_40] : memref<222x8xf32, #tpu.memory_space<vmem>>, vector<188x8xf32>
    %c34_41 = arith.constant 34 : index
    %c0_42 = arith.constant 0 : index
    %35 = vector.load %arg8[%c34_41, %c0_42] : memref<222x8xf32, #tpu.memory_space<vmem>>, vector<188x8xf32>
    %36 = tpu.concatenate %27, %28, %29, %30, %31, %32, %33, %34, %35 in 1 : vector<188x8xf32>, vector<188x8xf32>, vector<188x8xf32>, vector<188x8xf32>, vector<188x8xf32>, vector<188x8xf32>, vector<188x8xf32>, vector<188x8xf32>, vector<188x8xf32> -> vector<188x72xf32>
    %c0_43 = arith.constant 0 : index
    %c0_44 = arith.constant 0 : index
    %37 = vector.load %arg4[%c0_43, %c0_44] : memref<72x8xf32, #tpu.memory_space<vmem>>, vector<72x8xf32>
    %cst_45 = arith.constant dense<0.000000e+00> : vector<188x8xf32>
    %38 = tpu.matmul %36, %37, %cst_45 {dimension_numbers = #tpu.dot_dimension_numbers<[1], [0], [0], [1], [0, 0, 1, 1], [], []>} : vector<188x72xf32>, vector<72x8xf32>, vector<188x8xf32> -> vector<188x8xf32>
    %c0_46 = arith.constant 0 : index
    %c0_47 = arith.constant 0 : index
    %39 = vector.load %arg5[%c0_46, %c0_47] : memref<1x8xf32, #tpu.memory_space<vmem>>, vector<1x8xf32>
    %40 = vector.broadcast %39 : vector<1x8xf32> to vector<188x8xf32>
    %41 = arith.addf %38, %40 : vector<188x8xf32>
    %cst_48 = arith.constant 0.000000e+00 : f32
    %42 = vector.broadcast %cst_48 : f32 to vector<188x8xf32>
    %43 = arith.maximumf %41, %42 : vector<188x8xf32>
    %c0_49 = arith.constant 0 : index
    %c0_50 = arith.constant 0 : index
    %44 = vector.load %arg9[%c0_49, %c0_50] : memref<188x8xf32, #tpu.memory_space<vmem>>, vector<188x8xf32>
    tpu.vector_store %arg9[%c0_49, %c0_50], %43 {strides = array<i32>} : memref<188x8xf32, #tpu.memory_space<vmem>>, vector<188x8xf32>,
    %c0_51 = arith.constant 0 : index
    %c0_52 = arith.constant 0 : index
    %45 = vector.load %arg9[%c0_51, %c0_52] : memref<188x8xf32, #tpu.memory_space<vmem>>, vector<12x8xf32>
    %c0_53 = arith.constant 0 : index
    %c0_54 = arith.constant 0 : index
    %c0_55 = arith.constant 0 : index
    %c0_56 = arith.constant 0 : index
    %46 = vector.load %arg6[%c0_53, %c0_54, %c0_55, %c0_56] : memref<1x12x12x8xf32, #tpu.memory_space<vmem>>, vector<1x1x12x8xf32>
    %47 = vector.shape_cast %46 : vector<1x1x12x8xf32> to vector<12x8xf32>
    %48 = vector.shape_cast %45 : vector<12x8xf32> to vector<1x1x12x8xf32>
    tpu.vector_store %arg6[%c0_53, %c0_54, %c0_55, %c0_56], %48 {strides = array<i32>} : memref<1x12x12x8xf32, #tpu.memory_space<vmem>>, vector<1x1x12x8xf32>,
    %c16_57 = arith.constant 16 : index
    %c0_58 = arith.constant 0 : index
    %49 = vector.load %arg9[%c16_57, %c0_58] : memref<188x8xf32, #tpu.memory_space<vmem>>, vector<12x8xf32>
    %c0_59 = arith.constant 0 : index
    %c1_60 = arith.constant 1 : index
    %c0_61 = arith.constant 0 : index
    %c0_62 = arith.constant 0 : index
    %50 = vector.load %arg6[%c0_59, %c1_60, %c0_61, %c0_62] : memref<1x12x12x8xf32, #tpu.memory_space<vmem>>, vector<1x1x12x8xf32>
    %51 = vector.shape_cast %50 : vector<1x1x12x8xf32> to vector<12x8xf32>
    %52 = vector.shape_cast %49 : vector<12x8xf32> to vector<1x1x12x8xf32>
    tpu.vector_store %arg6[%c0_59, %c1_60, %c0_61, %c0_62], %52 {strides = array<i32>} : memref<1x12x12x8xf32, #tpu.memory_space<vmem>>, vector<1x1x12x8xf32>,
    %c32_63 = arith.constant 32 : index
    %c0_64 = arith.constant 0 : index
    %53 = vector.load %arg9[%c32_63, %c0_64] : memref<188x8xf32, #tpu.memory_space<vmem>>, vector<12x8xf32>
    %c0_65 = arith.constant 0 : index
    %c2_66 = arith.constant 2 : index
    %c0_67 = arith.constant 0 : index
    %c0_68 = arith.constant 0 : index
    %54 = vector.load %arg6[%c0_65, %c2_66, %c0_67, %c0_68] : memref<1x12x12x8xf32, #tpu.memory_space<vmem>>, vector<1x1x12x8xf32>
    %55 = vector.shape_cast %54 : vector<1x1x12x8xf32> to vector<12x8xf32>
    %56 = vector.shape_cast %53 : vector<12x8xf32> to vector<1x1x12x8xf32>
    tpu.vector_store %arg6[%c0_65, %c2_66, %c0_67, %c0_68], %56 {strides = array<i32>} : memref<1x12x12x8xf32, #tpu.memory_space<vmem>>, vector<1x1x12x8xf32>,
    %c48 = arith.constant 48 : index
    %c0_69 = arith.constant 0 : index
    %57 = vector.load %arg9[%c48, %c0_69] : memref<188x8xf32, #tpu.memory_space<vmem>>, vector<12x8xf32>
    %c0_70 = arith.constant 0 : index
    %c3 = arith.constant 3 : index
    %c0_71 = arith.constant 0 : index
    %c0_72 = arith.constant 0 : index
    %58 = vector.load %arg6[%c0_70, %c3, %c0_71, %c0_72] : memref<1x12x12x8xf32, #tpu.memory_space<vmem>>, vector<1x1x12x8xf32>
    %59 = vector.shape_cast %58 : vector<1x1x12x8xf32> to vector<12x8xf32>
    %60 = vector.shape_cast %57 : vector<12x8xf32> to vector<1x1x12x8xf32>
    tpu.vector_store %arg6[%c0_70, %c3, %c0_71, %c0_72], %60 {strides = array<i32>} : memref<1x12x12x8xf32, #tpu.memory_space<vmem>>, vector<1x1x12x8xf32>,
    %c64 = arith.constant 64 : index
    %c0_73 = arith.constant 0 : index
    %61 = vector.load %arg9[%c64, %c0_73] : memref<188x8xf32, #tpu.memory_space<vmem>>, vector<12x8xf32>
    %c0_74 = arith.constant 0 : index
    %c4 = arith.constant 4 : index
    %c0_75 = arith.constant 0 : index
    %c0_76 = arith.constant 0 : index
    %62 = vector.load %arg6[%c0_74, %c4, %c0_75, %c0_76] : memref<1x12x12x8xf32, #tpu.memory_space<vmem>>, vector<1x1x12x8xf32>
    %63 = vector.shape_cast %62 : vector<1x1x12x8xf32> to vector<12x8xf32>
    %64 = vector.shape_cast %61 : vector<12x8xf32> to vector<1x1x12x8xf32>
    tpu.vector_store %arg6[%c0_74, %c4, %c0_75, %c0_76], %64 {strides = array<i32>} : memref<1x12x12x8xf32, #tpu.memory_space<vmem>>, vector<1x1x12x8xf32>,
    %c80 = arith.constant 80 : index
    %c0_77 = arith.constant 0 : index
    %65 = vector.load %arg9[%c80, %c0_77] : memref<188x8xf32, #tpu.memory_space<vmem>>, vector<12x8xf32>
    %c0_78 = arith.constant 0 : index
    %c5 = arith.constant 5 : index
    %c0_79 = arith.constant 0 : index
    %c0_80 = arith.constant 0 : index
    %66 = vector.load %arg6[%c0_78, %c5, %c0_79, %c0_80] : memref<1x12x12x8xf32, #tpu.memory_space<vmem>>, vector<1x1x12x8xf32>
    %67 = vector.shape_cast %66 : vector<1x1x12x8xf32> to vector<12x8xf32>
    %68 = vector.shape_cast %65 : vector<12x8xf32> to vector<1x1x12x8xf32>
    tpu.vector_store %arg6[%c0_78, %c5, %c0_79, %c0_80], %68 {strides = array<i32>} : memref<1x12x12x8xf32, #tpu.memory_space<vmem>>, vector<1x1x12x8xf32>,
    %c96 = arith.constant 96 : index
    %c0_81 = arith.constant 0 : index
    %69 = vector.load %arg9[%c96, %c0_81] : memref<188x8xf32, #tpu.memory_space<vmem>>, vector<12x8xf32>
    %c0_82 = arith.constant 0 : index
    %c6 = arith.constant 6 : index
    %c0_83 = arith.constant 0 : index
    %c0_84 = arith.constant 0 : index
    %70 = vector.load %arg6[%c0_82, %c6, %c0_83, %c0_84] : memref<1x12x12x8xf32, #tpu.memory_space<vmem>>, vector<1x1x12x8xf32>
    %71 = vector.shape_cast %70 : vector<1x1x12x8xf32> to vector<12x8xf32>
    %72 = vector.shape_cast %69 : vector<12x8xf32> to vector<1x1x12x8xf32>
    tpu.vector_store %arg6[%c0_82, %c6, %c0_83, %c0_84], %72 {strides = array<i32>} : memref<1x12x12x8xf32, #tpu.memory_space<vmem>>, vector<1x1x12x8xf32>,
    %c112 = arith.constant 112 : index
    %c0_85 = arith.constant 0 : index
    %73 = vector.load %arg9[%c112, %c0_85] : memref<188x8xf32, #tpu.memory_space<vmem>>, vector<12x8xf32>
    %c0_86 = arith.constant 0 : index
    %c7 = arith.constant 7 : index
    %c0_87 = arith.constant 0 : index
    %c0_88 = arith.constant 0 : index
    %74 = vector.load %arg6[%c0_86, %c7, %c0_87, %c0_88] : memref<1x12x12x8xf32, #tpu.memory_space<vmem>>, vector<1x1x12x8xf32>
    %75 = vector.shape_cast %74 : vector<1x1x12x8xf32> to vector<12x8xf32>
    %76 = vector.shape_cast %73 : vector<12x8xf32> to vector<1x1x12x8xf32>
    tpu.vector_store %arg6[%c0_86, %c7, %c0_87, %c0_88], %76 {strides = array<i32>} : memref<1x12x12x8xf32, #tpu.memory_space<vmem>>, vector<1x1x12x8xf32>,
    %c128 = arith.constant 128 : index
    %c0_89 = arith.constant 0 : index
    %77 = vector.load %arg9[%c128, %c0_89] : memref<188x8xf32, #tpu.memory_space<vmem>>, vector<12x8xf32>
    %c0_90 = arith.constant 0 : index
    %c8 = arith.constant 8 : index
    %c0_91 = arith.constant 0 : index
    %c0_92 = arith.constant 0 : index
    %78 = vector.load %arg6[%c0_90, %c8, %c0_91, %c0_92] : memref<1x12x12x8xf32, #tpu.memory_space<vmem>>, vector<1x1x12x8xf32>
    %79 = vector.shape_cast %78 : vector<1x1x12x8xf32> to vector<12x8xf32>
    %80 = vector.shape_cast %77 : vector<12x8xf32> to vector<1x1x12x8xf32>
    tpu.vector_store %arg6[%c0_90, %c8, %c0_91, %c0_92], %80 {strides = array<i32>} : memref<1x12x12x8xf32, #tpu.memory_space<vmem>>, vector<1x1x12x8xf32>,
    %c144 = arith.constant 144 : index
    %c0_93 = arith.constant 0 : index
    %81 = vector.load %arg9[%c144, %c0_93] : memref<188x8xf32, #tpu.memory_space<vmem>>, vector<12x8xf32>
    %c0_94 = arith.constant 0 : index
    %c9 = arith.constant 9 : index
    %c0_95 = arith.constant 0 : index
    %c0_96 = arith.constant 0 : index
    %82 = vector.load %arg6[%c0_94, %c9, %c0_95, %c0_96] : memref<1x12x12x8xf32, #tpu.memory_space<vmem>>, vector<1x1x12x8xf32>
    %83 = vector.shape_cast %82 : vector<1x1x12x8xf32> to vector<12x8xf32>
    %84 = vector.shape_cast %81 : vector<12x8xf32> to vector<1x1x12x8xf32>
    tpu.vector_store %arg6[%c0_94, %c9, %c0_95, %c0_96], %84 {strides = array<i32>} : memref<1x12x12x8xf32, #tpu.memory_space<vmem>>, vector<1x1x12x8xf32>,
    %c160 = arith.constant 160 : index
    %c0_97 = arith.constant 0 : index
    %85 = vector.load %arg9[%c160, %c0_97] : memref<188x8xf32, #tpu.memory_space<vmem>>, vector<12x8xf32>
    %c0_98 = arith.constant 0 : index
    %c10 = arith.constant 10 : index
    %c0_99 = arith.constant 0 : index
    %c0_100 = arith.constant 0 : index
    %86 = vector.load %arg6[%c0_98, %c10, %c0_99, %c0_100] : memref<1x12x12x8xf32, #tpu.memory_space<vmem>>, vector<1x1x12x8xf32>
    %87 = vector.shape_cast %86 : vector<1x1x12x8xf32> to vector<12x8xf32>
    %88 = vector.shape_cast %85 : vector<12x8xf32> to vector<1x1x12x8xf32>
    tpu.vector_store %arg6[%c0_98, %c10, %c0_99, %c0_100], %88 {strides = array<i32>} : memref<1x12x12x8xf32, #tpu.memory_space<vmem>>, vector<1x1x12x8xf32>,
    %c176 = arith.constant 176 : index
    %c0_101 = arith.constant 0 : index
    %89 = vector.load %arg9[%c176, %c0_101] : memref<188x8xf32, #tpu.memory_space<vmem>>, vector<12x8xf32>
    %c0_102 = arith.constant 0 : index
    %c11 = arith.constant 11 : index
    %c0_103 = arith.constant 0 : index
    %c0_104 = arith.constant 0 : index
    %90 = vector.load %arg6[%c0_102, %c11, %c0_103, %c0_104] : memref<1x12x12x8xf32, #tpu.memory_space<vmem>>, vector<1x1x12x8xf32>
    %91 = vector.shape_cast %90 : vector<1x1x12x8xf32> to vector<12x8xf32>
    %92 = vector.shape_cast %89 : vector<12x8xf32> to vector<1x1x12x8xf32>
    tpu.vector_store %arg6[%c0_102, %c11, %c0_103, %c0_104], %92 {strides = array<i32>} : memref<1x12x12x8xf32, #tpu.memory_space<vmem>>, vector<1x1x12x8xf32>,
    %c0_105 = arith.constant 0 : index
    %c0_106 = arith.constant 0 : index
    %93 = tpu.strided_load %arg9[%c0_105, %c0_106] {strides = array<i32: 2, 1>} : memref<188x8xf32, #tpu.memory_space<vmem>>, vector<6x8xf32>
    %c1_107 = arith.constant 1 : index
    %c0_108 = arith.constant 0 : index
    %94 = tpu.strided_load %arg9[%c1_107, %c0_108] {strides = array<i32: 2, 1>} : memref<188x8xf32, #tpu.memory_space<vmem>>, vector<6x8xf32>
    %c16_109 = arith.constant 16 : index
    %c0_110 = arith.constant 0 : index
    %95 = tpu.strided_load %arg9[%c16_109, %c0_110] {strides = array<i32: 2, 1>} : memref<188x8xf32, #tpu.memory_space<vmem>>, vector<6x8xf32>
    %c17_111 = arith.constant 17 : index
    %c0_112 = arith.constant 0 : index
    %96 = tpu.strided_load %arg9[%c17_111, %c0_112] {strides = array<i32: 2, 1>} : memref<188x8xf32, #tpu.memory_space<vmem>>, vector<6x8xf32>
    %97 = arith.maximumf %93, %94 : vector<6x8xf32>
    %98 = arith.maximumf %95, %96 : vector<6x8xf32>
    %99 = arith.maximumf %97, %98 : vector<6x8xf32>
    %c0_113 = arith.constant 0 : index
    %c0_114 = arith.constant 0 : index
    %c0_115 = arith.constant 0 : index
    %c0_116 = arith.constant 0 : index
    %100 = vector.load %arg7[%c0_113, %c0_114, %c0_115, %c0_116] : memref<1x6x6x8xf32, #tpu.memory_space<vmem>>, vector<1x1x6x8xf32>
    %101 = vector.shape_cast %100 : vector<1x1x6x8xf32> to vector<6x8xf32>
    %102 = vector.shape_cast %99 : vector<6x8xf32> to vector<1x1x6x8xf32>
    tpu.vector_store %arg7[%c0_113, %c0_114, %c0_115, %c0_116], %102 {strides = array<i32>} : memref<1x6x6x8xf32, #tpu.memory_space<vmem>>, vector<1x1x6x8xf32>,
    %c32_117 = arith.constant 32 : index
    %c0_118 = arith.constant 0 : index
    %103 = tpu.strided_load %arg9[%c32_117, %c0_118] {strides = array<i32: 2, 1>} : memref<188x8xf32, #tpu.memory_space<vmem>>, vector<6x8xf32>
    %c33_119 = arith.constant 33 : index
    %c0_120 = arith.constant 0 : index
    %104 = tpu.strided_load %arg9[%c33_119, %c0_120] {strides = array<i32: 2, 1>} : memref<188x8xf32, #tpu.memory_space<vmem>>, vector<6x8xf32>
    %c48_121 = arith.constant 48 : index
    %c0_122 = arith.constant 0 : index
    %105 = tpu.strided_load %arg9[%c48_121, %c0_122] {strides = array<i32: 2, 1>} : memref<188x8xf32, #tpu.memory_space<vmem>>, vector<6x8xf32>
    %c49 = arith.constant 49 : index
    %c0_123 = arith.constant 0 : index
    %106 = tpu.strided_load %arg9[%c49, %c0_123] {strides = array<i32: 2, 1>} : memref<188x8xf32, #tpu.memory_space<vmem>>, vector<6x8xf32>
    %107 = arith.maximumf %103, %104 : vector<6x8xf32>
    %108 = arith.maximumf %105, %106 : vector<6x8xf32>
    %109 = arith.maximumf %107, %108 : vector<6x8xf32>
    %c0_124 = arith.constant 0 : index
    %c1_125 = arith.constant 1 : index
    %c0_126 = arith.constant 0 : index
    %c0_127 = arith.constant 0 : index
    %110 = vector.load %arg7[%c0_124, %c1_125, %c0_126, %c0_127] : memref<1x6x6x8xf32, #tpu.memory_space<vmem>>, vector<1x1x6x8xf32>
    %111 = vector.shape_cast %110 : vector<1x1x6x8xf32> to vector<6x8xf32>
    %112 = vector.shape_cast %109 : vector<6x8xf32> to vector<1x1x6x8xf32>
    tpu.vector_store %arg7[%c0_124, %c1_125, %c0_126, %c0_127], %112 {strides = array<i32>} : memref<1x6x6x8xf32, #tpu.memory_space<vmem>>, vector<1x1x6x8xf32>,
    %c64_128 = arith.constant 64 : index
    %c0_129 = arith.constant 0 : index
    %113 = tpu.strided_load %arg9[%c64_128, %c0_129] {strides = array<i32: 2, 1>} : memref<188x8xf32, #tpu.memory_space<vmem>>, vector<6x8xf32>
    %c65 = arith.constant 65 : index
    %c0_130 = arith.constant 0 : index
    %114 = tpu.strided_load %arg9[%c65, %c0_130] {strides = array<i32: 2, 1>} : memref<188x8xf32, #tpu.memory_space<vmem>>, vector<6x8xf32>
    %c80_131 = arith.constant 80 : index
    %c0_132 = arith.constant 0 : index
    %115 = tpu.strided_load %arg9[%c80_131, %c0_132] {strides = array<i32: 2, 1>} : memref<188x8xf32, #tpu.memory_space<vmem>>, vector<6x8xf32>
    %c81 = arith.constant 81 : index
    %c0_133 = arith.constant 0 : index
    %116 = tpu.strided_load %arg9[%c81, %c0_133] {strides = array<i32: 2, 1>} : memref<188x8xf32, #tpu.memory_space<vmem>>, vector<6x8xf32>
    %117 = arith.maximumf %113, %114 : vector<6x8xf32>
    %118 = arith.maximumf %115, %116 : vector<6x8xf32>
    %119 = arith.maximumf %117, %118 : vector<6x8xf32>
    %c0_134 = arith.constant 0 : index
    %c2_135 = arith.constant 2 : index
    %c0_136 = arith.constant 0 : index
    %c0_137 = arith.constant 0 : index
    %120 = vector.load %arg7[%c0_134, %c2_135, %c0_136, %c0_137] : memref<1x6x6x8xf32, #tpu.memory_space<vmem>>, vector<1x1x6x8xf32>
    %121 = vector.shape_cast %120 : vector<1x1x6x8xf32> to vector<6x8xf32>
    %122 = vector.shape_cast %119 : vector<6x8xf32> to vector<1x1x6x8xf32>
    tpu.vector_store %arg7[%c0_134, %c2_135, %c0_136, %c0_137], %122 {strides = array<i32>} : memref<1x6x6x8xf32, #tpu.memory_space<vmem>>, vector<1x1x6x8xf32>,
    %c96_138 = arith.constant 96 : index
    %c0_139 = arith.constant 0 : index
    %123 = tpu.strided_load %arg9[%c96_138, %c0_139] {strides = array<i32: 2, 1>} : memref<188x8xf32, #tpu.memory_space<vmem>>, vector<6x8xf32>
    %c97 = arith.constant 97 : index
    %c0_140 = arith.constant 0 : index
    %124 = tpu.strided_load %arg9[%c97, %c0_140] {strides = array<i32: 2, 1>} : memref<188x8xf32, #tpu.memory_space<vmem>>, vector<6x8xf32>
    %c112_141 = arith.constant 112 : index
    %c0_142 = arith.constant 0 : index
    %125 = tpu.strided_load %arg9[%c112_141, %c0_142] {strides = array<i32: 2, 1>} : memref<188x8xf32, #tpu.memory_space<vmem>>, vector<6x8xf32>
    %c113 = arith.constant 113 : index
    %c0_143 = arith.constant 0 : index
    %126 = tpu.strided_load %arg9[%c113, %c0_143] {strides = array<i32: 2, 1>} : memref<188x8xf32, #tpu.memory_space<vmem>>, vector<6x8xf32>
    %127 = arith.maximumf %123, %124 : vector<6x8xf32>
    %128 = arith.maximumf %125, %126 : vector<6x8xf32>
    %129 = arith.maximumf %127, %128 : vector<6x8xf32>
    %c0_144 = arith.constant 0 : index
    %c3_145 = arith.constant 3 : index
    %c0_146 = arith.constant 0 : index
    %c0_147 = arith.constant 0 : index
    %130 = vector.load %arg7[%c0_144, %c3_145, %c0_146, %c0_147] : memref<1x6x6x8xf32, #tpu.memory_space<vmem>>, vector<1x1x6x8xf32>
    %131 = vector.shape_cast %130 : vector<1x1x6x8xf32> to vector<6x8xf32>
    %132 = vector.shape_cast %129 : vector<6x8xf32> to vector<1x1x6x8xf32>
    tpu.vector_store %arg7[%c0_144, %c3_145, %c0_146, %c0_147], %132 {strides = array<i32>} : memref<1x6x6x8xf32, #tpu.memory_space<vmem>>, vector<1x1x6x8xf32>,
    %c128_148 = arith.constant 128 : index
    %c0_149 = arith.constant 0 : index
    %133 = tpu.strided_load %arg9[%c128_148, %c0_149] {strides = array<i32: 2, 1>} : memref<188x8xf32, #tpu.memory_space<vmem>>, vector<6x8xf32>
    %c129 = arith.constant 129 : index
    %c0_150 = arith.constant 0 : index
    %134 = tpu.strided_load %arg9[%c129, %c0_150] {strides = array<i32: 2, 1>} : memref<188x8xf32, #tpu.memory_space<vmem>>, vector<6x8xf32>
    %c144_151 = arith.constant 144 : index
    %c0_152 = arith.constant 0 : index
    %135 = tpu.strided_load %arg9[%c144_151, %c0_152] {strides = array<i32: 2, 1>} : memref<188x8xf32, #tpu.memory_space<vmem>>, vector<6x8xf32>
    %c145 = arith.constant 145 : index
    %c0_153 = arith.constant 0 : index
    %136 = tpu.strided_load %arg9[%c145, %c0_153] {strides = array<i32: 2, 1>} : memref<188x8xf32, #tpu.memory_space<vmem>>, vector<6x8xf32>
    %137 = arith.maximumf %133, %134 : vector<6x8xf32>
    %138 = arith.maximumf %135, %136 : vector<6x8xf32>
    %139 = arith.maximumf %137, %138 : vector<6x8xf32>
    %c0_154 = arith.constant 0 : index
    %c4_155 = arith.constant 4 : index
    %c0_156 = arith.constant 0 : index
    %c0_157 = arith.constant 0 : index
    %140 = vector.load %arg7[%c0_154, %c4_155, %c0_156, %c0_157] : memref<1x6x6x8xf32, #tpu.memory_space<vmem>>, vector<1x1x6x8xf32>
    %141 = vector.shape_cast %140 : vector<1x1x6x8xf32> to vector<6x8xf32>
    %142 = vector.shape_cast %139 : vector<6x8xf32> to vector<1x1x6x8xf32>
    tpu.vector_store %arg7[%c0_154, %c4_155, %c0_156, %c0_157], %142 {strides = array<i32>} : memref<1x6x6x8xf32, #tpu.memory_space<vmem>>, vector<1x1x6x8xf32>,
    %c160_158 = arith.constant 160 : index
    %c0_159 = arith.constant 0 : index
    %143 = tpu.strided_load %arg9[%c160_158, %c0_159] {strides = array<i32: 2, 1>} : memref<188x8xf32, #tpu.memory_space<vmem>>, vector<6x8xf32>
    %c161 = arith.constant 161 : index
    %c0_160 = arith.constant 0 : index
    %144 = tpu.strided_load %arg9[%c161, %c0_160] {strides = array<i32: 2, 1>} : memref<188x8xf32, #tpu.memory_space<vmem>>, vector<6x8xf32>
    %c176_161 = arith.constant 176 : index
    %c0_162 = arith.constant 0 : index
    %145 = tpu.strided_load %arg9[%c176_161, %c0_162] {strides = array<i32: 2, 1>} : memref<188x8xf32, #tpu.memory_space<vmem>>, vector<6x8xf32>
    %c177 = arith.constant 177 : index
    %c0_163 = arith.constant 0 : index
    %146 = tpu.strided_load %arg9[%c177, %c0_163] {strides = array<i32: 2, 1>} : memref<188x8xf32, #tpu.memory_space<vmem>>, vector<6x8xf32>
    %147 = arith.maximumf %143, %144 : vector<6x8xf32>
    %148 = arith.maximumf %145, %146 : vector<6x8xf32>
    %149 = arith.maximumf %147, %148 : vector<6x8xf32>
    %c0_164 = arith.constant 0 : index
    %c5_165 = arith.constant 5 : index
    %c0_166 = arith.constant 0 : index
    %c0_167 = arith.constant 0 : index
    %150 = vector.load %arg7[%c0_164, %c5_165, %c0_166, %c0_167] : memref<1x6x6x8xf32, #tpu.memory_space<vmem>>, vector<1x1x6x8xf32>
    %151 = vector.shape_cast %150 : vector<1x1x6x8xf32> to vector<6x8xf32>
    %152 = vector.shape_cast %149 : vector<6x8xf32> to vector<1x1x6x8xf32>
    tpu.vector_store %arg7[%c0_164, %c5_165, %c0_166, %c0_167], %152 {strides = array<i32>} : memref<1x6x6x8xf32, #tpu.memory_space<vmem>>, vector<1x1x6x8xf32>,
    return
  }
  func.func @transform_0(%arg0: i32) -> (i32, i32, i32) {
    %c0_i32 = arith.constant 0 : i32
    %c0_i32_0 = arith.constant 0 : i32
    %c0_i32_1 = arith.constant 0 : i32
    return %arg0, %c0_i32, %c0_i32_0 : i32, i32, i32
  }
  func.func @transform_1(%arg0: i32) -> (i32, i32) {
    %c0_i32 = arith.constant 0 : i32
    %c0_i32_0 = arith.constant 0 : i32
    %c0_i32_1 = arith.constant 0 : i32
    return %c0_i32, %c0_i32_0 : i32, i32
  }
  func.func @transform_2(%arg0: i32) -> (i32, i32) {
    %c0_i32 = arith.constant 0 : i32
    %c0_i32_0 = arith.constant 0 : i32
    %c0_i32_1 = arith.constant 0 : i32
    return %c0_i32, %c0_i32_0 : i32, i32
  }
  func.func @transform_3(%arg0: i32) -> (i32, i32) {
    %c0_i32 = arith.constant 0 : i32
    %c0_i32_0 = arith.constant 0 : i32
    %c0_i32_1 = arith.constant 0 : i32
    return %c0_i32, %c0_i32_0 : i32, i32
  }
  func.func @transform_4(%arg0: i32) -> (i32, i32) {
    %c0_i32 = arith.constant 0 : i32
    %c0_i32_0 = arith.constant 0 : i32
    %c0_i32_1 = arith.constant 0 : i32
    return %c0_i32, %c0_i32_0 : i32, i32
  }
  func.func @transform_5(%arg0: i32) -> (i32, i32, i32, i32) {
    %c0_i32 = arith.constant 0 : i32
    %c0_i32_0 = arith.constant 0 : i32
    %c0_i32_1 = arith.constant 0 : i32
    %c0_i32_2 = arith.constant 0 : i32
    return %arg0, %c0_i32, %c0_i32_0, %c0_i32_1 : i32, i32, i32, i32
  }
  func.func @transform_6(%arg0: i32) -> (i32, i32, i32, i32) {
    %c0_i32 = arith.constant 0 : i32
    %c0_i32_0 = arith.constant 0 : i32
    %c0_i32_1 = arith.constant 0 : i32
    %c0_i32_2 = arith.constant 0 : i32
    return %arg0, %c0_i32, %c0_i32_0, %c0_i32_1 : i32, i32, i32, i32
  }
}

</mosaic_0001>

<bundles_post_ra>
// kernel: unet_down_forward.1
= control target key start
LH: loop header
LB: loop body
LE: loop exit
PB: predicated region body
PF: predicated region fallthrough
CT: control target
= control target key end

     0   :  { %s3598_s21 = smov 0   ;;  %s5864_s0 = inlined_call_operand.vmem [shape: f32[2,256,4], index: 0, kind: input, shape index: {}]   ;;  %s5865_s1 = inlined_call_operand.vmem [shape: f32[36,8], index: 1, kind: input, shape index: {}]   ;;  %s5866_s2 = inlined_call_operand.vmem [shape: f32[1,8], index: 2, kind: input, shape index: {}]   ;;  %s5867_s3 = inlined_call_operand.vmem [shape: f32[72,8], index: 3, kind: input, shape index: {}]   ;;  %s5868_s4 = inlined_call_operand.vmem [shape: f32[1,8], index: 4, kind: input, shape index: {}]   ;;  %s5869_s5 = inlined_call_operand.vmem [shape: f32[2,12,12,8], index: 5, kind: output, shape index: {0}]   ;;  %s5870_s6 = inlined_call_operand.vmem [shape: f32[2,6,6,8], index: 6, kind: output, shape index: {1}]  }
   0x1 LB: > { %s3228_s22 = sadd.s32 4294967295, %s3549_s21   ;;  %p3232_p0 = scmp.ge.s32.totalorder %s3549_s21, 1  ;;  %s3549_s21 = sphi %s3598_s21, %s17_s21  }
   0x2   : > { %p215_p1 = scmp.lt.s32.totalorder %s3549_s21, 3 }
   0x4   : > { %p216_p2 = pnand %p3232_p0, %p215_p1 }
   0x6   : > { %219 = sbr.rel (%p216_p2) target bundleno = 1460 (0x5b4), region = 40 }
   0xd   : > { %p250_p3 = scmp.lt.s32.totalorder %s3228_s22, 1  ;;  %s3551_s27 = smov 4   ;;  %vm1467_vm0 = vcmask 1043456   ;;  %vm1138_vm1 = vcmask 31744   ;;  %vm1167_vm2 = vcmask 64512   ;;  %vm1196_vm3 = vcmask 97280  }
   0xe   : > { %s3552_s28 = smov 8   ;;  %s3553_s29 = smov 12   ;;  %vm1225_vm4 = vcmask 130048   ;;  %vm1254_vm5 = vcmask 162816   ;;  %vm1283_vm6 = vcmask 195584   ;;  %vm1312_vm7 = vcmask 228352  }
   0xf   : > { %s6082_s22 = smov (!%p250_p3, %s3228_s22), 1  ;;  %s3554_s30 = smov 16   ;;  %vm1341_vm8 = vcmask 261120   ;;  %vm1382_vm9 = vcmask 293888   ;;  %vm1731_vm10 = vcmask 62464   ;;  %vm2582_vm11 = vcmask 326656  }
  0x10   : > { %s3321_s23 = sshll.u32 %s6082_s22, 8  ;;  %s3555_s15 = smov 20   ;;  %vm2607_vm12 = vcmask 392192   ;;  %vm2632_vm13 = vcmask 457728   ;;  %vm2657_vm14 = vcmask 523264   ;;  %vm2698_vm15 = vcmask 588800  }
  0x11   : > { %s3612_s26 = scalar_lea.vmem %s5864_s0, %s3321_s23  ;;  %s3556_s18 = smov 24  }
  0x12   : > { %v3615_v0 = vld [vmem:[%s3612_s26 + $0x11] sm:$0xff]  ;;  %v293_v1 = vld [vmem:[%s3612_s26 + $0x1] sm:$0xff]  ;;  %v3622_v2 = vld [vmem:[%s3612_s26 + $0x19] sm:$0xff]  ;;  %s3557_s19 = smov 28   ;;  %s3558_s20 = smov 32  }
  0x13   : > { %399 = vrot.lane.b32.xlu1 %v3615_v0, %s3551_s27  ;;  %395 = vrot.lane.b32.xlu0 %v293_v1, %s3551_s27  ;;  %v294_v3 = vld [vmem:[%s3612_s26 + $0x9] sm:$0xff]  ;;  %v3632_v5 = vld [vmem:[%s3612_s26 + $0x21] sm:$0xff]  ;;  %s3559_s7 = smov 40   ;;  %s3560_s12 = smov 48  }
  0x14   : > { %v3629_v4 = vld [vmem:[%s3612_s26 + $0x29] sm:$0xff]  ;;  %v3639_v6 = vld [vmem:[%s3612_s26 + $0x39] sm:$0xff]  ;;  %v3642_v7 = vld [vmem:[%s3612_s26 + $0x31] sm:$0xff]  ;;  %s3561_s25 = smov 56   ;;  %s3519_s9 = smul.u32 48, %s6082_s22 }
  0x15   : > { %v3649_v8 = vld [vmem:[%s3612_s26 + $0x49] sm:$0xff]  ;;  %v3652_v9 = vld [vmem:[%s3612_s26 + $0x41] sm:$0xff]  ;;  %v3659_v10 = vld [vmem:[%s3612_s26 + $0x59] sm:$0xff] }
  0x16   : > { %v3662_v11 = vld [vmem:[%s3612_s26 + $0x51] sm:$0xff]  ;;  %v3669_v12 = vld [vmem:[%s3612_s26 + $0x69] sm:$0xff]  ;;  %v3672_v13 = vld [vmem:[%s3612_s26 + $0x61] sm:$0xff] }
  0x17   : > { %401 = vrot.lane.b32.xlu1 %v3622_v2, %s3551_s27  ;;  %397 = vrot.lane.b32.xlu0 %v294_v3, %s3551_s27  ;;  %5937 = vst [vmem:[#allocation4_spill] sm:$0xff] %v3672_v13  ;;  %v3679_v14 = vld [vmem:[%s3612_s26 + $0x79] sm:$0xff]  ;;  %v3682_v15 = vld [vmem:[%s3612_s26 + $0x71] sm:$0xff] }
  0x18   : > { %5938 = vst [vmem:[#allocation5_spill] sm:$0xff] %v3682_v15  ;;  %v3689_v16 = vld [vmem:[%s3612_s26 + $0x89] sm:$0xff]  ;;  %v3692_v17 = vld [vmem:[%s3612_s26 + $0x81] sm:$0xff]  ;;  %v3699_v18 = vld [vmem:[%s3612_s26 + $0x99] sm:$0xff] }
  0x19   : > { %5939 = vst [vmem:[#allocation6_spill] sm:$0xff] %v3689_v16  ;;  %5940 = vst [vmem:[#allocation7_spill] sm:$0xff] %v3692_v17  ;;  %v3702_v19 = vld [vmem:[%s3612_s26 + $0x91] sm:$0xff]  ;;  %v3709_v20 = vld [vmem:[%s3612_s26 + $0xa9] sm:$0xff] }
  0x1a   : > { %5941 = vst [vmem:[#allocation8_spill] sm:$0xff] %v3699_v18  ;;  %5942 = vst [vmem:[#allocation9_spill] sm:$0xff] %v3702_v19  ;;  %v3712_v21 = vld [vmem:[%s3612_s26 + $0xa1] sm:$0xff]  ;;  %v3719_v22 = vld [vmem:[%s3612_s26 + $0xb9] sm:$0xff] }
  0x1b   : > { %405 = vrot.lane.b32.xlu1 %v3629_v4, %s3551_s27  ;;  %403 = vrot.lane.b32.xlu0 %v3632_v5, %s3551_s27  ;;  %5943 = vst [vmem:[#allocation10_spill] sm:$0xff] %v3709_v20  ;;  %5944 = vst [vmem:[#allocation11_spill] sm:$0xff] %v3712_v21  ;;  %v3722_v23 = vld [vmem:[%s3612_s26 + $0xb1] sm:$0xff]  ;;  %v318_v24 = vld [vmem:[%s3612_s26 + $0xc9] sm:$0xff] }
  0x1c   : > { %5945 = vst [vmem:[#allocation12_spill] sm:$0xff] %v3719_v22  ;;  %5946 = vst [vmem:[#allocation13_spill] sm:$0xff] %v3722_v23  ;;  %v317_v25 = vld [vmem:[%s3612_s26 + $0xc1] sm:$0xff]  ;;  %v320_v26 = vld [vmem:[%s3612_s26 + $0xd9] sm:$0x3f] }
  0x1d   : > { %v319_v27 = vld [vmem:[%s3612_s26 + $0xd1] sm:$0xff]  ;;  %v321_v29 = vld [vmem:[%s3612_s26 + $0x2] sm:$0xff]  ;;  %v3741_v30 = vld [vmem:[%s3612_s26 + $0x1a] sm:$0xff] }
  0x1e   : > { %v322_v28 = vld [vmem:[%s3612_s26 + $0xa] sm:$0xff]  ;;  %v3744_v31 = vld [vmem:[%s3612_s26 + $0x12] sm:$0xff]  ;;  %v3754_v33 = vld [vmem:[%s3612_s26 + $0x22] sm:$0xff] }
  0x1f   : > { %409 = vrot.lane.b32.xlu1 %v3639_v6, %s3551_s27  ;;  %407 = vrot.lane.b32.xlu0 %v3642_v7, %s3551_s27  ;;  %v3751_v32 = vld [vmem:[%s3612_s26 + $0x2a] sm:$0xff]  ;;  %v3761_v34 = vld [vmem:[%s3612_s26 + $0x3a] sm:$0xff] }
  0x20   : > { %v3764_v35 = vld [vmem:[%s3612_s26 + $0x32] sm:$0xff]  ;;  %v3771_v36 = vld [vmem:[%s3612_s26 + $0x4a] sm:$0xff]  ;;  %v3774_v37 = vld [vmem:[%s3612_s26 + $0x42] sm:$0xff] }
  0x21   : > { %v3781_v38 = vld [vmem:[%s3612_s26 + $0x5a] sm:$0xff]  ;;  %v3784_v39 = vld [vmem:[%s3612_s26 + $0x52] sm:$0xff]  ;;  %v3791_v40 = vld [vmem:[%s3612_s26 + $0x6a] sm:$0xff] }
  0x22   : > { %5947 = vst [vmem:[#allocation14_spill] sm:$0xff] %v3791_v40  ;;  %v3794_v41 = vld [vmem:[%s3612_s26 + $0x62] sm:$0xff]  ;;  %v3801_v42 = vld [vmem:[%s3612_s26 + $0x7a] sm:$0xff]  ;;  %v3804_v43 = vld [vmem:[%s3612_s26 + $0x72] sm:$0xff] }
  0x23   : > { %413 = vrot.lane.b32.xlu1 %v3649_v8, %s3551_s27  ;;  %411 = vrot.lane.b32.xlu0 %v3652_v9, %s3551_s27  ;;  %5948 = vst [vmem:[#allocation15_spill] sm:$0xff] %v3794_v41  ;;  %5949 = vst [vmem:[#allocation16_spill] sm:$0xff] %v3801_v42  ;;  %v3811_v44 = vld [vmem:[%s3612_s26 + $0x8a] sm:$0xff]  ;;  %v3814_v45 = vld [vmem:[%s3612_s26 + $0x82] sm:$0xff] }
  0x24   : > { %5950 = vst [vmem:[#allocation17_spill] sm:$0xff] %v3804_v43  ;;  %5951 = vst [vmem:[#allocation18_spill] sm:$0xff] %v3811_v44  ;;  %v3821_v46 = vld [vmem:[%s3612_s26 + $0x9a] sm:$0xff]  ;;  %v3824_v47 = vld [vmem:[%s3612_s26 + $0x92] sm:$0xff] }
  0x25   : > { %5952 = vst [vmem:[#allocation19_spill] sm:$0xff] %v3814_v45  ;;  %5953 = vst [vmem:[#allocation20_spill] sm:$0xff] %v3821_v46  ;;  %v3831_v48 = vld [vmem:[%s3612_s26 + $0xaa] sm:$0xff]  ;;  %v3834_v49 = vld [vmem:[%s3612_s26 + $0xa2] sm:$0xff] }
  0x26   : > { %5954 = vst [vmem:[#allocation21_spill] sm:$0xff] %v3824_v47  ;;  %5955 = vst [vmem:[#allocation22_spill] sm:$0xff] %v3831_v48  ;;  %v3841_v50 = vld [vmem:[%s3612_s26 + $0xba] sm:$0xff]  ;;  %v3844_v51 = vld [vmem:[%s3612_s26 + $0xb2] sm:$0xff] }
  0x27   : > { %417 = vrot.lane.b32.xlu1 %v3659_v10, %s3551_s27  ;;  %415 = vrot.lane.b32.xlu0 %v3662_v11, %s3551_s27  ;;  %5956 = vst [vmem:[#allocation23_spill] sm:$0xff] %v3834_v49  ;;  %5957 = vst [vmem:[#allocation24_spill] sm:$0xff] %v3841_v50  ;;  %v3851_v52 = vld [vmem:[%s3612_s26 + $0xca] sm:$0xff]  ;;  %v3854_v53 = vld [vmem:[%s3612_s26 + $0xc2] sm:$0xff] }
  0x28   : > { %5958 = vst [vmem:[#allocation25_spill] sm:$0xff] %v3844_v51  ;;  %5959 = vst [vmem:[#allocation26_spill] sm:$0xff] %v3851_v52  ;;  %v348_v54 = vld [vmem:[%s3612_s26 + $0xda] sm:$0x3f]  ;;  %v3862_v55 = vld [vmem:[%s3612_s26 + $0xd2] sm:$0xff] }
  0x29   : > { %5960 = vst [vmem:[#allocation27_spill] sm:$0xff] %v3854_v53  ;;  %5961 = vst [vmem:[#allocation28_spill] sm:$0xff] %v3862_v55  ;;  %v3868_v56 = vld [vmem:[%s3612_s26 + $0x18] sm:$0xff]  ;;  %v3871_v57 = vld [vmem:[%s3612_s26 + $0x10] sm:$0xff] }
  0x2a   : > { %5962 = vst [vmem:[#allocation29_spill] sm:$0xff] %v3868_v56  ;;  %5963 = vst [vmem:[#allocation30_spill] sm:$0xff] %v3871_v57  ;;  %v3878_v58 = vld [vmem:[%s3612_s26 + $0x28] sm:$0xff]  ;;  %v3881_v59 = vld [vmem:[%s3612_s26 + $0x20] sm:$0xff] }
  0x2b   : > { %421 = vrot.lane.b32.xlu1 %v3669_v12, %s3551_s27  ;;  %419 = vrot.lane.b32.xlu0 %v3672_v13, %s3551_s27  ;;  %5964 = vst [vmem:[#allocation31_spill] sm:$0xff] %v3878_v58  ;;  %5965 = vst [vmem:[#allocation32_spill] sm:$0xff] %v3881_v59  ;;  %v3892_v62 = vld [vmem:[%s3612_s26 + $0x38] sm:$0xff]  ;;  %v3895_v63 = vld [vmem:[%s3612_s26 + $0x30] sm:$0xff] }
  0x2c   : > { %5968 = vst [vmem:[#allocation35_spill] sm:$0xff] %v3892_v62  ;;  %5969 = vst [vmem:[#allocation36_spill] sm:$0xff] %v3895_v63 }
  0x2f   : > { %425 = vrot.lane.b32.xlu1 %v3679_v14, %s3551_s27  ;;  %423 = vrot.lane.b32.xlu0 %v3682_v15, %s3551_s27 }
  0x33   : > { %429 = vrot.lane.b32.xlu1 %v3689_v16, %s3551_s27  ;;  %427 = vrot.lane.b32.xlu0 %v3692_v17, %s3551_s27 }
  0x37   : > { %433 = vrot.lane.b32.xlu1 %v3699_v18, %s3551_s27  ;;  %431 = vrot.lane.b32.xlu0 %v3702_v19, %s3551_s27 }
  0x3b   : > { %437 = vrot.lane.b32.xlu1 %v3709_v20, %s3551_s27  ;;  %435 = vrot.lane.b32.xlu0 %v3712_v21, %s3551_s27  ;;  %v3979_v21 = vld [vmem:[%s3612_s26 + $0x90] sm:$0xff] }
  0x3f   : > { %441 = vrot.lane.b32.xlu1 %v3719_v22, %s3551_s27  ;;  %439 = vrot.lane.b32.xlu0 %v3722_v23, %s3551_s27 }
  0x43   : > { %445 = vrot.lane.b32.xlu1 %v318_v24, %s3551_s27  ;;  %443 = vrot.lane.b32.xlu0 %v317_v25, %s3551_s27  ;;  %v3906_v24 = vld [vmem:[%s3612_s26 + $0x48] sm:$0xff]  ;;  %v3909_v25 = vld [vmem:[%s3612_s26 + $0x40] sm:$0xff] }
  0x47   : > { %449 = vrot.lane.b32.xlu1 %v320_v26, %s3551_s27  ;;  %447 = vrot.lane.b32.xlu0 %v319_v27, %s3551_s27 }
  0x4b   : > { %509 = vrot.lane.b32.xlu1 %v322_v28, %s3552_s28  ;;  %507 = vrot.lane.b32.xlu0 %v321_v29, %s3552_s28  ;;  %v3920_v28 = vld [vmem:[%s3612_s26 + $0x58] sm:$0xff]  ;;  %v3923_v29 = vld [vmem:[%s3612_s26 + $0x50] sm:$0xff] }
  0x4f   : > { %513 = vrot.lane.b32.xlu1 %v3741_v30, %s3552_s28  ;;  %511 = vrot.lane.b32.xlu0 %v3744_v31, %s3552_s28 }
  0x53   : > { %517 = vrot.lane.b32.xlu1 %v3751_v32, %s3552_s28  ;;  %515 = vrot.lane.b32.xlu0 %v3754_v33, %s3552_s28 }
  0x57   : > { %521 = vrot.lane.b32.xlu1 %v3761_v34, %s3552_s28  ;;  %519 = vrot.lane.b32.xlu0 %v3764_v35, %s3552_s28 }
  0x5b   : > { %525 = vrot.lane.b32.xlu1 %v3771_v36, %s3552_s28  ;;  %523 = vrot.lane.b32.xlu0 %v3774_v37, %s3552_s28 }
  0x5f   : > { %529 = vrot.lane.b32.xlu1 %v3781_v38, %s3552_s28  ;;  %527 = vrot.lane.b32.xlu0 %v3784_v39, %s3552_s28 }
  0x63   : > { %533 = vrot.lane.b32.xlu1 %v3791_v40, %s3552_s28  ;;  %531 = vrot.lane.b32.xlu0 %v3794_v41, %s3552_s28  ;;  %v4032_v40 = vld [vmem:[%s3612_s26 + $0xd8] sm:$0xff]  ;;  %v4035_v41 = vld [vmem:[%s3612_s26 + $0xd0] sm:$0xff] }
  0x64   : > { %5982 = vst [vmem:[#allocation49_spill] sm:$0xff] %v4032_v40  ;;  %5983 = vst [vmem:[#allocation50_spill] sm:$0xff] %v4035_v41 }
  0x67   : > { %537 = vrot.lane.b32.xlu1 %v3801_v42, %s3552_s28  ;;  %535 = vrot.lane.b32.xlu0 %v3804_v43, %s3552_s28 }
  0x6b   : > { %541 = vrot.lane.b32.xlu1 %v3811_v44, %s3552_s28  ;;  %539 = vrot.lane.b32.xlu0 %v3814_v45, %s3552_s28  ;;  %v4018_v44 = vld [vmem:[%s3612_s26 + $0xc8] sm:$0xff]  ;;  %v4021_v45 = vld [vmem:[%s3612_s26 + $0xc0] sm:$0xff] }
  0x6c   : > { %5979 = vst [vmem:[#allocation46_spill] sm:$0xff] %v4018_v44  ;;  %5980 = vst [vmem:[#allocation47_spill] sm:$0xff] %v4021_v45 }
  0x6f   : > { %545 = vrot.lane.b32.xlu1 %v3821_v46, %s3552_s28  ;;  %543 = vrot.lane.b32.xlu0 %v3824_v47, %s3552_s28  ;;  %v4004_v47 = vld [vmem:[%s3612_s26 + $0xb8] sm:$0xff] }
  0x70   : > { %5977 = vst [vmem:[#allocation44_spill] sm:$0xff] %v4004_v47 }
  0x73   : > { %549 = vrot.lane.b32.xlu1 %v3831_v48, %s3552_s28  ;;  %547 = vrot.lane.b32.xlu0 %v3834_v49, %s3552_s28  ;;  %v3965_v48 = vld [vmem:[%s3612_s26 + $0x80] sm:$0xff]  ;;  %v3976_v49 = vld [vmem:[%s3612_s26 + $0x98] sm:$0xff] }
  0x77   : > { %553 = vrot.lane.b32.xlu1 %v3841_v50, %s3552_s28  ;;  %551 = vrot.lane.b32.xlu0 %v3844_v51, %s3552_s28 }
  0x7b   : > { %557 = vrot.lane.b32.xlu1 %v3851_v52, %s3552_s28  ;;  %555 = vrot.lane.b32.xlu0 %v3854_v53, %s3552_s28  ;;  %v3934_v52 = vld [vmem:[%s3612_s26 + $0x68] sm:$0xff]  ;;  %v3937_v53 = vld [vmem:[%s3612_s26 + $0x60] sm:$0xff] }
  0x7f   : > { %561 = vrot.lane.b32.xlu1 %v348_v54, %s3552_s28  ;;  %559 = vrot.lane.b32.xlu0 %v3862_v55, %s3552_s28 }
  0x83   : > { %621 = vrot.lane.b32.xlu1 %v3868_v56, %s3553_s29  ;;  %619 = vrot.lane.b32.xlu0 %v3871_v57, %s3553_s29  ;;  %v3990_v57 = vld [vmem:[%s3612_s26 + $0xa8] sm:$0xff] }
  0x85   : > { %v3883_v60 = vpop.permute.xlu1 %399  ;;  %v3885_v61 = vpop.permute.xlu0 %395 }
  0x86   : > { %5966 = vst [vmem:[#allocation33_spill] sm:$0xff] %v3883_v60  ;;  %5967 = vst [vmem:[#allocation34_spill] sm:$0xff] %v3885_v61  ;;  %v3993_v60 = vld [vmem:[%s3612_s26 + $0xa0] sm:$0xff] }
  0x87   : > { %625 = vrot.lane.b32.xlu1 %v3878_v58, %s3553_s29  ;;  %623 = vrot.lane.b32.xlu0 %v3881_v59, %s3553_s29  ;;  %5976 = vst [vmem:[#allocation43_spill] sm:$0xff] %v3993_v60 }
  0x89   : > { %v3897_v1 = vpop.permute.xlu1 %401  ;;  %v3899_v3 = vpop.permute.xlu0 %397 }
  0x8a   : > { %5970 = vst [vmem:[#allocation37_spill] sm:$0xff] %v3897_v1  ;;  %5971 = vst [vmem:[#allocation38_spill] sm:$0xff] %v3899_v3  ;;  %v4007_v3 = vld [vmem:[%s3612_s26 + $0xb0] sm:$0xff] }
  0x8b   : > { %629 = vrot.lane.b32.xlu1 %v3892_v62, %s3553_s29  ;;  %627 = vrot.lane.b32.xlu0 %v3895_v63, %s3553_s29  ;;  %5978 = vst [vmem:[#allocation45_spill] sm:$0xff] %v4007_v3 }
  0x8d   : > { %v3911_v26 = vpop.permute.xlu1 %405  ;;  %v3913_v27 = vpop.permute.xlu0 %403 }
  0x8e   : > { %5972 = vst [vmem:[#allocation39_spill] sm:$0xff] %v3911_v26  ;;  %5973 = vst [vmem:[#allocation40_spill] sm:$0xff] %v3913_v27  ;;  %v3962_v26 = vld [vmem:[%s3612_s26 + $0x88] sm:$0xff] }
  0x8f   : > { %633 = vrot.lane.b32.xlu1 %v3906_v24, %s3553_s29  ;;  %631 = vrot.lane.b32.xlu0 %v3909_v25, %s3553_s29 }
  0x91   : > { %v3925_v54 = vpop.permute.xlu1 %409  ;;  %v3927_v55 = vpop.permute.xlu0 %407 }
  0x92   : > { %5974 = vst [vmem:[#allocation41_spill] sm:$0xff] %v3925_v54  ;;  %5975 = vst [vmem:[#allocation42_spill] sm:$0xff] %v3927_v55  ;;  %v3948_v54 = vld [vmem:[%s3612_s26 + $0x78] sm:$0xff]  ;;  %v3951_v55 = vld [vmem:[%s3612_s26 + $0x70] sm:$0xff] }
  0x93   : > { %637 = vrot.lane.b32.xlu1 %v3920_v28, %s3553_s29  ;;  %635 = vrot.lane.b32.xlu0 %v3923_v29, %s3553_s29 }
  0x95   : > { %v3939_v50 = vpop.permute.xlu1 %413  ;;  %v3941_v22 = vpop.permute.xlu0 %411 }
  0x97   : > { %641 = vrot.lane.b32.xlu1 %v3934_v52, %s3553_s29  ;;  %639 = vrot.lane.b32.xlu0 %v3937_v53, %s3553_s29 }
  0x99   : > { %v3953_v51 = vpop.permute.xlu1 %417  ;;  %v3955_v23 = vpop.permute.xlu0 %415 }
  0x9b   : > { %645 = vrot.lane.b32.xlu1 %v3948_v54, %s3553_s29  ;;  %643 = vrot.lane.b32.xlu0 %v3951_v55, %s3553_s29 }
  0x9d   : > { %v3967_v27 = vpop.permute.xlu1 %421  ;;  %v3969_v20 = vpop.permute.xlu0 %419 }
  0x9f   : > { %649 = vrot.lane.b32.xlu1 %v3962_v26, %s3553_s29  ;;  %647 = vrot.lane.b32.xlu0 %v3965_v48, %s3553_s29 }
  0xa1   : > { %v3981_v56 = vpop.permute.xlu1 %425  ;;  %v3983_v1 = vpop.permute.xlu0 %423 }
  0xa3   : > { %653 = vrot.lane.b32.xlu1 %v3976_v49, %s3553_s29  ;;  %651 = vrot.lane.b32.xlu0 %v3979_v21, %s3553_s29 }
  0xa5   : > { %v3995_v46 = vpop.permute.xlu1 %429  ;;  %v3997_v18 = vpop.permute.xlu0 %427 }
  0xa7   : > { %657 = vrot.lane.b32.xlu1 %v3990_v57, %s3553_s29  ;;  %655 = vrot.lane.b32.xlu0 %v3993_v60, %s3553_s29  ;;  %v351_v60 = vld [vmem:[%s3612_s26 + $0xe8] sm:$0x3f] }
  0xa9   : > { %v4009_v19 = vpop.permute.xlu1 %433  ;;  %v4011_v61 = vpop.permute.xlu0 %431 }
  0xab   : > { %661 = vrot.lane.b32.xlu1 %v4004_v47, %s3553_s29  ;;  %659 = vrot.lane.b32.xlu0 %v4007_v3, %s3553_s29 }
  0xad   : > { %v4023_v42 = vpop.permute.xlu1 %437  ;;  %v4025_v43 = vpop.permute.xlu0 %435 }
  0xae   : > { %5981 = vst [vmem:[#allocation48_spill] sm:$0xff] %v4025_v43  ;;  %v4047_v43 = vld [vmem:[%s3612_s26 + $0xe0] sm:$0xff] }
  0xaf   : > { %665 = vrot.lane.b32.xlu1 %v4018_v44, %s3553_s29  ;;  %663 = vrot.lane.b32.xlu0 %v4021_v45, %s3553_s29  ;;  %5986 = vst [vmem:[#allocation53_spill] sm:$0xff] %v4047_v43 }
  0xb1   : > { %v4037_v47 = vpop.permute.xlu1 %441  ;;  %v4039_v3 = vpop.permute.xlu0 %439 }
  0xb2   : > { %5984 = vst [vmem:[#allocation51_spill] sm:$0xff] %v4037_v47  ;;  %5985 = vst [vmem:[#allocation52_spill] sm:$0xff] %v4039_v3 }
  0xb3   : > { %669 = vrot.lane.b32.xlu1 %v4032_v40, %s3553_s29  ;;  %667 = vrot.lane.b32.xlu0 %v4035_v41, %s3553_s29 }
  0xb5   : > { %v4049_v44 = vpop.permute.xlu1 %445  ;;  %v4051_v45 = vpop.permute.xlu0 %443 }
  0xb6   : > { %5987 = vst [vmem:[#allocation54_spill] sm:$0xff] %v4049_v44  ;;  %5988 = vst [vmem:[#allocation55_spill] sm:$0xff] %v4051_v45  ;;  %v1372_v44 = vld [vmem:[%s5865_s1 + $0x10] sm:$0xff] }
  0xb7   : > { %673 = vrot.lane.b32.xlu1 %v351_v60, %s3553_s29  ;;  %671 = vrot.lane.b32.xlu0 %v4047_v43, %s3553_s29  ;;  %s3562_s29 = smov 64  }
  0xb9   : > { %v4056_v47 = vpop.permute.xlu1 %449  ;;  %v4058_v3 = vpop.permute.xlu0 %447 }
  0xba   : > { %5989 = vst [vmem:[#allocation56_spill] sm:$0xff] %v4056_v47  ;;  %5990 = vst [vmem:[#allocation57_spill] sm:$0xff] %v4058_v3 }
  0xbb   : > { %708 = vrot.lane.b32.xlu1 %v3622_v2, %s3554_s30  ;;  %706 = vrot.lane.b32.xlu0 %v3615_v0, %s3554_s30 }
  0xbd   : > { %v4064_v40 = vpop.permute.xlu1 %509  ;;  %v4066_v41 = vpop.permute.xlu0 %507 }
  0xbe   : > { %5991 = vst [vmem:[#allocation58_spill] sm:$0xff] %v4064_v40  ;;  %5992 = vst [vmem:[#allocation59_spill] sm:$0xff] %v4066_v41  ;;  %v1371_v41 = vld [vmem:[%s5865_s1 + $0x8] sm:$0xff] }
  0xbf   : > { %712 = vrot.lane.b32.xlu1 %v3629_v4, %s3554_s30  ;;  %710 = vrot.lane.b32.xlu0 %v3632_v5, %s3554_s30 }
  0xc1   : > { %v4072_v60 = vpop.permute.xlu1 %513  ;;  %v4074_v43 = vpop.permute.xlu0 %511 }
  0xc2   : > { %5993 = vst [vmem:[#allocation60_spill] sm:$0xff] %v4072_v60  ;;  %5994 = vst [vmem:[#allocation61_spill] sm:$0xff] %v4074_v43 }
  0xc3   : > { %716 = vrot.lane.b32.xlu1 %v3639_v6, %s3554_s30  ;;  %714 = vrot.lane.b32.xlu0 %v3642_v7, %s3554_s30 }
  0xc5   : > { %v4080_v0 = vpop.permute.xlu1 %517  ;;  %v4082_v2 = vpop.permute.xlu0 %515 }
  0xc6   : > { %5995 = vst [vmem:[#allocation62_spill] sm:$0xff] %v4080_v0  ;;  %5996 = vst [vmem:[#allocation63_spill] sm:$0xff] %v4082_v2 }
  0xc7   : > { %720 = vrot.lane.b32.xlu1 %v3649_v8, %s3554_s30  ;;  %718 = vrot.lane.b32.xlu0 %v3652_v9, %s3554_s30 }
  0xc9   : > { %v4088_v40 = vpop.permute.xlu1 %521  ;;  %v4090_v60 = vpop.permute.xlu0 %519 }
  0xca   : > { %5997 = vst [vmem:[#allocation64_spill] sm:$0xff] %v4088_v40  ;;  %5998 = vst [vmem:[#allocation65_spill] sm:$0xff] %v4090_v60  ;;  %v1370_v60 = vld [vmem:[%s5865_s1] sm:$0xff] }
  0xcb   : > { %724 = vrot.lane.b32.xlu1 %v3659_v10, %s3554_s30  ;;  %722 = vrot.lane.b32.xlu0 %v3662_v11, %s3554_s30  ;;  %v3494_v3 = vpack.c.bf16 %v1371_v41, %v1370_v60 }
  0xcd   : > { %v4096_v43 = vpop.permute.xlu1 %525  ;;  %v4098_v0 = vpop.permute.xlu0 %523  ;;  %3495 = vmatprep.subr.bf16.mxu0 %v3494_v3 }
  0xce   : > { %3497 = vmatpush3.bf16.msra.mxu0 %v3494_v3  ;;  %v1374_v3 = vld [vmem:[%s5865_s1 + $0x20] sm:$0xf] }
  0xcf   : > { %728 = vrot.lane.b32.xlu1 %v3669_v12, %s3554_s30  ;;  %726 = vrot.lane.b32.xlu0 %v3672_v13, %s3554_s30  ;;  %v1373_v13 = vld [vmem:[%s5865_s1 + $0x18] sm:$0xff] }
  0xd0   : > { %v3498_v41 = vpack.c.bf16 %v1373_v13, %v1372_v44 }
  0xd1   : > { %v4104_v2 = vpop.permute.xlu1 %529  ;;  %v4106_v40 = vpop.permute.xlu0 %527 }
  0xd2   : > { %3499 = vmatprep.subr.bf16.mxu0 %v3498_v41 }
  0xd3   : > { %732 = vrot.lane.b32.xlu1 %v3679_v14, %s3554_s30  ;;  %730 = vrot.lane.b32.xlu0 %v3682_v15, %s3554_s30 }
  0xd4   : > { %3501 = vmatpush3.bf16.msra.mxu0 %v3498_v41 }
  0xd5   : > { %v4118_v47 = vpop.permute.xlu1 %533  ;;  %v4120_v45 = vpop.permute.xlu0 %531  ;;  %3396 = vmatprep.subr.msk.mxu0 %vm1467_vm0, %v1374_v3 }
  0xd7   : > { %736 = vrot.lane.b32.xlu1 %v3689_v16, %s3554_s30  ;;  %734 = vrot.lane.b32.xlu0 %v3692_v17, %s3554_s30 }
  0xd8   : > { %3397 = vmatpush3.msk.msra.mxu0 %vm1467_vm0, %v1374_v3  ;;  %vm3003_vm0 = vcmask 60416  }
  0xd9   : > { %v4132_v60 = vpop.permute.xlu1 %537  ;;  %v4134_v15 = vpop.permute.xlu0 %535 }
  0xdb   : > { %795 = vrot.lane.b32.xlu1 %v3741_v30, %s3555_s15  ;;  %793 = vrot.lane.b32.xlu0 %v3744_v31, %s3555_s15 }
  0xdd   : > { %v4143_v17 = vpop.permute.xlu1 %541  ;;  %v4145_v13 = vpop.permute.xlu0 %539 }
  0xdf   : > { %882 = vrot.lane.b32.xlu1 %v3878_v58, %s3556_s18  ;;  %880 = vrot.lane.b32.xlu0 %v3881_v59, %s3556_s18 }
  0xe1   : > { %v4151_v30 = vpop.permute.xlu1 %545  ;;  %v4153_v31 = vpop.permute.xlu0 %543 }
  0xe3   : > { %969 = vrot.lane.b32.xlu1 %v3629_v4, %s3557_s19  ;;  %967 = vrot.lane.b32.xlu0 %v3632_v5, %s3557_s19 }
  0xe5   : > { %v4159_v44 = vpop.permute.xlu1 %549  ;;  %v4161_v41 = vpop.permute.xlu0 %547 }
  0xe7   : > { %797 = vrot.lane.b32.xlu1 %v3754_v33, %s3555_s15  ;;  %1054 = vrot.lane.b32.xlu0 %v3754_v33, %s3558_s20 }
  0xe9   : > { %v4167_v3 = vpop.permute.xlu1 %553  ;;  %v4169_v58 = vpop.permute.xlu0 %551 }
  0xeb   : > { %799 = vrot.lane.b32.xlu1 %v3751_v32, %s3555_s15  ;;  %1056 = vrot.lane.b32.xlu0 %v3751_v32, %s3558_s20 }
  0xed   : > { %v4175_v4 = vpop.permute.xlu1 %557  ;;  %v4177_v5 = vpop.permute.xlu0 %555 }
  0xef   : > { %886 = vrot.lane.b32.xlu1 %v3892_v62, %s3556_s18  ;;  %884 = vrot.lane.b32.xlu0 %v3895_v63, %s3556_s18 }
  0xf1   : > { %v4183_v33 = vpop.permute.xlu1 %561  ;;  %v4185_v59 = vpop.permute.xlu0 %559 }
  0xf3   : > { %973 = vrot.lane.b32.xlu1 %v3639_v6, %s3557_s19  ;;  %971 = vrot.lane.b32.xlu0 %v3642_v7, %s3557_s19 }
  0xf5   : > { %v4191_v32 = vpop.permute.xlu1 %621  ;;  %v4193_v16 = vpop.permute.xlu0 %619 }
  0xf7   : > { %801 = vrot.lane.b32.xlu1 %v3764_v35, %s3555_s15  ;;  %1058 = vrot.lane.b32.xlu0 %v3764_v35, %s3558_s20 }
  0xf9   : > { %v4199_v62 = vpop.permute.xlu1 %625  ;;  %v4201_v63 = vpop.permute.xlu0 %623 }
  0xfa   : > { %5999 = vst [vmem:[#allocation66_spill] sm:$0xff] %v4199_v62  ;;  %6000 = vst [vmem:[#allocation67_spill] sm:$0xff] %v4201_v63 }
  0xfb   : > { %803 = vrot.lane.b32.xlu1 %v3761_v34, %s3555_s15  ;;  %1060 = vrot.lane.b32.xlu0 %v3761_v34, %s3558_s20  ;;  %v1148_v34 = vsel %vm1138_vm1, %v3906_v24, %v3939_v50 }
  0xfd   : > { %v4207_v6 = vpop.permute.xlu1 %629  ;;  %v4209_v7 = vpop.permute.xlu0 %627 }
  0xfe   : > { %6001 = vst [vmem:[#allocation68_spill] sm:$0xff] %v4207_v6  ;;  %6002 = vst [vmem:[#allocation69_spill] sm:$0xff] %v4209_v7  ;;  %v1147_v6 = vsel %vm1138_vm1, %v3909_v25, %v3941_v22  ;;  %v1150_v22 = vsel %vm1138_vm1, %v3920_v28, %v3953_v51 }
  0xff   : > { %890 = vrot.lane.b32.xlu1 %v3906_v24, %s3556_s18  ;;  %888 = vrot.lane.b32.xlu0 %v3909_v25, %s3556_s18  ;;  %v1179_v50 = vsel %vm1167_vm2, %v1150_v22, %v4104_v2 }
 0x101   : > { %v4215_v35 = vpop.permute.xlu1 %633  ;;  %v4217_v62 = vpop.permute.xlu0 %631 }
 0x102   : > { %6003 = vst [vmem:[#allocation70_spill] sm:$0xff] %v4215_v35  ;;  %6004 = vst [vmem:[#allocation71_spill] sm:$0xff] %v4217_v62  ;;  %v1177_v35 = vsel %vm1167_vm2, %v1148_v34, %v4096_v43  ;;  %v1176_v62 = vsel %vm1167_vm2, %v1147_v6, %v4098_v0  ;;  %v1149_v43 = vsel %vm1138_vm1, %v3923_v29, %v3955_v23 }
 0x103   : > { %977 = vrot.lane.b32.xlu1 %v3649_v8, %s3557_s19  ;;  %975 = vrot.lane.b32.xlu0 %v3652_v9, %s3557_s19  ;;  %v1152_v23 = vsel %vm1138_vm1, %v3934_v52, %v3967_v27 }
 0x104   : > { %v1181_v51 = vsel %vm1167_vm2, %v1152_v23, %v4118_v47 }
 0x105   : > { %v638_v8 = vpop.permute.xlu1 %637  ;;  %v636_v7 = vpop.permute.xlu0 %635 }
 0x106   : > { %v4234_v9 = vsel %vm1196_vm3, %v1177_v35, %v638_v8  ;;  %v4237_v63 = vsel %vm1196_vm3, %v1176_v62, %v636_v7  ;;  %v1178_v62 = vsel %vm1167_vm2, %v1149_v43, %v4106_v40  ;;  %v1151_v40 = vsel %vm1138_vm1, %v3937_v53, %v3969_v20 }
 0x107   : > { %805 = vrot.lane.b32.xlu1 %v3774_v37, %s3555_s15  ;;  %1062 = vrot.lane.b32.xlu0 %v3774_v37, %s3558_s20  ;;  %v1180_v2 = vsel %vm1167_vm2, %v1151_v40, %v4120_v45  ;;  %v1154_v20 = vsel %vm1138_vm1, %v3948_v54, %v3981_v56  ;;  %v1153_v45 = vsel %vm1138_vm1, %v3951_v55, %v3983_v1 }
 0x108   : > { %v1183_v47 = vsel %vm1167_vm2, %v1154_v20, %v4132_v60  ;;  %v1182_v27 = vsel %vm1167_vm2, %v1153_v45, %v4134_v15  ;;  %v1156_v56 = vsel %vm1138_vm1, %v3962_v26, %v3995_v46  ;;  %v1155_v15 = vsel %vm1138_vm1, %v3965_v48, %v3997_v18 }
 0x109   : > { %v642_v24 = vpop.permute.xlu1 %641  ;;  %v640_v25 = vpop.permute.xlu0 %639  ;;  %v1185_v1 = vsel %vm1167_vm2, %v1156_v56, %v4143_v17  ;;  %v1184_v60 = vsel %vm1167_vm2, %v1155_v15, %v4145_v13  ;;  %v1158_v17 = vsel %vm1138_vm1, %v3976_v49, %v4009_v19  ;;  %v1157_v18 = vsel %vm1138_vm1, %v3979_v21, %v4011_v61  ;;  %v6005_v61 = vld [vmem:[#allocation48_spill] sm:$0xff]  ;;  %v6012_v56 = vld [vmem:[#allocation54_spill] sm:$0xff] }
 0x10a   : > { %v4254_v0 = vsel %vm1196_vm3, %v1179_v50, %v642_v24  ;;  %v4257_v37 = vsel %vm1196_vm3, %v1178_v62, %v640_v25  ;;  %v1187_v46 = vsel %vm1167_vm2, %v1158_v17, %v4151_v30  ;;  %v1186_v13 = vsel %vm1167_vm2, %v1157_v18, %v4153_v31  ;;  %v6006_v30 = vld [vmem:[#allocation43_spill] sm:$0xff]  ;;  %v6013_v15 = vld [vmem:[#allocation46_spill] sm:$0xff] }
 0x10b   : > { %807 = vrot.lane.b32.xlu1 %v3771_v36, %s3555_s15  ;;  %1064 = vrot.lane.b32.xlu0 %v3771_v36, %s3558_s20  ;;  %v1160_v19 = vsel %vm1138_vm1, %v3990_v57, %v4023_v42  ;;  %v1159_v31 = vsel %vm1138_vm1, %v6006_v30, %v6005_v61  ;;  %v6007_v42 = vld [vmem:[#allocation51_spill] sm:$0xff]  ;;  %v6019_v61 = vld [vmem:[#allocation50_spill] sm:$0xff] }
 0x10c   : > { %v1189_v25 = vsel %vm1167_vm2, %v1160_v19, %v4159_v44  ;;  %v1188_v23 = vsel %vm1167_vm2, %v1159_v31, %v4161_v41  ;;  %v6008_v44 = vld [vmem:[#allocation44_spill] sm:$0xff]  ;;  %v6018_v19 = vld [vmem:[#allocation57_spill] sm:$0xff] }
 0x10d   : > { %v646_v6 = vpop.permute.xlu1 %645  ;;  %v644_v7 = vpop.permute.xlu0 %643  ;;  %v6009_v41 = vld [vmem:[#allocation52_spill] sm:$0xff] }
 0x10e   : > { %v4274_v35 = vsel %vm1196_vm3, %v1181_v51, %v646_v6  ;;  %v4277_v36 = vsel %vm1196_vm3, %v1180_v2, %v644_v7  ;;  %v1162_v6 = vsel %vm1138_vm1, %v6008_v44, %v6007_v42  ;;  %v6010_v7 = vld [vmem:[#allocation45_spill] sm:$0xff] }
 0x10f   : > { %894 = vrot.lane.b32.xlu1 %v3920_v28, %s3556_s18  ;;  %892 = vrot.lane.b32.xlu0 %v3923_v29, %s3556_s18  ;;  %v1161_v20 = vsel %vm1138_vm1, %v6010_v7, %v6009_v41  ;;  %v1191_v45 = vsel %vm1167_vm2, %v1162_v6, %v4167_v3  ;;  %v1164_v3 = vsel %vm1138_vm1, %v6013_v15, %v6012_v56  ;;  %v6020_v6 = vld [vmem:[#allocation14_spill] sm:$0xff] }
 0x111   : > { %v650_v34 = vpop.permute.xlu1 %649  ;;  %v648_v8 = vpop.permute.xlu0 %647 }
 0x112   : > { %v4294_v28 = vsel %vm1196_vm3, %v1183_v47, %v650_v34  ;;  %v4297_v29 = vsel %vm1196_vm3, %v1182_v27, %v648_v8  ;;  %v1190_v47 = vsel %vm1167_vm2, %v1161_v20, %v4169_v58  ;;  %v6011_v8 = vld [vmem:[#allocation4_spill] sm:$0xff]  ;;  %v6015_v58 = vld [vmem:[#allocation47_spill] sm:$0xff] }
 0x113   : > { %981 = vrot.lane.b32.xlu1 %v3659_v10, %s3557_s19  ;;  %979 = vrot.lane.b32.xlu0 %v3662_v11, %s3557_s19 }
 0x115   : > { %v654_v22 = vpop.permute.xlu1 %653  ;;  %v652_v43 = vpop.permute.xlu0 %651 }
 0x116   : > { %v4314_v10 = vsel %vm1196_vm3, %v1185_v1, %v654_v22  ;;  %v4317_v11 = vsel %vm1196_vm3, %v1184_v60, %v652_v43  ;;  %v6014_v1 = vld [vmem:[#allocation55_spill] sm:$0xff]  ;;  %v1193_v43 = vsel %vm1167_vm2, %v1164_v3, %v4175_v4 }
 0x117   : > { %809 = vrot.lane.b32.xlu1 %v3784_v39, %s3555_s15  ;;  %1066 = vrot.lane.b32.xlu0 %v3784_v39, %s3558_s20  ;;  %v1163_v60 = vsel %vm1138_vm1, %v6015_v58, %v6014_v1  ;;  %v292_v22 = vld [vmem:[%s3612_s26 + $0xd8] sm:$0x3f] }
 0x118   : > { %v1192_v17 = vsel %vm1167_vm2, %v1163_v60, %v4177_v5  ;;  %v1165_v5 = vsel %vm1138_vm1, %v6019_v61, %v6018_v19  ;;  %v6024_v60 = vld [vmem:[#allocation6_spill] sm:$0xff] }
 0x119   : > { %v658_v50 = vpop.permute.xlu1 %657  ;;  %v656_v62 = vpop.permute.xlu0 %655 }
 0x11a   : > { %v4334_v24 = vsel %vm1196_vm3, %v1187_v46, %v658_v50  ;;  %v4337_v39 = vsel %vm1196_vm3, %v1186_v13, %v656_v62  ;;  %v6016_v50 = vld [vmem:[#allocation15_spill] sm:$0xff]  ;;  %v6017_v62 = vld [vmem:[#allocation56_spill] sm:$0xff] }
 0x11b   : > { %811 = vrot.lane.b32.xlu1 %v3781_v38, %s3555_s15  ;;  %1068 = vrot.lane.b32.xlu0 %v3781_v38, %s3558_s20  ;;  %v1166_v4 = vsel %vm1138_vm1, %v292_v22, %v6017_v62  ;;  %v6025_v22 = vld [vmem:[#allocation7_spill] sm:$0xff] }
 0x11c   : > { %v1195_v31 = vsel %vm1167_vm2, %v1166_v4, %v4183_v33  ;;  %v265_v4 = vld [vmem:[%s3612_s26] sm:$0xff] }
 0x11d   : > { %v662_v40 = vpop.permute.xlu1 %661  ;;  %v660_v51 = vpop.permute.xlu0 %659 }
 0x11e   : > { %v4354_v2 = vsel %vm1196_vm3, %v1189_v25, %v662_v40  ;;  %v4357_v38 = vsel %vm1196_vm3, %v1188_v23, %v660_v51  ;;  %v1194_v25 = vsel %vm1167_vm2, %v1165_v5, %v4185_v59 }
 0x11f   : > { %898 = vrot.lane.b32.xlu1 %v3934_v52, %s3556_s18  ;;  %896 = vrot.lane.b32.xlu0 %v3937_v53, %s3556_s18 }
 0x121   : > { %v666_v27 = vpop.permute.xlu1 %665  ;;  %v664_v34 = vpop.permute.xlu0 %663 }
 0x122   : > { %v4374_v52 = vsel %vm1196_vm3, %v1191_v45, %v666_v27  ;;  %v4377_v53 = vsel %vm1196_vm3, %v1190_v47, %v664_v34  ;;  %v6021_v45 = vld [vmem:[#allocation5_spill] sm:$0xff] }
 0x123   : > { %985 = vrot.lane.b32.xlu1 %v3669_v12, %s3557_s19  ;;  %983 = vrot.lane.b32.xlu0 %v6011_v8, %s3557_s19  ;;  %v6022_v34 = vld [vmem:[#allocation17_spill] sm:$0xff]  ;;  %v6023_v8 = vld [vmem:[#allocation16_spill] sm:$0xff] }
 0x125   : > { %v670_v18 = vpop.permute.xlu1 %669  ;;  %v668_v12 = vpop.permute.xlu0 %667 }
 0x126   : > { %v4395_v46 = vsel %vm1196_vm3, %v1193_v43, %v670_v18  ;;  %v4398_v13 = vsel %vm1196_vm3, %v1192_v17, %v668_v12  ;;  %v6027_v12 = vld [vmem:[#allocation18_spill] sm:$0xff] }
 0x127   : > { %813 = vrot.lane.b32.xlu1 %v6016_v50, %s3555_s15  ;;  %1070 = vrot.lane.b32.xlu0 %v6016_v50, %s3558_s20 }
 0x129   : > { %v674_v23 = vpop.permute.xlu1 %673  ;;  %v672_v40 = vpop.permute.xlu0 %671 }
 0x12a   : > { %v4414_v51 = vsel %vm1196_vm3, %v1195_v31, %v674_v23  ;;  %v4417_v42 = vsel %vm1196_vm3, %v1194_v25, %v672_v40  ;;  %v6028_v31 = vld [vmem:[#allocation34_spill] sm:$0xff]  ;;  %v6029_v23 = vld [vmem:[#allocation9_spill] sm:$0xff] }
 0x12b   : > { %815 = vrot.lane.b32.xlu1 %v6020_v6, %s3555_s15  ;;  %1072 = vrot.lane.b32.xlu0 %v6020_v6, %s3558_s20  ;;  %v1139_v25 = vsel %vm1138_vm1, %v265_v4, %v6028_v31  ;;  %v266_v40 = vld [vmem:[%s3612_s26 + $0x8] sm:$0xff]  ;;  %v6030_v6 = vld [vmem:[#allocation59_spill] sm:$0xff]  ;;  %v6033_v4 = vld [vmem:[#allocation8_spill] sm:$0xff] }
 0x12c   : > { %v6034_v31 = vld [vmem:[#allocation58_spill] sm:$0xff] }
 0x12d   : > { %v4423_v41 = vpop.permute.xlu1 %708  ;;  %v707_v33 = vpop.permute.xlu0 %706 }
 0x12f   : > { %902 = vrot.lane.b32.xlu1 %v3948_v54, %s3556_s18  ;;  %900 = vrot.lane.b32.xlu0 %v3951_v55, %s3556_s18 }
 0x131   : > { %v4429_v59 = vpop.permute.xlu1 %712  ;;  %v4431_v20 = vpop.permute.xlu0 %710 }
 0x133   : > { %989 = vrot.lane.b32.xlu1 %v3679_v14, %s3557_s19  ;;  %987 = vrot.lane.b32.xlu0 %v6021_v45, %s3557_s19 }
 0x135   : > { %v4437_v47 = vpop.permute.xlu1 %716  ;;  %v4439_v27 = vpop.permute.xlu0 %714 }
 0x137   : > { %817 = vrot.lane.b32.xlu1 %v6022_v34, %s3555_s15  ;;  %1074 = vrot.lane.b32.xlu0 %v6022_v34, %s3558_s20 }
 0x139   : > { %v4445_v55 = vpop.permute.xlu1 %720  ;;  %v4447_v54 = vpop.permute.xlu0 %718 }
 0x13b   : > { %819 = vrot.lane.b32.xlu1 %v6023_v8, %s3555_s15  ;;  %1076 = vrot.lane.b32.xlu0 %v6023_v8, %s3558_s20 }
 0x13d   : > { %v4453_v14 = vpop.permute.xlu1 %724  ;;  %v4455_v56 = vpop.permute.xlu0 %722 }
 0x13f   : > { %906 = vrot.lane.b32.xlu1 %v3962_v26, %s3556_s18  ;;  %904 = vrot.lane.b32.xlu0 %v3965_v48, %s3556_s18  ;;  %v6026_v26 = vld [vmem:[#allocation19_spill] sm:$0xff] }
 0x141   : > { %v4461_v3 = vpop.permute.xlu1 %728  ;;  %v4463_v1 = vpop.permute.xlu0 %726 }
 0x143   : > { %993 = vrot.lane.b32.xlu1 %v6024_v60, %s3557_s19  ;;  %991 = vrot.lane.b32.xlu0 %v6025_v22, %s3557_s19  ;;  %v6031_v60 = vld [vmem:[#allocation38_spill] sm:$0xff] }
 0x144   : > { %v1140_v22 = vsel %vm1138_vm1, %v266_v40, %v6031_v60  ;;  %v6035_v60 = vld [vmem:[#allocation20_spill] sm:$0xff] }
 0x145   : > { %v4469_v43 = vpop.permute.xlu1 %732  ;;  %v4471_v17 = vpop.permute.xlu0 %730 }
 0x147   : > { %821 = vrot.lane.b32.xlu1 %v6026_v26, %s3555_s15  ;;  %1078 = vrot.lane.b32.xlu0 %v6026_v26, %s3558_s20 }
 0x149   : > { %v4477_v48 = vpop.permute.xlu1 %736  ;;  %v4479_v18 = vpop.permute.xlu0 %734 }
 0x14b   : > { %823 = vrot.lane.b32.xlu1 %v6027_v12, %s3555_s15  ;;  %1080 = vrot.lane.b32.xlu0 %v6027_v12, %s3558_s20  ;;  %v6032_v12 = vld [vmem:[#allocation21_spill] sm:$0xff] }
 0x14d   : > { %v796_v50 = vpop.permute.xlu1 %795  ;;  %v794_v62 = vpop.permute.xlu0 %793 }
 0x14f   : > { %910 = vrot.lane.b32.xlu1 %v3976_v49, %s3556_s18  ;;  %908 = vrot.lane.b32.xlu0 %v3979_v21, %s3556_s18  ;;  %v1168_v49 = vsel %vm1167_vm2, %v1139_v25, %v6030_v6 }
 0x150   : > { %v1197_v21 = vsel %vm1196_vm3, %v1168_v49, %v4193_v16  ;;  %v1169_v16 = vsel %vm1167_vm2, %v1140_v22, %v6034_v31  ;;  %v6039_v31 = vld [vmem:[#allocation67_spill] sm:$0xff] }
 0x151   : > { %v883_v19 = vpop.permute.xlu1 %882  ;;  %v881_v5 = vpop.permute.xlu0 %880  ;;  %v1226_v8 = vsel %vm1225_vm4, %v1197_v21, %v707_v33  ;;  %v1198_v33 = vsel %vm1196_vm3, %v1169_v16, %v4191_v32 }
 0x152   : > { %v1255_v26 = vsel %vm1254_vm5, %v1226_v8, %v794_v62  ;;  %v1227_v62 = vsel %vm1225_vm4, %v1198_v33, %v4423_v41 }
 0x153   : > { %738 = vrot.lane.b32.xlu1 %v6029_v23, %s3554_s30  ;;  %995 = vrot.lane.b32.xlu0 %v6029_v23, %s3557_s19  ;;  %v1284_v25 = vsel %vm1283_vm6, %v1255_v26, %v881_v5  ;;  %v1256_v21 = vsel %vm1254_vm5, %v1227_v62, %v796_v50  ;;  %v6036_v26 = vld [vmem:[#allocation33_spill] sm:$0xff] }
 0x154   : > { %v1285_v32 = vsel %vm1283_vm6, %v1256_v21, %v883_v19  ;;  %v6037_v19 = vld [vmem:[#allocation30_spill] sm:$0xff]  ;;  %v6041_v62 = vld [vmem:[#allocation29_spill] sm:$0xff]  ;;  %v6042_v21 = vld [vmem:[#allocation11_spill] sm:$0xff] }
 0x155   : > { %v970_v45 = vpop.permute.xlu1 %969  ;;  %v968_v34 = vpop.permute.xlu0 %967 }
 0x156   : > { %v1313_v23 = vsel %vm1312_vm7, %v1284_v25, %v968_v34  ;;  %v1314_v5 = vsel %vm1312_vm7, %v1285_v32, %v970_v45  ;;  %v6038_v45 = vld [vmem:[#allocation61_spill] sm:$0xff] }
 0x157   : > { %1082 = vrot.lane.b32.xlu1 %v6032_v12, %s3558_s20  ;;  %997 = vrot.lane.b32.xlu0 %v6033_v4, %s3557_s19 }
 0x159   : > { %v798_v40 = vpop.permute.xlu1 %797  ;;  %v1055_v6 = vpop.permute.xlu0 %1054 }
 0x15a   : > { %v1342_v49 = vsel %vm1341_vm8, %v1313_v23, %v1055_v6  ;;  %v6040_v6 = vld [vmem:[#allocation37_spill] sm:$0xff] }
 0x15b   : > { %825 = vrot.lane.b32.xlu1 %v6032_v12, %s3555_s15  ;;  %740 = vrot.lane.b32.xlu0 %v6033_v4, %s3554_s30  ;;  %v1141_v12 = vsel %vm1138_vm1, %v6037_v19, %v6036_v26 }
 0x15c   : > { %3398 = vmatprep.mubr.msk.f32.mxu0 %vm1382_vm9, %v1342_v49  ;;  %v1170_v4 = vsel %vm1167_vm2, %v1141_v12, %v6038_v45  ;;  %v1142_v49 = vsel %vm1138_vm1, %v6041_v62, %v6040_v6  ;;  %v6045_v45 = vld [vmem:[#allocation23_spill] sm:$0xff]  ;;  %v6047_v6 = vld [vmem:[#allocation40_spill] sm:$0xff] }
 0x15d   : > { %v800_v34 = vpop.permute.xlu1 %799  ;;  %v1057_v8 = vpop.permute.xlu0 %1056  ;;  %v1199_v16 = vsel %vm1196_vm3, %v1170_v4, %v6039_v31  ;;  %v6046_v4 = vld [vmem:[#allocation10_spill] sm:$0xff] }
 0x15e   : > { %v1343_v41 = vsel %vm1341_vm8, %v1314_v5, %v1057_v8  ;;  %v1228_v23 = vsel %vm1225_vm4, %v1199_v16, %v4431_v20  ;;  %v6044_v8 = vld [vmem:[#allocation66_spill] sm:$0xff] }
 0x15f   : > { %827 = vrot.lane.b32.xlu1 %v6035_v60, %s3555_s15  ;;  %1084 = vrot.lane.b32.xlu0 %v6035_v60, %s3558_s20 }
 0x160   : > { %3399 = vmatmul.mubr.msk.f32.vlgmr.msra.gmra.mrb[0].mxu0 %vm1382_vm9, %v1343_v41 }
 0x161   : > { %v887_v50 = vpop.permute.xlu1 %886  ;;  %v885_v22 = vpop.permute.xlu0 %884 }
 0x163   : > { %914 = vrot.lane.b32.xlu1 %v3990_v57, %s3556_s18  ;;  %912 = vrot.lane.b32.xlu0 %v6006_v30, %s3556_s18  ;;  %v1257_v57 = vsel %vm1254_vm5, %v1228_v23, %v798_v40  ;;  %v6043_v30 = vld [vmem:[#allocation60_spill] sm:$0xff] }
 0x164   : > { %v1171_v32 = vsel %vm1167_vm2, %v1142_v49, %v6043_v30  ;;  %v1286_v5 = vsel %vm1283_vm6, %v1257_v57, %v885_v22  ;;  %v6050_v49 = vld [vmem:[#allocation63_spill] sm:$0xff] }
 0x165   : > { %v974_v25 = vpop.permute.xlu1 %973  ;;  %v972_v33 = vpop.permute.xlu0 %971  ;;  %v1200_v20 = vsel %vm1196_vm3, %v1171_v32, %v6044_v8 }
 0x166   : > { %v1315_v41 = vsel %vm1312_vm7, %v1286_v5, %v972_v33  ;;  %v1229_v40 = vsel %vm1225_vm4, %v1200_v20, %v4429_v59  ;;  %v6052_v20 = vld [vmem:[#allocation39_spill] sm:$0xff] }
 0x167   : > { %742 = vrot.lane.b32.xlu1 %v6042_v21, %s3554_s30  ;;  %999 = vrot.lane.b32.xlu0 %v6042_v21, %s3557_s19  ;;  %v1258_v12 = vsel %vm1254_vm5, %v1229_v40, %v800_v34  ;;  %v6051_v21 = vld [vmem:[#allocation69_spill] sm:$0xff] }
 0x168   : > { %v1287_v22 = vsel %vm1283_vm6, %v1258_v12, %v887_v50  ;;  %v6048_v50 = vld [vmem:[#allocation32_spill] sm:$0xff] }
 0x169   : > { %v802_v60 = vpop.permute.xlu1 %801  ;;  %v1059_v26 = vpop.permute.xlu0 %1058  ;;  %v1316_v31 = vsel %vm1312_vm7, %v1287_v22, %v974_v25  ;;  %v1143_v62 = vsel %vm1138_vm1, %v6048_v50, %v6047_v6  ;;  %v6049_v25 = vld [vmem:[#allocation22_spill] sm:$0xff] }
 0x16a   : > { %v1344_v19 = vsel %vm1341_vm8, %v1315_v41, %v1059_v26  ;;  %v1172_v57 = vsel %vm1167_vm2, %v1143_v62, %v6050_v49  ;;  %v6053_v41 = vld [vmem:[#allocation31_spill] sm:$0xff] }
 0x16b   : > { %1086 = vrot.lane.b32.xlu1 %v6045_v45, %s3558_s20  ;;  %1001 = vrot.lane.b32.xlu0 %v6046_v4, %s3557_s19  ;;  %v1201_v30 = vsel %vm1196_vm3, %v1172_v57, %v6051_v21  ;;  %v1144_v26 = vsel %vm1138_vm1, %v6053_v41, %v6052_v20  ;;  %v6059_v21 = vld [vmem:[#allocation42_spill] sm:$0xff] }
 0x16c   : > { %3401 = vmatprep.mubr.msk.f32.mxu0 %vm1382_vm9, %v1344_v19  ;;  %v1230_v8 = vsel %vm1225_vm4, %v1201_v30, %v4439_v27  ;;  %v6054_v19 = vld [vmem:[#allocation62_spill] sm:$0xff] }
 0x16d   : > { %v804_v16 = vpop.permute.xlu1 %803  ;;  %v1061_v33 = vpop.permute.xlu0 %1060  ;;  %v1259_v40 = vsel %vm1254_vm5, %v1230_v8, %v802_v60  ;;  %v1173_v12 = vsel %vm1167_vm2, %v1144_v26, %v6054_v19  ;;  %v6062_v8 = vld [vmem:[#allocation71_spill] sm:$0xff]  ;;  %v6063_v19 = vld [vmem:[#allocation41_spill] sm:$0xff] }
 0x16e   : > { %v1345_v59 = vsel %vm1341_vm8, %v1316_v31, %v1061_v33 }
 0x16f   : > { %829 = vrot.lane.b32.xlu1 %v6045_v45, %s3555_s15  ;;  %744 = vrot.lane.b32.xlu0 %v6046_v4, %s3554_s30  ;;  %v6055_v4 = vld [vmem:[#allocation68_spill] sm:$0xff] }
 0x170   : > { %3402 = vmatmul.mubr.msk.f32.gmra.mrb[2].mxu0 %vm1382_vm9, %v1345_v59  ;;  %v1202_v27 = vsel %vm1196_vm3, %v1173_v12, %v6055_v4  ;;  %v6064_v12 = vld [vmem:[#allocation35_spill] sm:$0xff] }
 0x171   : > { %v891_v34 = vpop.permute.xlu1 %890  ;;  %v889_v23 = vpop.permute.xlu0 %888  ;;  %v1231_v60 = vsel %vm1225_vm4, %v1202_v27, %v4437_v47  ;;  %v6065_v27 = vld [vmem:[#allocation24_spill] sm:$0xff] }
 0x172   : > { %v1288_v45 = vsel %vm1283_vm6, %v1259_v40, %v889_v23  ;;  %v1260_v59 = vsel %vm1254_vm5, %v1231_v60, %v804_v16  ;;  %v6058_v16 = vld [vmem:[#allocation12_spill] sm:$0xff] }
 0x173   : > { %831 = vrot.lane.b32.xlu1 %v6049_v25, %s3555_s15  ;;  %1088 = vrot.lane.b32.xlu0 %v6049_v25, %s3558_s20  ;;  %v1289_v23 = vsel %vm1283_vm6, %v1260_v59, %v891_v34  ;;  %v6057_v25 = vld [vmem:[#allocation25_spill] sm:$0xff]  ;;  %v6060_v34 = vld [vmem:[#allocation36_spill] sm:$0xff] }
 0x174   : > { %v1145_v30 = vsel %vm1138_vm1, %v6060_v34, %v6059_v21  ;;  %v3540_v21 = vld [vmem:[%s3612_s26 + $0xc1] sm:$0xff] }
 0x175   : > { %v978_v32 = vpop.permute.xlu1 %977  ;;  %v976_v5 = vpop.permute.xlu0 %975 }
 0x176   : > { %v1317_v22 = vsel %vm1312_vm7, %v1288_v45, %v976_v5  ;;  %v1318_v6 = vsel %vm1312_vm7, %v1289_v23, %v978_v32  ;;  %v6061_v32 = vld [vmem:[#allocation65_spill] sm:$0xff]  ;;  %v1146_v45 = vsel %vm1138_vm1, %v6064_v12, %v6063_v19  ;;  %v6069_v19 = vld [vmem:[#allocation26_spill] sm:$0xff] }
 0x177   : > { %918 = vrot.lane.b32.xlu1 %v6008_v44, %s3556_s18  ;;  %916 = vrot.lane.b32.xlu0 %v6010_v7, %s3556_s18  ;;  %v6056_v7 = vld [vmem:[#allocation13_spill] sm:$0xff]  ;;  %v1174_v5 = vsel %vm1167_vm2, %v1145_v30, %v6061_v32  ;;  %v1234_v32 = vsel %vm1225_vm4, %v4237_v63, %v4455_v56 }
 0x178   : > { %v1203_v20 = vsel %vm1196_vm3, %v1174_v5, %v6062_v8 }
 0x179   : > { %v806_v31 = vpop.permute.xlu1 %805  ;;  %v1063_v33 = vpop.permute.xlu0 %1062  ;;  %v1232_v40 = vsel %vm1225_vm4, %v1203_v20, %v4447_v54 }
 0x17a   : > { %v1346_v44 = vsel %vm1341_vm8, %v1317_v22, %v1063_v33  ;;  %v1261_v4 = vsel %vm1254_vm5, %v1232_v40, %v806_v31  ;;  %v6066_v22 = vld [vmem:[#allocation64_spill] sm:$0xff]  ;;  %v1235_v40 = vsel %vm1225_vm4, %v4234_v9, %v4453_v14 }
 0x17b   : > { %746 = vrot.lane.b32.xlu1 %v6056_v7, %s3554_s30  ;;  %1003 = vrot.lane.b32.xlu0 %v6056_v7, %s3557_s19  ;;  %v1175_v33 = vsel %vm1167_vm2, %v1146_v45, %v6066_v22 }
 0x17c   : > { %3404 = vmatprep.mubr.msk.f32.mxu0 %vm1382_vm9, %v1346_v44  ;;  %v6067_v44 = vld [vmem:[#allocation70_spill] sm:$0xff] }
 0x17d   : > { %v808_v50 = vpop.permute.xlu1 %807  ;;  %v1065_v62 = vpop.permute.xlu0 %1064  ;;  %v1204_v54 = vsel %vm1196_vm3, %v1175_v33, %v6067_v44  ;;  %v352_v44 = vld [vmem:[%s3612_s26 + $0xd9] sm:$0xff] }
 0x17e   : > { %v1347_v47 = vsel %vm1341_vm8, %v1318_v6, %v1065_v62  ;;  %v1233_v31 = vsel %vm1225_vm4, %v1204_v54, %v4445_v55 }
 0x17f   : > { %1090 = vrot.lane.b32.xlu1 %v6057_v25, %s3558_s20  ;;  %1005 = vrot.lane.b32.xlu0 %v6058_v16, %s3557_s19  ;;  %v1262_v62 = vsel %vm1254_vm5, %v1233_v31, %v808_v50 }
 0x180   : > { %3405 = vmatmul.mubr.msk.f32.gmra.mrb[4].mxu0 %vm1382_vm9, %v1347_v47 }
 0x181   : > { %v895_v49 = vpop.permute.xlu1 %894  ;;  %v893_v57 = vpop.permute.xlu0 %892 }
 0x182   : > { %v1290_v60 = vsel %vm1283_vm6, %v1261_v4, %v893_v57  ;;  %v1291_v47 = vsel %vm1283_vm6, %v1262_v62, %v895_v49  ;;  %v3541_v49 = vld [vmem:[%s3612_s26 + $0xc9] sm:$0xff] }
 0x183   : > { %833 = vrot.lane.b32.xlu1 %v6057_v25, %s3555_s15  ;;  %748 = vrot.lane.b32.xlu0 %v6058_v16, %s3554_s30 }
 0x185   : > { %v982_v41 = vpop.permute.xlu1 %981  ;;  %v980_v26 = vpop.permute.xlu0 %979 }
 0x186   : > { %v1319_v59 = vsel %vm1312_vm7, %v1290_v60, %v980_v26  ;;  %v1320_v25 = vsel %vm1312_vm7, %v1291_v47, %v982_v41  ;;  %v3542_v60 = vld [vmem:[%s3612_s26 + $0xd1] sm:$0xff] }
 0x187   : > { %835 = vrot.lane.b32.xlu1 %v6065_v27, %s3555_s15  ;;  %1092 = vrot.lane.b32.xlu0 %v6065_v27, %s3558_s20  ;;  %v6070_v27 = vld [vmem:[#allocation49_spill] sm:$0xff] }
 0x189   : > { %v810_v7 = vpop.permute.xlu1 %809  ;;  %v1067_v23 = vpop.permute.xlu0 %1066 }
 0x18a   : > { %v1348_v6 = vsel %vm1341_vm8, %v1319_v59, %v1067_v23  ;;  %v1263_v5 = vsel %vm1254_vm5, %v1234_v32, %v810_v7  ;;  %v1236_v7 = vsel %vm1225_vm4, %v4257_v37, %v4463_v1 }
 0x18b   : > { %922 = vrot.lane.b32.xlu1 %v6013_v15, %s3556_s18  ;;  %920 = vrot.lane.b32.xlu0 %v6015_v58, %s3556_s18  ;;  %v6068_v58 = vld [vmem:[#allocation27_spill] sm:$0xff] }
 0x18c   : > { %3407 = vmatprep.mubr.msk.f32.mxu0 %vm1382_vm9, %v1348_v6 }
 0x18d   : > { %v812_v16 = vpop.permute.xlu1 %811  ;;  %v1069_v57 = vpop.permute.xlu0 %1068 }
 0x18e   : > { %v1349_v55 = vsel %vm1341_vm8, %v1320_v25, %v1069_v57  ;;  %v1264_v56 = vsel %vm1254_vm5, %v1235_v40, %v812_v16  ;;  %v1237_v25 = vsel %vm1225_vm4, %v4254_v0, %v4461_v3  ;;  %v355_v57 = vld [vmem:[%s3612_s26 + $0xda] sm:$0xff]  ;;  %v358_v3 = vld [vmem:[%s3612_s26 + $0xe8] sm:$0xff] }
 0x18f   : > { %750 = vrot.lane.b32.xlu1 %v3540_v21, %s3554_s30  ;;  %1007 = vrot.lane.b32.xlu0 %v3540_v21, %s3557_s19 }
 0x190   : > { %3408 = vmatmul.mubr.msk.f32.gmra.mrb[6].mxu0 %vm1382_vm9, %v1349_v55 }
 0x191   : > { %v899_v15 = vpop.permute.xlu1 %898  ;;  %v897_v50 = vpop.permute.xlu0 %896 }
 0x192   : > { %v1292_v8 = vsel %vm1283_vm6, %v1263_v5, %v897_v50  ;;  %v1293_v12 = vsel %vm1283_vm6, %v1264_v56, %v899_v15  ;;  %v1238_v5 = vsel %vm1225_vm4, %v4277_v36, %v4471_v17  ;;  %v1239_v36 = vsel %vm1225_vm4, %v4274_v35, %v4469_v43 }
 0x193   : > { %1094 = vrot.lane.b32.xlu1 %v6068_v58, %s3558_s20  ;;  %1009 = vrot.lane.b32.xlu0 %v3541_v49, %s3557_s19 }
 0x195   : > { %v986_v34 = vpop.permute.xlu1 %985  ;;  %v984_v30 = vpop.permute.xlu0 %983 }
 0x196   : > { %v1321_v20 = vsel %vm1312_vm7, %v1292_v8, %v984_v30  ;;  %v1322_v45 = vsel %vm1312_vm7, %v1293_v12, %v986_v34  ;;  %v353_v34 = vld [vmem:[%s3612_s26 + $0xe1] sm:$0xff] }
 0x197   : > { %837 = vrot.lane.b32.xlu1 %v6068_v58, %s3555_s15  ;;  %752 = vrot.lane.b32.xlu0 %v3541_v49, %s3554_s30  ;;  %v6072_v49 = vld [vmem:[#allocation53_spill] sm:$0xff] }
 0x199   : > { %v814_v41 = vpop.permute.xlu1 %813  ;;  %v1071_v26 = vpop.permute.xlu0 %1070 }
 0x19a   : > { %v1350_v63 = vsel %vm1341_vm8, %v1321_v20, %v1071_v26  ;;  %v1265_v23 = vsel %vm1254_vm5, %v1236_v7, %v814_v41  ;;  %v356_v41 = vld [vmem:[%s3612_s26 + $0xe2] sm:$0xff]  ;;  %v1240_v7 = vsel %vm1225_vm4, %v4297_v29, %v4479_v18  ;;  %v366_v29 = vld [vmem:[%s3612_s26 + $0xfa] sm:$0x3f]  ;;  %v365_v18 = vld [vmem:[%s3612_s26 + $0xf2] sm:$0xff] }
 0x19b   : > { %839 = vrot.lane.b32.xlu1 %v6069_v19, %s3555_s15  ;;  %1096 = vrot.lane.b32.xlu0 %v6069_v19, %s3558_s20  ;;  %v361_v26 = vld [vmem:[%s3612_s26 + $0xe9] sm:$0xff] }
 0x19c   : > { %3410 = vmatprep.mubr.msk.f32.mxu0 %vm1382_vm9, %v1350_v63 }
 0x19d   : > { %v816_v4 = vpop.permute.xlu1 %815  ;;  %v1073_v9 = vpop.permute.xlu0 %1072 }
 0x19e   : > { %v1351_v14 = vsel %vm1341_vm8, %v1322_v45, %v1073_v9  ;;  %v1266_v1 = vsel %vm1254_vm5, %v1237_v25, %v816_v4  ;;  %v354_v45 = vld [vmem:[%s3612_s26 + $0xe9] sm:$0x3f] }
 0x19f   : > { %926 = vrot.lane.b32.xlu1 %v6070_v27, %s3556_s18  ;;  %924 = vrot.lane.b32.xlu0 %v6019_v61, %s3556_s18  ;;  %v6071_v61 = vld [vmem:[#allocation28_spill] sm:$0xff]  ;;  %v364_v27 = vld [vmem:[%s3612_s26 + $0xea] sm:$0xff] }
 0x1a0   : > { %3411 = vmatmul.mubr.msk.f32.gmra.mrb[8].mxu0 %vm1382_vm9, %v1351_v14  ;;  %v357_v14 = vld [vmem:[%s3612_s26 + $0xea] sm:$0x3f] }
 0x1a1   : > { %v903_v22 = vpop.permute.xlu1 %902  ;;  %v901_v33 = vpop.permute.xlu0 %900 }
 0x1a2   : > { %v1294_v31 = vsel %vm1283_vm6, %v1265_v23, %v901_v33  ;;  %v1295_v16 = vsel %vm1283_vm6, %v1266_v1, %v903_v22 }
 0x1a3   : > { %754 = vrot.lane.b32.xlu1 %v3542_v60, %s3554_s30  ;;  %1011 = vrot.lane.b32.xlu0 %v3542_v60, %s3557_s19  ;;  %v360_v60 = vld [vmem:[%s3612_s26 + $0xf8] sm:$0x3f] }
 0x1a5   : > { %v990_v54 = vpop.permute.xlu1 %989  ;;  %v988_v59 = vpop.permute.xlu0 %987 }
 0x1a6   : > { %v1323_v6 = vsel %vm1312_vm7, %v1294_v31, %v988_v59  ;;  %v1324_v55 = vsel %vm1312_vm7, %v1295_v16, %v990_v54  ;;  %v363_v31 = vld [vmem:[%s3612_s26 + $0xf9] sm:$0x3f] }
 0x1a7   : > { %1098 = vrot.lane.b32.xlu1 %v6071_v61, %s3558_s20  ;;  %1013 = vrot.lane.b32.xlu0 %v352_v44, %s3557_s19 }
 0x1a9   : > { %v818_v62 = vpop.permute.xlu1 %817  ;;  %v1075_v47 = vpop.permute.xlu0 %1074 }
 0x1aa   : > { %v1352_v37 = vsel %vm1341_vm8, %v1323_v6, %v1075_v47  ;;  %v1267_v8 = vsel %vm1254_vm5, %v1238_v5, %v818_v62  ;;  %v362_v6 = vld [vmem:[%s3612_s26 + $0xf1] sm:$0xff] }
 0x1ab   : > { %841 = vrot.lane.b32.xlu1 %v6071_v61, %s3555_s15  ;;  %756 = vrot.lane.b32.xlu0 %v352_v44, %s3554_s30  ;;  %v359_v44 = vld [vmem:[%s3612_s26 + $0xf0] sm:$0xff] }
 0x1ac   : > { %3413 = vmatprep.mubr.msk.f32.mxu0 %vm1382_vm9, %v1352_v37 }
 0x1ad   : > { %v820_v21 = vpop.permute.xlu1 %819  ;;  %v1077_v15 = vpop.permute.xlu0 %1076 }
 0x1ae   : > { %v1353_v0 = vsel %vm1341_vm8, %v1324_v55, %v1077_v15  ;;  %v1268_v19 = vsel %vm1254_vm5, %v1239_v36, %v820_v21 }
 0x1af   : > { %843 = vrot.lane.b32.xlu1 %v355_v57, %s3555_s15  ;;  %1100 = vrot.lane.b32.xlu0 %v355_v57, %s3558_s20  ;;  %v1241_v57 = vsel %vm1225_vm4, %v4294_v28, %v4477_v48 }
 0x1b0   : > { %3414 = vmatmul.mubr.msk.f32.gmra.mrb[10].mxu0 %vm1382_vm9, %v1353_v0 }
 0x1b1   : > { %v907_v50 = vpop.permute.xlu1 %906  ;;  %v905_v58 = vpop.permute.xlu0 %904 }
 0x1b2   : > { %v1296_v20 = vsel %vm1283_vm6, %v1267_v8, %v905_v58  ;;  %v1297_v12 = vsel %vm1283_vm6, %v1268_v19, %v907_v50 }
 0x1b3   : > { %930 = vrot.lane.b32.xlu1 %v358_v3, %s3556_s18  ;;  %928 = vrot.lane.b32.xlu0 %v6072_v49, %s3556_s18 }
 0x1b5   : > { %v994_v30 = vpop.permute.xlu1 %993  ;;  %v992_v32 = vpop.permute.xlu0 %991 }
 0x1b6   : > { %v1325_v40 = vsel %vm1312_vm7, %v1296_v20, %v992_v32  ;;  %v1326_v4 = vsel %vm1312_vm7, %v1297_v12, %v994_v30 }
 0x1b7   : > { %758 = vrot.lane.b32.xlu1 %v353_v34, %s3554_s30  ;;  %1015 = vrot.lane.b32.xlu0 %v353_v34, %s3557_s19 }
 0x1b9   : > { %v822_v63 = vpop.permute.xlu1 %821  ;;  %v1079_v56 = vpop.permute.xlu0 %1078 }
 0x1ba   : > { %v1354_v17 = vsel %vm1341_vm8, %v1325_v40, %v1079_v56  ;;  %v1269_v23 = vsel %vm1254_vm5, %v1240_v7, %v822_v63 }
 0x1bb   : > { %1102 = vrot.lane.b32.xlu1 %v356_v41, %s3558_s20  ;;  %1017 = vrot.lane.b32.xlu0 %v361_v26, %s3557_s19 }
 0x1bc   : > { %3416 = vmatprep.mubr.msk.f32.mxu0 %vm1382_vm9, %v1354_v17 }
 0x1bd   : > { %v824_v9 = vpop.permute.xlu1 %823  ;;  %v1081_v35 = vpop.permute.xlu0 %1080 }
 0x1be   : > { %v1355_v43 = vsel %vm1341_vm8, %v1326_v4, %v1081_v35  ;;  %v1270_v55 = vsel %vm1254_vm5, %v1241_v57, %v824_v9 }
 0x1bf   : > { %845 = vrot.lane.b32.xlu1 %v356_v41, %s3555_s15  ;;  %760 = vrot.lane.b32.xlu0 %v354_v45, %s3554_s30 }
 0x1c0   : > { %3417 = vmatmul.mubr.msk.f32.gmra.mrb[12].mxu0 %vm1382_vm9, %v1355_v43 }
 0x1c1   : > { %v911_v22 = vpop.permute.xlu1 %910  ;;  %v909_v33 = vpop.permute.xlu0 %908 }
 0x1c2   : > { %v1298_v61 = vsel %vm1283_vm6, %v1269_v23, %v909_v33  ;;  %v1299_v21 = vsel %vm1283_vm6, %v1270_v55, %v911_v22 }
 0x1c3   : > { %847 = vrot.lane.b32.xlu1 %v357_v14, %s3555_s15  ;;  %1104 = vrot.lane.b32.xlu0 %v364_v27, %s3558_s20 }
 0x1c5   : > { %v739_v54 = vpop.permute.xlu1 %738  ;;  %v996_v59 = vpop.permute.xlu0 %995 }
 0x1c6   : > { %v1327_v62 = vsel %vm1312_vm7, %v1298_v61, %v996_v59  ;;  %v1242_v48 = vsel %vm1225_vm4, %v4317_v11, %v739_v54 }
 0x1c7   : > { %934 = vrot.lane.b32.xlu1 %v360_v60, %s3556_s18  ;;  %932 = vrot.lane.b32.xlu0 %v359_v44, %s3556_s18 }
 0x1c9   : > { %v1083_v47 = vpop.permute.xlu1 %1082  ;;  %v998_v25 = vpop.permute.xlu0 %997 }
 0x1ca   : > { %v1356_v37 = vsel %vm1341_vm8, %v1327_v62, %v1083_v47  ;;  %v1328_v15 = vsel %vm1312_vm7, %v1299_v21, %v998_v25 }
 0x1cb   : > { %1021 = vrot.lane.b32.xlu1 %v363_v31, %s3557_s19  ;;  %1019 = vrot.lane.b32.xlu0 %v362_v6, %s3557_s19 }
 0x1cc   : > { %3419 = vmatprep.mubr.msk.f32.mxu0 %vm1382_vm9, %v1356_v37 }
 0x1cd   : > { %v826_v1 = vpop.permute.xlu1 %825  ;;  %v741_v16 = vpop.permute.xlu0 %740 }
 0x1ce   : > { %v1271_v30 = vsel %vm1254_vm5, %v1242_v48, %v826_v1  ;;  %v1243_v63 = vsel %vm1225_vm4, %v4314_v10, %v741_v16 }
 0x1cf   : > { %1108 = vrot.lane.b32.xlu1 %v366_v29, %s3558_s20  ;;  %1106 = vrot.lane.b32.xlu0 %v365_v18, %s3558_s20 }
 0x1d1   : > { %v828_v0 = vpop.permute.xlu1 %827  ;;  %v1085_v3 = vpop.permute.xlu0 %1084 }
 0x1d2   : > { %v1357_v50 = vsel %vm1341_vm8, %v1328_v15, %v1085_v3  ;;  %v1272_v56 = vsel %vm1254_vm5, %v1243_v63, %v828_v0 }
 0x1d3   : > { %3420 = vmatmul.mubr.msk.f32.gmra.mrb[14].mxu0 %vm1382_vm9, %v1357_v50 }
 0x1d5   : > { %v915_v58 = vpop.permute.xlu1 %914  ;;  %v913_v49 = vpop.permute.xlu0 %912 }
 0x1d6   : > { %v1300_v32 = vsel %vm1283_vm6, %v1271_v30, %v913_v49  ;;  %v1301_v11 = vsel %vm1283_vm6, %v1272_v56, %v915_v58 }
 0x1d9   : > { %v743_v34 = vpop.permute.xlu1 %742  ;;  %v1000_v28 = vpop.permute.xlu0 %999 }
 0x1da   : > { %v1329_v5 = vsel %vm1312_vm7, %v1300_v32, %v1000_v28  ;;  %v1244_v43 = vsel %vm1225_vm4, %v4337_v39, %v743_v34 }
 0x1dd   : > { %v1087_v8 = vpop.permute.xlu1 %1086  ;;  %v1002_v20 = vpop.permute.xlu0 %1001 }
 0x1de   : > { %v1358_v41 = vsel %vm1341_vm8, %v1329_v5, %v1087_v8  ;;  %v1330_v36 = vsel %vm1312_vm7, %v1301_v11, %v1002_v20 }
 0x1df   : > { %3422 = vmatprep.mubr.msk.f32.mxu0 %vm1382_vm9, %v1358_v41 }
 0x1e1   : > { %v830_v26 = vpop.permute.xlu1 %829  ;;  %v745_v40 = vpop.permute.xlu0 %744 }
 0x1e2   : > { %v1273_v10 = vsel %vm1254_vm5, %v1244_v43, %v830_v26  ;;  %v1245_v59 = vsel %vm1225_vm4, %v4334_v24, %v745_v40 }
 0x1e5   : > { %v832_v17 = vpop.permute.xlu1 %831  ;;  %v1089_v19 = vpop.permute.xlu0 %1088 }
 0x1e6   : > { %v1359_v12 = vsel %vm1341_vm8, %v1330_v36, %v1089_v19  ;;  %v1274_v7 = vsel %vm1254_vm5, %v1245_v59, %v832_v17  ;;  %v4851_v59 = vld [vmem:[%s5866_s2] ss:$0 sm:$0xff] }
 0x1e7   : > { %3423 = vmatmul.mubr.msk.f32.gmra.mrb[16].mxu0 %vm1382_vm9, %v1359_v12 }
 0x1e9   : > { %v919_v45 = vpop.permute.xlu1 %918  ;;  %v917_v4 = vpop.permute.xlu0 %916 }
 0x1ea   : > { %v1302_v14 = vsel %vm1283_vm6, %v1273_v10, %v917_v4  ;;  %v1303_v39 = vsel %vm1283_vm6, %v1274_v7, %v919_v45 }
 0x1ed   : > { %v747_v9 = vpop.permute.xlu1 %746  ;;  %v1004_v35 = vpop.permute.xlu0 %1003 }
 0x1ee   : > { %v1331_v27 = vsel %vm1312_vm7, %v1302_v14, %v1004_v35  ;;  %v1246_v29 = vsel %vm1225_vm4, %v4357_v38, %v747_v9 }
 0x1f1   : > { %v1091_v22 = vpop.permute.xlu1 %1090  ;;  %v1006_v33 = vpop.permute.xlu0 %1005 }
 0x1f2   : > { %v1360_v60 = vsel %vm1341_vm8, %v1331_v27, %v1091_v22  ;;  %v1332_v23 = vsel %vm1312_vm7, %v1303_v39, %v1006_v33 }
 0x1f3   : > { %3425 = vmatprep.mubr.msk.f32.mxu0 %vm1382_vm9, %v1360_v60 }
 0x1f5   : > { %v834_v44 = vpop.permute.xlu1 %833  ;;  %v749_v54 = vpop.permute.xlu0 %748 }
 0x1f6   : > { %v1275_v24 = vsel %vm1254_vm5, %v1246_v29, %v834_v44  ;;  %v1247_v0 = vsel %vm1225_vm4, %v4354_v2, %v749_v54 }
 0x1f9   : > { %v836_v61 = vpop.permute.xlu1 %835  ;;  %v1093_v31 = vpop.permute.xlu0 %1092 }
 0x1fa   : > { %v1361_v6 = vsel %vm1341_vm8, %v1332_v23, %v1093_v31  ;;  %v1276_v3 = vsel %vm1254_vm5, %v1247_v0, %v836_v61 }
 0x1fb   : > { %3426 = vmatmul.mubr.msk.f32.gmra.mrb[18].mxu0 %vm1382_vm9, %v1361_v6 }
 0x1fd   : > { %v923_v62 = vpop.permute.xlu1 %922  ;;  %v921_v47 = vpop.permute.xlu0 %920 }
 0x1fe   : > { %v1304_v18 = vsel %vm1283_vm6, %v1275_v24, %v921_v47  ;;  %v1305_v38 = vsel %vm1283_vm6, %v1276_v3, %v923_v62 }
 0x201   : > { %v751_v25 = vpop.permute.xlu1 %750  ;;  %v1008_v37 = vpop.permute.xlu0 %1007 }
 0x202   : > { %v1333_v1 = vsel %vm1312_vm7, %v1304_v18, %v1008_v37  ;;  %v1248_v5 = vsel %vm1225_vm4, %v4377_v53, %v751_v25 }
 0x205   : > { %v1095_v16 = vpop.permute.xlu1 %1094  ;;  %v1010_v57 = vpop.permute.xlu0 %1009 }
 0x206   : > { %v1362_v55 = vsel %vm1341_vm8, %v1333_v1, %v1095_v16  ;;  %v1334_v50 = vsel %vm1312_vm7, %v1305_v38, %v1010_v57 }
 0x207   : > { %3428 = vmatprep.mubr.msk.f32.mxu0 %vm1382_vm9, %v1362_v55 }
 0x209   : > { %v838_v21 = vpop.permute.xlu1 %837  ;;  %v753_v15 = vpop.permute.xlu0 %752 }
 0x20a   : > { %v1277_v2 = vsel %vm1254_vm5, %v1248_v5, %v838_v21  ;;  %v1249_v11 = vsel %vm1225_vm4, %v4374_v52, %v753_v15 }
 0x20d   : > { %v840_v58 = vpop.permute.xlu1 %839  ;;  %v1097_v49 = vpop.permute.xlu0 %1096 }
 0x20e   : > { %v1363_v34 = vsel %vm1341_vm8, %v1334_v50, %v1097_v49  ;;  %v1278_v36 = vsel %vm1254_vm5, %v1249_v11, %v840_v58 }
 0x20f   : > { %3429 = vmatmul.mubr.msk.f32.gmra.mrb[20].mxu0 %vm1382_vm9, %v1363_v34 }
 0x211   : > { %v927_v28 = vpop.permute.xlu1 %926  ;;  %v925_v48 = vpop.permute.xlu0 %924 }
 0x212   : > { %v1306_v8 = vsel %vm1283_vm6, %v1277_v2, %v925_v48  ;;  %v1307_v53 = vsel %vm1283_vm6, %v1278_v36, %v927_v28 }
 0x215   : > { %v755_v30 = vpop.permute.xlu1 %754  ;;  %v1012_v32 = vpop.permute.xlu0 %1011 }
 0x216   : > { %v1335_v20 = vsel %vm1312_vm7, %v1306_v8, %v1012_v32  ;;  %v1250_v10 = vsel %vm1225_vm4, %v4398_v13, %v755_v30 }
 0x219   : > { %v1099_v41 = vpop.permute.xlu1 %1098  ;;  %v1014_v26 = vpop.permute.xlu0 %1013 }
 0x21a   : > { %v1364_v40 = vsel %vm1341_vm8, %v1335_v20, %v1099_v41  ;;  %v1336_v17 = vsel %vm1312_vm7, %v1307_v53, %v1014_v26 }
 0x21b   : > { %3431 = vmatprep.mubr.msk.f32.mxu0 %vm1382_vm9, %v1364_v40 }
 0x21d   : > { %v842_v63 = vpop.permute.xlu1 %841  ;;  %v757_v56 = vpop.permute.xlu0 %756 }
 0x21e   : > { %v1279_v52 = vsel %vm1254_vm5, %v1250_v10, %v842_v63  ;;  %v1251_v13 = vsel %vm1225_vm4, %v4395_v46, %v757_v56 }
 0x221   : > { %v844_v19 = vpop.permute.xlu1 %843  ;;  %v1101_v12 = vpop.permute.xlu0 %1100 }
 0x222   : > { %v1365_v45 = vsel %vm1341_vm8, %v1336_v17, %v1101_v12  ;;  %v1280_v7 = vsel %vm1254_vm5, %v1251_v13, %v844_v19 }
 0x223   : > { %3432 = vmatmul.mubr.msk.f32.gmra.mrb[22].mxu0 %vm1382_vm9, %v1365_v45 }
 0x225   : > { %v931_v4 = vpop.permute.xlu1 %930  ;;  %v929_v9 = vpop.permute.xlu0 %928 }
 0x226   : > { %v1308_v14 = vsel %vm1283_vm6, %v1279_v52, %v929_v9  ;;  %v1309_v23 = vsel %vm1283_vm6, %v1280_v7, %v931_v4 }
 0x229   : > { %v759_v35 = vpop.permute.xlu1 %758  ;;  %v1016_v43 = vpop.permute.xlu0 %1015 }
 0x22a   : > { %v1337_v27 = vsel %vm1312_vm7, %v1308_v14, %v1016_v43  ;;  %v1252_v57 = vsel %vm1225_vm4, %v4417_v42, %v759_v35 }
 0x22d   : > { %v1103_v22 = vpop.permute.xlu1 %1102  ;;  %v1018_v33 = vpop.permute.xlu0 %1017 }
 0x22e   : > { %v1366_v60 = vsel %vm1341_vm8, %v1337_v27, %v1103_v22  ;;  %v1338_v6 = vsel %vm1312_vm7, %v1309_v23, %v1018_v33 }
 0x22f   : > { %3434 = vmatprep.mubr.msk.f32.mxu0 %vm1382_vm9, %v1366_v60 }
 0x231   : > { %v846_v44 = vpop.permute.xlu1 %845  ;;  %v761_v54 = vpop.permute.xlu0 %760 }
 0x232   : > { %v1253_v55 = vsel %vm1225_vm4, %v4414_v51, %v761_v54  ;;  %v1281_v21 = vsel %vm1254_vm5, %v1252_v57, %v846_v44 }
 0x233   : > { %v3400_v39 = vpop.f32.mrb[0].mxu0 }
 0x234   : > { %v1543_v61 = vadd.f32 %v3400_v39, %v4851_v59  ;;  %v1537_v31 = vpop.f32.mrb[1].mxu0 }
 0x235   : > { %v1538_v62 = vadd.f32 %v4851_v59, %v1537_v31  ;;  %v848_v47 = vpop.permute.xlu1 %847  ;;  %v1105_v25 = vpop.permute.xlu0 %1104 }
 0x236   : > { %v1677_v37 = vmax.f32 %v1543_v61, 0.0  ;;  %v1367_v29 = vsel %vm1341_vm8, %v1338_v6, %v1105_v25  ;;  %v1282_v15 = vsel %vm1254_vm5, %v1253_v55, %v848_v47 }
 0x237   : > { %v1676_v24 = vmax.f32 %v1538_v62, 0.0  ;;  %3435 = vmatmul.mubr.msk.f32.gmra.mrb[24].mxu0 %vm1382_vm9, %v1367_v29 }
 0x238   : > { %1705 = vst.msk [vmem:[#allocation2 + $0x8] sm:$0xff] %vm1167_vm2, %v1677_v37 }
 0x239   : > { %1704 = vst.msk [vmem:[#allocation2] sm:$0xff] %vm1167_vm2, %v1676_v24  ;;  %v935_v46 = vpop.permute.xlu1 %934  ;;  %v933_v18 = vpop.permute.xlu0 %932 }
 0x23a   : > { %v1311_v0 = vsel %vm1283_vm6, %v1282_v15, %v935_v46  ;;  %v1310_v3 = vsel %vm1283_vm6, %v1281_v21, %v933_v18 }
 0x23d   : > { %v1022_v1 = vpop.permute.xlu1 %1021  ;;  %v1020_v16 = vpop.permute.xlu0 %1019 }
 0x23e   : > { %v1340_v50 = vsel %vm1312_vm7, %v1311_v0, %v1022_v1  ;;  %v1339_v58 = vsel %vm1312_vm7, %v1310_v3, %v1020_v16 }
 0x240   : > { %v1757_v38 = vld [vmem:[#allocation2 + $0x1] sm:$0xff] }
 0x241   : > { %1847 = vrot.lane.b32.xlu0 %v1757_v38, %s3552_s28  ;;  %v1109_v49 = vpop.permute.xlu1 %1108  ;;  %v1107_v42 = vpop.permute.xlu0 %1106 }
 0x242   : > { %v1369_v34 = vsel %vm1341_vm8, %v1340_v50, %v1109_v49  ;;  %v1368_v51 = vsel %vm1341_vm8, %v1339_v58, %v1107_v42 }
 0x243   : > { %v3403_v28 = vpop.f32.mrb[2].mxu0  ;;  %3437 = vmatprep.mubr.msk.f32.mxu0 %vm1382_vm9, %v1368_v51 }
 0x244   : > { %v1553_v48 = vadd.f32 %v3403_v28, %v4851_v59  ;;  %v1547_v30 = vpop.f32.mrb[3].mxu0  ;;  %3438 = vmatmul.mubr.msk.f32.gmra.mrb[26].mxu0 %vm1382_vm9, %v1369_v34 }
 0x245   : > { %v1548_v32 = vadd.f32 %v4851_v59, %v1547_v30 }
 0x246   : > { %v1679_v5 = vmax.f32 %v1553_v48, 0.0 }
 0x247   : > { %v1678_v2 = vmax.f32 %v1548_v32, 0.0 }
 0x248   : > { %1707 = vst.msk [vmem:[#allocation2 + $0x18] sm:$0xff] %vm1167_vm2, %v1679_v5 }
 0x249   : > { %1706 = vst.msk [vmem:[#allocation2 + $0x10] sm:$0xff] %vm1167_vm2, %v1678_v2 }
 0x250   : > { %v1758_v8 = vld [vmem:[#allocation2 + $0x9] sm:$0xff]  ;;  %v4883_v20 = vld [vmem:[#allocation2 + $0x11] sm:$0xff] }
 0x251   : > { %1849 = vrot.lane.b32.xlu1 %v1758_v8, %s3552_s28  ;;  %1851 = vrot.lane.b32.xlu0 %v4883_v20, %s3552_s28 }
 0x253   : > { %v3406_v41 = vpop.f32.mrb[4].mxu0 }
 0x254   : > { %v1563_v26 = vadd.f32 %v3406_v41, %v4851_v59  ;;  %v1557_v40 = vpop.f32.mrb[5].mxu0 }
 0x255   : > { %v1558_v63 = vadd.f32 %v4851_v59, %v1557_v40 }
 0x256   : > { %v1681_v56 = vmax.f32 %v1563_v26, 0.0 }
 0x257   : > { %v1680_v11 = vmax.f32 %v1558_v63, 0.0 }
 0x258   : > { %1709 = vst.msk [vmem:[#allocation2 + $0x28] sm:$0xff] %vm1167_vm2, %v1681_v56 }
 0x259   : > { %1708 = vst.msk [vmem:[#allocation2 + $0x20] sm:$0xff] %vm1167_vm2, %v1680_v11 }
 0x260   : > { %v4892_v36 = vld [vmem:[#allocation2 + $0x19] sm:$0xff]  ;;  %v4894_v53 = vld [vmem:[#allocation2 + $0x21] sm:$0xff] }
 0x261   : > { %1853 = vrot.lane.b32.xlu1 %v4892_v36, %s3552_s28  ;;  %1855 = vrot.lane.b32.xlu0 %v4894_v53, %s3552_s28 }
 0x263   : > { %v3409_v17 = vpop.f32.mrb[6].mxu0 }
 0x264   : > { %v1573_v19 = vadd.f32 %v3409_v17, %v4851_v59  ;;  %v1567_v12 = vpop.f32.mrb[7].mxu0 }
 0x265   : > { %v1568_v45 = vadd.f32 %v4851_v59, %v1567_v12 }
 0x266   : > { %v1683_v4 = vmax.f32 %v1573_v19, 0.0 }
 0x267   : > { %v1682_v9 = vmax.f32 %v1568_v45, 0.0 }
 0x268   : > { %1711 = vst.msk [vmem:[#allocation2 + $0x38] sm:$0xff] %vm1167_vm2, %v1683_v4 }
 0x269   : > { %1710 = vst.msk [vmem:[#allocation2 + $0x30] sm:$0xff] %vm1167_vm2, %v1682_v9 }
 0x270   : > { %v4904_v35 = vld [vmem:[#allocation2 + $0x29] sm:$0xff]  ;;  %v4906_v43 = vld [vmem:[#allocation2 + $0x31] sm:$0xff] }
 0x271   : > { %1857 = vrot.lane.b32.xlu1 %v4904_v35, %s3552_s28  ;;  %1859 = vrot.lane.b32.xlu0 %v4906_v43, %s3552_s28 }
 0x273   : > { %v3412_v10 = vpop.f32.mrb[8].mxu0 }
 0x274   : > { %v1583_v52 = vadd.f32 %v3412_v10, %v4851_v59  ;;  %v1577_v14 = vpop.f32.mrb[9].mxu0 }
 0x275   : > { %v1578_v27 = vadd.f32 %v4851_v59, %v1577_v14 }
 0x276   : > { %v1685_v22 = vmax.f32 %v1583_v52, 0.0 }
 0x277   : > { %v1684_v33 = vmax.f32 %v1578_v27, 0.0 }
 0x278   : > { %1713 = vst.msk [vmem:[#allocation2 + $0x48] sm:$0xff] %vm1167_vm2, %v1685_v22 }
 0x279   : > { %1712 = vst.msk [vmem:[#allocation2 + $0x40] sm:$0xff] %vm1167_vm2, %v1684_v33 }
 0x280   : > { %v4916_v60 = vld [vmem:[#allocation2 + $0x39] sm:$0xff]  ;;  %v4918_v44 = vld [vmem:[#allocation2 + $0x41] sm:$0xff] }
 0x281   : > { %1861 = vrot.lane.b32.xlu1 %v4916_v60, %s3552_s28  ;;  %1863 = vrot.lane.b32.xlu0 %v4918_v44, %s3552_s28 }
 0x283   : > { %v3415_v54 = vpop.f32.mrb[10].mxu0 }
 0x284   : > { %v1593_v13 = vadd.f32 %v3415_v54, %v4851_v59  ;;  %v1587_v7 = vpop.f32.mrb[11].mxu0  ;;  %v1781_v54 = vld [vmem:[#allocation2 + $0x2] sm:$0xff] }
 0x285   : > { %v1588_v39 = vadd.f32 %v4851_v59, %v1587_v7 }
 0x286   : > { %v1687_v23 = vmax.f32 %v1593_v13, 0.0  ;;  %v1782_v13 = vld [vmem:[#allocation2 + $0xa] sm:$0xff] }
 0x287   : > { %v1686_v61 = vmax.f32 %v1588_v39, 0.0  ;;  %v5010_v39 = vld [vmem:[#allocation2 + $0x10] sm:$0xff] }
 0x288   : > { %1715 = vst.msk [vmem:[#allocation2 + $0x58] sm:$0xff] %vm1167_vm2, %v1687_v23  ;;  %v5012_v23 = vld [vmem:[#allocation2 + $0x18] sm:$0xff] }
 0x289   : > { %1714 = vst.msk [vmem:[#allocation2 + $0x50] sm:$0xff] %vm1167_vm2, %v1686_v61 }
 0x290   : > { %v4928_v31 = vld [vmem:[#allocation2 + $0x49] sm:$0xff]  ;;  %v4930_v6 = vld [vmem:[#allocation2 + $0x51] sm:$0xff] }
 0x291   : > { %1865 = vrot.lane.b32.xlu1 %v4928_v31, %s3552_s28  ;;  %1867 = vrot.lane.b32.xlu0 %v4930_v6, %s3552_s28 }
 0x293   : > { %v3418_v62 = vpop.f32.mrb[12].mxu0 }
 0x294   : > { %v1603_v47 = vadd.f32 %v3418_v62, %v4851_v59  ;;  %v1597_v25 = vpop.f32.mrb[13].mxu0 }
 0x295   : > { %v1598_v37 = vadd.f32 %v4851_v59, %v1597_v25 }
 0x296   : > { %v1689_v29 = vmax.f32 %v1603_v47, 0.0 }
 0x297   : > { %v1688_v24 = vmax.f32 %v1598_v37, 0.0 }
 0x298   : > { %1717 = vst.msk [vmem:[#allocation2 + $0x68] sm:$0xff] %vm1167_vm2, %v1689_v29  ;;  %v2682_v29 = vld [vmem:[%s5867_s3] sm:$0xff] }
 0x299   : > { %1716 = vst.msk [vmem:[#allocation2 + $0x60] sm:$0xff] %vm1167_vm2, %v1688_v24  ;;  %v2683_v24 = vld [vmem:[%s5867_s3 + $0x8] sm:$0xff] }
 0x2a0   : > { %v4940_v46 = vld [vmem:[#allocation2 + $0x59] sm:$0xff]  ;;  %v4942_v18 = vld [vmem:[#allocation2 + $0x61] sm:$0xff] }
 0x2a1   : > { %1869 = vrot.lane.b32.xlu1 %v4940_v46, %s3552_s28  ;;  %1871 = vrot.lane.b32.xlu0 %v4942_v18, %s3552_s28 }
 0x2a6   : > { %v3421_v1 = vpop.f32.mrb[14].mxu0 }
 0x2a7   : > { %v1613_v16 = vadd.f32 %v3421_v1, %v4851_v59  ;;  %v1607_v57 = vpop.f32.mrb[15].mxu0  ;;  %v3502_v1 = vpack.c.bf16 %v2683_v24, %v2682_v29 }
 0x2a8   : > { %v1608_v55 = vadd.f32 %v4851_v59, %v1607_v57 }
 0x2a9   : > { %v1691_v21 = vmax.f32 %v1613_v16, 0.0  ;;  %v1783_v16 = vld [vmem:[#allocation2 + $0x12] sm:$0xff]  ;;  %3503 = vmatprep.subr.bf16.mxu1 %v3502_v1 }
 0x2aa   : > { %v1690_v15 = vmax.f32 %v1608_v55, 0.0  ;;  %3505 = vmatpush3.bf16.msra.mxu1 %v3502_v1  ;;  %v5040_v55 = vld [vmem:[#allocation2 + $0x20] sm:$0xff]  ;;  %v5171_v1 = vld [vmem:[#allocation2 + $0x50] sm:$0xff] }
 0x2ab   : > { %1719 = vst.msk [vmem:[#allocation2 + $0x78] sm:$0xff] %vm1167_vm2, %v1691_v21 }
 0x2ac   : > { %1718 = vst.msk [vmem:[#allocation2 + $0x70] sm:$0xff] %vm1167_vm2, %v1690_v15  ;;  %v1784_v15 = vld [vmem:[#allocation2 + $0x1a] sm:$0xff] }
 0x2b3   : > { %v4952_v0 = vld [vmem:[#allocation2 + $0x69] sm:$0xff]  ;;  %v4954_v3 = vld [vmem:[#allocation2 + $0x71] sm:$0xff] }
 0x2b4   : > { %1873 = vrot.lane.b32.xlu1 %v4952_v0, %s3552_s28  ;;  %1875 = vrot.lane.b32.xlu0 %v4954_v3, %s3552_s28 }
 0x2ba   : > { %v3424_v38 = vpop.f32.mrb[16].mxu0 }
 0x2bb   : > { %v1623_v50 = vadd.f32 %v3424_v38, %v4851_v59  ;;  %v1617_v58 = vpop.f32.mrb[17].mxu0 }
 0x2bc   : > { %v1618_v49 = vadd.f32 %v4851_v59, %v1617_v58  ;;  %v2686_v58 = vld [vmem:[%s5867_s3 + $0x20] sm:$0xff] }
 0x2bd   : > { %v1693_v42 = vmax.f32 %v1623_v50, 0.0 }
 0x2be   : > { %v1692_v34 = vmax.f32 %v1618_v49, 0.0  ;;  %v2687_v49 = vld [vmem:[%s5867_s3 + $0x28] sm:$0xff] }
 0x2bf   : > { %1721 = vst.msk [vmem:[#allocation2 + $0x88] sm:$0xff] %vm1167_vm2, %v1693_v42 }
 0x2c0   : > { %1720 = vst.msk [vmem:[#allocation2 + $0x80] sm:$0xff] %vm1167_vm2, %v1692_v34  ;;  %v3510_v34 = vpack.c.bf16 %v2687_v49, %v2686_v58  ;;  %v1791_v58 = vld [vmem:[#allocation2 + $0x52] sm:$0xff] }
 0x2c7   : > { %v4964_v51 = vld [vmem:[#allocation2 + $0x79] sm:$0xff]  ;;  %v4966_v28 = vld [vmem:[#allocation2 + $0x81] sm:$0xff] }
 0x2c8   : > { %1877 = vrot.lane.b32.xlu1 %v4964_v51, %s3552_s28  ;;  %1879 = vrot.lane.b32.xlu0 %v4966_v28, %s3552_s28 }
 0x2ce   : > { %v3427_v48 = vpop.f32.mrb[18].mxu0 }
 0x2cf   : > { %v1633_v30 = vadd.f32 %v3427_v48, %v4851_v59  ;;  %v1627_v32 = vpop.f32.mrb[19].mxu0 }
 0x2d0   : > { %v1628_v5 = vadd.f32 %v4851_v59, %v1627_v32  ;;  %v2688_v32 = vld [vmem:[%s5867_s3 + $0x30] sm:$0xff] }
 0x2d1   : > { %v1695_v2 = vmax.f32 %v1633_v30, 0.0 }
 0x2d2   : > { %v1694_v8 = vmax.f32 %v1628_v5, 0.0 }
 0x2d3   : > { %1723 = vst.msk [vmem:[#allocation2 + $0x98] sm:$0xff] %vm1167_vm2, %v1695_v2  ;;  %v5064_v2 = vld [vmem:[#allocation2 + $0x28] sm:$0xff] }
 0x2d4   : > { %1722 = vst.msk [vmem:[#allocation2 + $0x90] sm:$0xff] %vm1167_vm2, %v1694_v8  ;;  %v2690_v8 = vld [vmem:[%s5867_s3 + $0x40] sm:$0xff] }
 0x2db   : > { %v4976_v41 = vld [vmem:[#allocation2 + $0x89] sm:$0xff]  ;;  %v4978_v26 = vld [vmem:[#allocation2 + $0x91] sm:$0xff] }
 0x2dc   : > { %1881 = vrot.lane.b32.xlu1 %v4976_v41, %s3552_s28  ;;  %1883 = vrot.lane.b32.xlu0 %v4978_v26, %s3552_s28 }
 0x2e2   : > { %v3430_v40 = vpop.f32.mrb[20].mxu0 }
 0x2e3   : > { %v1643_v63 = vadd.f32 %v3430_v40, %v4851_v59  ;;  %v1637_v56 = vpop.f32.mrb[21].mxu0  ;;  %v1785_v40 = vld [vmem:[#allocation2 + $0x22] sm:$0xff] }
 0x2e4   : > { %v1638_v17 = vadd.f32 %v4851_v59, %v1637_v56  ;;  %v5085_v56 = vld [vmem:[#allocation2 + $0x30] sm:$0xff] }
 0x2e5   : > { %v1697_v11 = vmax.f32 %v1643_v63, 0.0  ;;  %v1786_v63 = vld [vmem:[#allocation2 + $0x2a] sm:$0xff] }
 0x2e6   : > { %v1696_v19 = vmax.f32 %v1638_v17, 0.0  ;;  %v1788_v17 = vld [vmem:[#allocation2 + $0x3a] sm:$0xff] }
 0x2e7   : > { %1725 = vst.msk [vmem:[#allocation2 + $0xa8] sm:$0xff] %vm1167_vm2, %v1697_v11  ;;  %v5109_v11 = vpop.permute.xlu0 %1847 }
 0x2e8   : > { %1724 = vst.msk [vmem:[#allocation2 + $0xa0] sm:$0xff] %vm1167_vm2, %v1696_v19  ;;  %v5113_v19 = vpop.permute.xlu1 %1849 }
 0x2ef   : > { %v4988_v12 = vld [vmem:[#allocation2 + $0x99] sm:$0xff]  ;;  %v4990_v45 = vld [vmem:[#allocation2 + $0xa1] sm:$0xff] }
 0x2f0   : > { %1885 = vrot.lane.b32.xlu1 %v4988_v12, %s3552_s28  ;;  %1887 = vrot.lane.b32.xlu0 %v4990_v45, %s3552_s28 }
 0x2f6   : > { %v3433_v4 = vpop.f32.mrb[22].mxu0 }
 0x2f7   : > { %v1653_v9 = vadd.f32 %v3433_v4, %v4851_v59  ;;  %v1647_v10 = vpop.f32.mrb[23].mxu0  ;;  %v5117_v4 = vld [vmem:[#allocation2 + $0x40] sm:$0xff] }
 0x2f8   : > { %v1648_v52 = vadd.f32 %v4851_v59, %v1647_v10 }
 0x2f9   : > { %v1699_v14 = vmax.f32 %v1653_v9, 0.0 }
 0x2fa   : > { %v1698_v27 = vmax.f32 %v1648_v52, 0.0 }
 0x2fb   : > { %1727 = vst.msk [vmem:[#allocation2 + $0xb8] sm:$0xff] %vm1167_vm2, %v1699_v14  ;;  %v5133_v14 = vld [vmem:[#allocation2 + $0x48] sm:$0xff] }
 0x2fc   : > { %1726 = vst.msk [vmem:[#allocation2 + $0xb0] sm:$0xff] %vm1167_vm2, %v1698_v27 }
 0x303   : > { %v5000_v22 = vld [vmem:[#allocation2 + $0xa9] sm:$0xff]  ;;  %v5002_v33 = vld [vmem:[#allocation2 + $0xb1] sm:$0xff] }
 0x304   : > { %1889 = vrot.lane.b32.xlu1 %v5000_v22, %s3552_s28  ;;  %1891 = vrot.lane.b32.xlu0 %v5002_v33, %s3552_s28 }
 0x308   : > { %1943 = vrot.lane.b32.xlu1 %v1781_v54, %s3554_s30  ;;  %1945 = vrot.lane.b32.xlu0 %v1782_v13, %s3554_s30 }
 0x30a   : > { %v3436_v7 = vpop.f32.mrb[24].mxu0 }
 0x30b   : > { %v1663_v61 = vadd.f32 %v3436_v7, %v4851_v59  ;;  %v1657_v62 = vpop.f32.mrb[25].mxu0 }
 0x30c   : > { %v1658_v47 = vadd.f32 %v4851_v59, %v1657_v62  ;;  %2039 = vrot.lane.b32.xlu1 %v5010_v39, %s3556_s18  ;;  %2041 = vrot.lane.b32.xlu0 %v5012_v23, %s3556_s18 }
 0x30d   : > { %v1701_v25 = vmax.f32 %v1663_v61, 0.0  ;;  %v1789_v61 = vld [vmem:[#allocation2 + $0x42] sm:$0xff] }
 0x30e   : > { %v1700_v37 = vmax.f32 %v1658_v47, 0.0 }
 0x30f   : > { %1729 = vst.msk [vmem:[#allocation2 + $0xc8] sm:$0xff] %vm1167_vm2, %v1701_v25 }
 0x310   : > { %1728 = vst.msk [vmem:[#allocation2 + $0xc0] sm:$0xff] %vm1167_vm2, %v1700_v37  ;;  %2114 = vrot.lane.b32.xlu1 %v4883_v20, %s3558_s20  ;;  %2116 = vrot.lane.b32.xlu0 %v4892_v36, %s3558_s20  ;;  %v2684_v20 = vld [vmem:[%s5867_s3 + $0x10] sm:$0xff]  ;;  %v2685_v36 = vld [vmem:[%s5867_s3 + $0x18] sm:$0xff] }
 0x311   : > { %v3506_v57 = vpack.c.bf16 %v2685_v36, %v2684_v20  ;;  %v1790_v37 = vld [vmem:[#allocation2 + $0x4a] sm:$0xff] }
 0x313   : > { %3507 = vmatprep.subr.bf16.mxu1 %v3506_v57 }
 0x314   : > { %2189 = vrot.lane.b32.xlu1 %v1783_v16, %s3559_s7  ;;  %1947 = vrot.lane.b32.xlu0 %v1783_v16, %s3554_s30 }
 0x315   : > { %3509 = vmatpush3.bf16.msra.mxu1 %v3506_v57  ;;  %v5187_v57 = vld [vmem:[#allocation2 + $0x58] sm:$0xff] }
 0x316   : > { %3511 = vmatprep.subr.bf16.mxu1 %v3510_v34 }
 0x317   : > { %v3439_v21 = vpop.f32.mrb[26].mxu0 }
 0x318   : > { %v1673_v38 = vadd.f32 %v3439_v21, %v4851_v59  ;;  %v1667_v50 = vpop.f32.mrb[27].mxu0  ;;  %2191 = vrot.lane.b32.xlu1 %v1784_v15, %s3559_s7  ;;  %2264 = vrot.lane.b32.xlu0 %v5040_v55, %s3560_s12 }
 0x319   : > { %v1668_v42 = vadd.f32 %v4851_v59, %v1667_v50  ;;  %3513 = vmatpush3.bf16.msra.mxu1 %v3510_v34  ;;  %v2689_v59 = vld [vmem:[%s5867_s3 + $0x38] sm:$0xff] }
 0x31a   : > { %v1703_v48 = vmax.f32 %v1673_v38, 0.0  ;;  %v3514_v5 = vpack.c.bf16 %v2689_v59, %v2688_v32  ;;  %v5211_v59 = vld [vmem:[#allocation2 + $0x60] sm:$0xff] }
 0x31b   : > { %v1702_v30 = vmax.f32 %v1668_v42, 0.0 }
 0x31c   : > { %1732 = vst.msk [vmem:[#allocation2 + $0xd8] sm:$0x3f] %vm1731_vm10, %v1703_v48  ;;  %1949 = vrot.lane.b32.xlu1 %v1784_v15, %s3554_s30  ;;  %2043 = vrot.lane.b32.xlu0 %v5040_v55, %s3556_s18 }
 0x31d   : > { %1730 = vst.msk [vmem:[#allocation2 + $0xd0] sm:$0xff] %vm1167_vm2, %v1702_v30  ;;  %3515 = vmatprep.subr.bf16.mxu1 %v3514_v5  ;;  %v1792_v30 = vld [vmem:[#allocation2 + $0x5a] sm:$0xff] }
 0x31e   : > { %3517 = vmatpush3.bf16.msra.mxu1 %v3514_v5 }
 0x31f   : > { %3456 = vmatprep.subr.mxu1 %v2690_v8 }
 0x320   : > { %2266 = vrot.lane.b32.xlu1 %v5064_v2, %s3560_s12  ;;  %2339 = vrot.lane.b32.xlu0 %v4894_v53, %s3561_s25 }
 0x322   : > { %3457 = vmatpush3.msra.mxu1 %v2690_v8 }
 0x324   : > { %2045 = vrot.lane.b32.xlu1 %v5064_v2, %s3556_s18  ;;  %2118 = vrot.lane.b32.xlu0 %v4894_v53, %s3558_s20  ;;  %v5093_v53 = vld [vmem:[#allocation2 + $0x38] sm:$0xff] }
 0x328   : > { %2341 = vrot.lane.b32.xlu1 %v4904_v35, %s3561_s25  ;;  %2414 = vrot.lane.b32.xlu0 %v1785_v40, %s3562_s29 }
 0x32c   : > { %2120 = vrot.lane.b32.xlu1 %v4904_v35, %s3558_s20  ;;  %2193 = vrot.lane.b32.xlu0 %v1785_v40, %s3559_s7  ;;  %v1787_v35 = vld [vmem:[#allocation2 + $0x32] sm:$0xff] }
 0x330   : > { %2416 = vrot.lane.b32.xlu1 %v1786_v63, %s3562_s29  ;;  %1951 = vrot.lane.b32.xlu0 %v1785_v40, %s3554_s30 }
 0x334   : > { %2195 = vrot.lane.b32.xlu1 %v1786_v63, %s3559_s7  ;;  %2268 = vrot.lane.b32.xlu0 %v5085_v56, %s3560_s12 }
 0x338   : > { %1953 = vrot.lane.b32.xlu1 %v1786_v63, %s3554_s30  ;;  %2047 = vrot.lane.b32.xlu0 %v5085_v56, %s3556_s18  ;;  %v5223_v63 = vld [vmem:[#allocation2 + $0x68] sm:$0xff] }
 0x33c   : > { %2270 = vrot.lane.b32.xlu1 %v5093_v53, %s3560_s12  ;;  %2343 = vrot.lane.b32.xlu0 %v4906_v43, %s3561_s25 }
 0x340   : > { %2049 = vrot.lane.b32.xlu1 %v5093_v53, %s3556_s18  ;;  %2122 = vrot.lane.b32.xlu0 %v4906_v43, %s3558_s20  ;;  %v5115_v43 = vpop.permute.xlu0 %1851 }
 0x344   : > { %2345 = vrot.lane.b32.xlu1 %v4916_v60, %s3561_s25  ;;  %2418 = vrot.lane.b32.xlu0 %v1787_v35, %s3562_s29  ;;  %v5124_v9 = vpop.permute.xlu0 %1855 }
 0x348   : > { %2124 = vrot.lane.b32.xlu1 %v4916_v60, %s3558_s20  ;;  %2197 = vrot.lane.b32.xlu0 %v1787_v35, %s3559_s7  ;;  %v5122_v60 = vpop.permute.xlu1 %1853  ;;  %v5131_v52 = vpop.permute.xlu0 %1859 }
 0x34c   : > { %2420 = vrot.lane.b32.xlu1 %v1788_v17, %s3562_s29  ;;  %1955 = vrot.lane.b32.xlu0 %v1787_v35, %s3554_s30  ;;  %v5129_v10 = vpop.permute.xlu1 %1857  ;;  %v5141_v54 = vpop.permute.xlu0 %1863 }
 0x350   : > { %2199 = vrot.lane.b32.xlu1 %v1788_v17, %s3559_s7  ;;  %2272 = vrot.lane.b32.xlu0 %v5117_v4, %s3560_s12  ;;  %v5139_v27 = vpop.permute.xlu1 %1861  ;;  %v5149_v7 = vpop.permute.xlu0 %1867 }
 0x354   : > { %1957 = vrot.lane.b32.xlu1 %v1788_v17, %s3554_s30  ;;  %2051 = vrot.lane.b32.xlu0 %v5117_v4, %s3556_s18  ;;  %v5147_v13 = vpop.permute.xlu1 %1865  ;;  %v5156_v47 = vpop.permute.xlu0 %1871 }
 0x358   : > { %2274 = vrot.lane.b32.xlu1 %v5133_v14, %s3560_s12  ;;  %2347 = vrot.lane.b32.xlu0 %v4918_v44, %s3561_s25  ;;  %v5154_v62 = vpop.permute.xlu1 %1869  ;;  %v5163_v25 = vpop.permute.xlu0 %1875 }
 0x35c   : > { %2053 = vrot.lane.b32.xlu1 %v5133_v14, %s3556_s18  ;;  %2126 = vrot.lane.b32.xlu0 %v4918_v44, %s3558_s20  ;;  %v5161_v44 = vpop.permute.xlu1 %1873  ;;  %v5169_v24 = vpop.permute.xlu0 %1879 }
 0x360   : > { %2349 = vrot.lane.b32.xlu1 %v4928_v31, %s3561_s25  ;;  %2422 = vrot.lane.b32.xlu0 %v1789_v61, %s3562_s29  ;;  %v5167_v29 = vpop.permute.xlu1 %1877  ;;  %v5178_v16 = vpop.permute.xlu0 %1883 }
 0x364   : > { %2128 = vrot.lane.b32.xlu1 %v4928_v31, %s3558_s20  ;;  %2201 = vrot.lane.b32.xlu0 %v1789_v61, %s3559_s7  ;;  %v5176_v31 = vpop.permute.xlu1 %1881  ;;  %v5185_v36 = vpop.permute.xlu0 %1887 }
 0x365   : > { %6074 = vst [vmem:[#allocation43_spill] sm:$0xff] %v5185_v36 }
 0x368   : > { %2424 = vrot.lane.b32.xlu1 %v1790_v37, %s3562_s29  ;;  %1959 = vrot.lane.b32.xlu0 %v1789_v61, %s3554_s30  ;;  %v5183_v20 = vpop.permute.xlu1 %1885  ;;  %v1733_v61 = vld [vmem:[#allocation2] sm:$0xff] }
 0x369   : > { %6073 = vst [vmem:[#allocation48_spill] sm:$0xff] %v5183_v20  ;;  %v1793_v20 = vld [vmem:[#allocation2 + $0x62] sm:$0xff] }
 0x36c   : > { %2203 = vrot.lane.b32.xlu1 %v1790_v37, %s3559_s7  ;;  %2276 = vrot.lane.b32.xlu0 %v5171_v1, %s3560_s12 }
 0x370   : > { %1961 = vrot.lane.b32.xlu1 %v1790_v37, %s3554_s30  ;;  %2055 = vrot.lane.b32.xlu0 %v5171_v1, %s3556_s18  ;;  %v2486_v37 = vsel %vm1167_vm2, %v1733_v61, %v5109_v11 }
 0x374   : > { %2278 = vrot.lane.b32.xlu1 %v5187_v57, %s3560_s12  ;;  %2351 = vrot.lane.b32.xlu0 %v4930_v6, %s3561_s25 }
 0x376   : > { %v5193_v21 = vpop.permute.xlu1 %1889  ;;  %v5195_v15 = vpop.permute.xlu0 %1891 }
 0x377   : > { %6075 = vst [vmem:[#allocation51_spill] sm:$0xff] %v5193_v21  ;;  %6076 = vst [vmem:[#allocation44_spill] sm:$0xff] %v5195_v15 }
 0x378   : > { %2057 = vrot.lane.b32.xlu1 %v5187_v57, %s3556_s18  ;;  %2130 = vrot.lane.b32.xlu0 %v4930_v6, %s3558_s20 }
 0x37a   : > { %v1944_v38 = vpop.permute.xlu1 %1943  ;;  %v1946_v50 = vpop.permute.xlu0 %1945 }
 0x37c   : > { %2353 = vrot.lane.b32.xlu1 %v4940_v46, %s3561_s25  ;;  %2426 = vrot.lane.b32.xlu0 %v1791_v58, %s3562_s29 }
 0x37e   : > { %v2040_v49 = vpop.permute.xlu1 %2039  ;;  %v2042_v42 = vpop.permute.xlu0 %2041 }
 0x380   : > { %2132 = vrot.lane.b32.xlu1 %v4940_v46, %s3558_s20  ;;  %2205 = vrot.lane.b32.xlu0 %v1791_v58, %s3559_s7 }
 0x382   : > { %v2115_v34 = vpop.permute.xlu1 %2114  ;;  %v2117_v48 = vpop.permute.xlu0 %2116 }
 0x384   : > { %2428 = vrot.lane.b32.xlu1 %v1792_v30, %s3562_s29  ;;  %1963 = vrot.lane.b32.xlu0 %v1791_v58, %s3554_s30  ;;  %v2510_v58 = vsel %vm1225_vm4, %v2486_v37, %v1944_v38  ;;  %v1734_v37 = vld [vmem:[#allocation2 + $0x8] sm:$0xff] }
 0x386   : > { %v2190_v6 = vpop.permute.xlu1 %2189  ;;  %v5209_v32 = vpop.permute.xlu0 %1947 }
 0x388   : > { %2207 = vrot.lane.b32.xlu1 %v1792_v30, %s3559_s7  ;;  %2280 = vrot.lane.b32.xlu0 %v5211_v59, %s3560_s12 }
 0x38a   : > { %v2192_v46 = vpop.permute.xlu1 %2191  ;;  %v2265_v5 = vpop.permute.xlu0 %2264 }
 0x38c   : > { %1965 = vrot.lane.b32.xlu1 %v1792_v30, %s3554_s30  ;;  %2059 = vrot.lane.b32.xlu0 %v5211_v59, %s3556_s18  ;;  %v2534_v30 = vsel %vm1283_vm6, %v2510_v58, %v2040_v49  ;;  %v2487_v58 = vsel %vm1167_vm2, %v1734_v37, %v5113_v19 }
 0x38d   : > { %v2558_v36 = vsel %vm1341_vm8, %v2534_v30, %v2115_v34 }
 0x38e   : > { %v5219_v8 = vpop.permute.xlu1 %1949  ;;  %v5221_v40 = vpop.permute.xlu0 %2043  ;;  %v2583_v11 = vsel %vm2582_vm11, %v2558_v36, %v2190_v6  ;;  %v2511_v36 = vsel %vm1225_vm4, %v2487_v58, %v1946_v50  ;;  %v2488_v58 = vsel %vm1167_vm2, %v5010_v39, %v5115_v43 }
 0x38f   : > { %v2535_v6 = vsel %vm1283_vm6, %v2511_v36, %v2042_v42  ;;  %v2512_v36 = vsel %vm1225_vm4, %v2488_v58, %v5209_v32  ;;  %v1796_v58 = vld [vmem:[#allocation2 + $0x7a] sm:$0xff] }
 0x390   : > { %2282 = vrot.lane.b32.xlu1 %v5223_v63, %s3560_s12  ;;  %2355 = vrot.lane.b32.xlu0 %v4942_v18, %s3561_s25  ;;  %v2559_v30 = vsel %vm1341_vm8, %v2535_v6, %v2117_v48  ;;  %v2536_v6 = vsel %vm1283_vm6, %v2512_v36, %v5221_v40 }
 0x392   : > { %v2267_v35 = vpop.permute.xlu1 %2266  ;;  %v2340_v17 = vpop.permute.xlu0 %2339 }
 0x394   : > { %2061 = vrot.lane.b32.xlu1 %v5223_v63, %s3556_s18  ;;  %2134 = vrot.lane.b32.xlu0 %v4942_v18, %s3558_s20  ;;  %v2608_v18 = vsel %vm2607_vm12, %v2583_v11, %v2265_v5  ;;  %v1794_v11 = vld [vmem:[#allocation2 + $0x6a] sm:$0xff] }
 0x395   : > { %v2633_v38 = vsel %vm2632_vm13, %v2608_v18, %v2340_v17  ;;  %v2584_v18 = vsel %vm2582_vm11, %v2559_v30, %v2192_v46 }
 0x396   : > { %v5237_v15 = vpop.permute.xlu1 %2045  ;;  %v2119_v21 = vpop.permute.xlu0 %2118 }
 0x398   : > { %2357 = vrot.lane.b32.xlu1 %v4952_v0, %s3561_s25  ;;  %2430 = vrot.lane.b32.xlu0 %v1793_v20, %s3562_s29 }
 0x39a   : > { %v2342_v49 = vpop.permute.xlu1 %2341  ;;  %v2415_v61 = vpop.permute.xlu0 %2414 }
 0x39b   : > { %v2658_v34 = vsel %vm2657_vm14, %v2633_v38, %v2415_v61  ;;  %v5263_v61 = vld [vmem:[#allocation2 + $0x70] sm:$0xff] }
 0x39c   : > { %2136 = vrot.lane.b32.xlu1 %v4952_v0, %s3558_s20  ;;  %2209 = vrot.lane.b32.xlu0 %v1793_v20, %s3559_s7  ;;  %v2609_v0 = vsel %vm2607_vm12, %v2584_v18, %v2267_v35  ;;  %v2560_v18 = vsel %vm1341_vm8, %v2536_v6, %v2119_v21  ;;  %v2489_v21 = vsel %vm1167_vm2, %v5012_v23, %v5122_v60  ;;  %v5321_v6 = vld [vmem:[#allocation2 + $0x80] sm:$0xff] }
 0x39d   : > { %3458 = vmatprep.mubr.msk.f32.mxu1 %vm2698_vm15, %v2658_v34  ;;  %v2634_v19 = vsel %vm2632_vm13, %v2609_v0, %v2342_v49  ;;  %v5275_v49 = vld [vmem:[#allocation2 + $0x78] sm:$0xff] }
 0x39e   : > { %v2121_v5 = vpop.permute.xlu1 %2120  ;;  %v2194_v17 = vpop.permute.xlu0 %2193  ;;  %v1795_v0 = vld [vmem:[#allocation2 + $0x72] sm:$0xff] }
 0x39f   : > { %v2585_v39 = vsel %vm2582_vm11, %v2560_v18, %v2194_v17  ;;  %v2513_v17 = vsel %vm1225_vm4, %v2489_v21, %v5219_v8 }
 0x3a0   : > { %2432 = vrot.lane.b32.xlu1 %v1794_v11, %s3562_s29  ;;  %1967 = vrot.lane.b32.xlu0 %v1793_v20, %s3554_s30 }
 0x3a2   : > { %v2417_v50 = vpop.permute.xlu1 %2416  ;;  %v5261_v38 = vpop.permute.xlu0 %1951 }
 0x3a3   : > { %v2659_v42 = vsel %vm2657_vm14, %v2634_v19, %v2417_v50  ;;  %v2537_v50 = vsel %vm1283_vm6, %v2513_v17, %v5237_v15 }
 0x3a4   : > { %2211 = vrot.lane.b32.xlu1 %v1794_v11, %s3559_s7  ;;  %2284 = vrot.lane.b32.xlu0 %v5263_v61, %s3560_s12 }
 0x3a5   : > { %3459 = vmatmul.mubr.msk.f32.vlgmr.msra.gmra.mrb[0].mxu1 %vm2698_vm15, %v2659_v42 }
 0x3a6   : > { %v2196_v48 = vpop.permute.xlu1 %2195  ;;  %v2269_v20 = vpop.permute.xlu0 %2268 }
 0x3a8   : > { %1969 = vrot.lane.b32.xlu1 %v1794_v11, %s3554_s30  ;;  %2063 = vrot.lane.b32.xlu0 %v5263_v61, %s3556_s18 }
 0x3aa   : > { %v5273_v46 = vpop.permute.xlu1 %1953  ;;  %v2048_v35 = vpop.permute.xlu0 %2047 }
 0x3ac   : > { %2286 = vrot.lane.b32.xlu1 %v5275_v49, %s3560_s12  ;;  %2359 = vrot.lane.b32.xlu0 %v4954_v3, %s3561_s25 }
 0x3ae   : > { %v2271_v37 = vpop.permute.xlu1 %2270  ;;  %v2344_v34 = vpop.permute.xlu0 %2343 }
 0x3b0   : > { %2065 = vrot.lane.b32.xlu1 %v5275_v49, %s3556_s18  ;;  %2138 = vrot.lane.b32.xlu0 %v4954_v3, %s3558_s20  ;;  %v2610_v3 = vsel %vm2607_vm12, %v2585_v39, %v2269_v20 }
 0x3b1   : > { %v2635_v43 = vsel %vm2632_vm13, %v2610_v3, %v2344_v34  ;;  %v2561_v34 = vsel %vm1341_vm8, %v2537_v50, %v2121_v5  ;;  %v1797_v50 = vld [vmem:[#allocation2 + $0x82] sm:$0xff] }
 0x3b2   : > { %v5292_v30 = vpop.permute.xlu1 %2049  ;;  %v2123_v11 = vpop.permute.xlu0 %2122  ;;  %v2586_v23 = vsel %vm2582_vm11, %v2561_v34, %v2196_v48 }
 0x3b4   : > { %2361 = vrot.lane.b32.xlu1 %v4964_v51, %s3561_s25  ;;  %2434 = vrot.lane.b32.xlu0 %v1795_v0, %s3562_s29 }
 0x3b6   : > { %v2346_v32 = vpop.permute.xlu1 %2345  ;;  %v2419_v19 = vpop.permute.xlu0 %2418 }
 0x3b7   : > { %v2660_v40 = vsel %vm2657_vm14, %v2635_v43, %v2419_v19  ;;  %v2490_v43 = vsel %vm1167_vm2, %v5040_v55, %v5124_v9 }
 0x3b8   : > { %2140 = vrot.lane.b32.xlu1 %v4964_v51, %s3558_s20  ;;  %2213 = vrot.lane.b32.xlu0 %v1795_v0, %s3559_s7  ;;  %v2611_v51 = vsel %vm2607_vm12, %v2586_v23, %v2271_v37 }
 0x3b9   : > { %3461 = vmatprep.mubr.msk.f32.mxu1 %vm2698_vm15, %v2660_v40  ;;  %v2636_v60 = vsel %vm2632_vm13, %v2611_v51, %v2346_v32  ;;  %v2514_v32 = vsel %vm1225_vm4, %v2490_v43, %v5261_v38  ;;  %v5390_v43 = vld [vmem:[#allocation2 + $0x98] sm:$0xff] }
 0x3ba   : > { %v2125_v42 = vpop.permute.xlu1 %2124  ;;  %v2198_v20 = vpop.permute.xlu0 %2197  ;;  %v2538_v19 = vsel %vm1283_vm6, %v2514_v32, %v2048_v35 }
 0x3bb   : > { %v2562_v17 = vsel %vm1341_vm8, %v2538_v19, %v2123_v11  ;;  %v2491_v11 = vsel %vm1167_vm2, %v5064_v2, %v5129_v10 }
 0x3bc   : > { %2436 = vrot.lane.b32.xlu1 %v1796_v58, %s3562_s29  ;;  %1971 = vrot.lane.b32.xlu0 %v1795_v0, %s3554_s30  ;;  %v5333_v0 = vld [vmem:[#allocation2 + $0x88] sm:$0xff]  ;;  %v2587_v34 = vsel %vm2582_vm11, %v2562_v17, %v2198_v20  ;;  %v2515_v20 = vsel %vm1225_vm4, %v2491_v11, %v5273_v46  ;;  %v2492_v17 = vsel %vm1167_vm2, %v5085_v56, %v5131_v52 }
 0x3be   : > { %v2421_v8 = vpop.permute.xlu1 %2420  ;;  %v5319_v36 = vpop.permute.xlu0 %1955 }
 0x3bf   : > { %v2661_v15 = vsel %vm2657_vm14, %v2636_v60, %v2421_v8  ;;  %v1798_v8 = vld [vmem:[#allocation2 + $0x8a] sm:$0xff] }
 0x3c0   : > { %2215 = vrot.lane.b32.xlu1 %v1796_v58, %s3559_s7  ;;  %2288 = vrot.lane.b32.xlu0 %v5321_v6, %s3560_s12 }
 0x3c1   : > { %3462 = vmatmul.mubr.msk.f32.gmra.mrb[2].mxu1 %vm2698_vm15, %v2661_v15 }
 0x3c2   : > { %v2200_v5 = vpop.permute.xlu1 %2199  ;;  %v2273_v48 = vpop.permute.xlu0 %2272 }
 0x3c4   : > { %1973 = vrot.lane.b32.xlu1 %v1796_v58, %s3554_s30  ;;  %2067 = vrot.lane.b32.xlu0 %v5321_v6, %s3556_s18  ;;  %v2539_v58 = vsel %vm1283_vm6, %v2515_v20, %v5292_v30 }
 0x3c5   : > { %v2563_v60 = vsel %vm1341_vm8, %v2539_v58, %v2125_v42 }
 0x3c6   : > { %v5331_v37 = vpop.permute.xlu1 %1957  ;;  %v2052_v18 = vpop.permute.xlu0 %2051  ;;  %v2588_v2 = vsel %vm2582_vm11, %v2563_v60, %v2200_v5 }
 0x3c8   : > { %2290 = vrot.lane.b32.xlu1 %v5333_v0, %s3560_s12  ;;  %2363 = vrot.lane.b32.xlu0 %v4966_v28, %s3561_s25 }
 0x3ca   : > { %v2275_v39 = vpop.permute.xlu1 %2274  ;;  %v2348_v3 = vpop.permute.xlu0 %2347 }
 0x3cc   : > { %2069 = vrot.lane.b32.xlu1 %v5333_v0, %s3556_s18  ;;  %2142 = vrot.lane.b32.xlu0 %v4966_v28, %s3558_s20  ;;  %v2612_v28 = vsel %vm2607_vm12, %v2587_v34, %v2273_v48  ;;  %v5378_v48 = vld [vmem:[#allocation2 + $0x90] sm:$0xff] }
 0x3cd   : > { %v2637_v55 = vsel %vm2632_vm13, %v2612_v28, %v2348_v3 }
 0x3ce   : > { %v5349_v40 = vpop.permute.xlu1 %2053  ;;  %v2127_v21 = vpop.permute.xlu0 %2126 }
 0x3d0   : > { %2365 = vrot.lane.b32.xlu1 %v4976_v41, %s3561_s25  ;;  %2438 = vrot.lane.b32.xlu0 %v1797_v50, %s3562_s29 }
 0x3d2   : > { %v2350_v9 = vpop.permute.xlu1 %2349  ;;  %v2423_v38 = vpop.permute.xlu0 %2422 }
 0x3d3   : > { %v2662_v35 = vsel %vm2657_vm14, %v2637_v55, %v2423_v38  ;;  %v1799_v38 = vld [vmem:[#allocation2 + $0x92] sm:$0xff] }
 0x3d4   : > { %2144 = vrot.lane.b32.xlu1 %v4976_v41, %s3558_s20  ;;  %2217 = vrot.lane.b32.xlu0 %v1797_v50, %s3559_s7  ;;  %v2613_v41 = vsel %vm2607_vm12, %v2588_v2, %v2275_v39 }
 0x3d5   : > { %3464 = vmatprep.mubr.msk.f32.mxu1 %vm2698_vm15, %v2662_v35  ;;  %v2638_v10 = vsel %vm2632_vm13, %v2613_v41, %v2350_v9  ;;  %v5435_v41 = vld [vmem:[#allocation2 + $0xa0] sm:$0xff] }
 0x3d6   : > { %v2129_v23 = vpop.permute.xlu1 %2128  ;;  %v2202_v51 = vpop.permute.xlu0 %2201 }
 0x3d8   : > { %2440 = vrot.lane.b32.xlu1 %v1798_v8, %s3562_s29  ;;  %1975 = vrot.lane.b32.xlu0 %v1797_v50, %s3554_s30  ;;  %v2516_v50 = vsel %vm1225_vm4, %v2492_v17, %v5319_v36 }
 0x3d9   : > { %v2540_v34 = vsel %vm1283_vm6, %v2516_v50, %v2052_v18 }
 0x3da   : > { %v2425_v46 = vpop.permute.xlu1 %2424  ;;  %v5376_v15 = vpop.permute.xlu0 %1959  ;;  %v2564_v9 = vsel %vm1341_vm8, %v2540_v34, %v2127_v21  ;;  %v2493_v21 = vsel %vm1167_vm2, %v5093_v53, %v5139_v27 }
 0x3db   : > { %v2663_v30 = vsel %vm2657_vm14, %v2638_v10, %v2425_v46  ;;  %v2589_v35 = vsel %vm2582_vm11, %v2564_v9, %v2202_v51  ;;  %v2517_v11 = vsel %vm1225_vm4, %v2493_v21, %v5331_v37 }
 0x3dc   : > { %2219 = vrot.lane.b32.xlu1 %v1798_v8, %s3559_s7  ;;  %2292 = vrot.lane.b32.xlu0 %v5378_v48, %s3560_s12  ;;  %v2541_v20 = vsel %vm1283_vm6, %v2517_v11, %v5349_v40  ;;  %v1802_v11 = vld [vmem:[#allocation2 + $0xaa] sm:$0xff] }
 0x3dd   : > { %3465 = vmatmul.mubr.msk.f32.gmra.mrb[4].mxu1 %vm2698_vm15, %v2663_v30  ;;  %v2565_v60 = vsel %vm1341_vm8, %v2541_v20, %v2129_v23 }
 0x3de   : > { %v2204_v42 = vpop.permute.xlu1 %2203  ;;  %v2277_v5 = vpop.permute.xlu0 %2276 }
 0x3df   : > { %v2590_v53 = vsel %vm2582_vm11, %v2565_v60, %v2204_v42  ;;  %v5447_v42 = vld [vmem:[#allocation2 + $0xa8] sm:$0xff] }
 0x3e0   : > { %1977 = vrot.lane.b32.xlu1 %v1798_v8, %s3554_s30  ;;  %2071 = vrot.lane.b32.xlu0 %v5378_v48, %s3556_s18  ;;  %v1800_v8 = vld [vmem:[#allocation2 + $0x9a] sm:$0xff] }
 0x3e2   : > { %v5388_v39 = vpop.permute.xlu1 %1961  ;;  %v2056_v3 = vpop.permute.xlu0 %2055 }
 0x3e4   : > { %2294 = vrot.lane.b32.xlu1 %v5390_v43, %s3560_s12  ;;  %2367 = vrot.lane.b32.xlu0 %v4978_v26, %s3561_s25 }
 0x3e6   : > { %v2279_v32 = vpop.permute.xlu1 %2278  ;;  %v2352_v19 = vpop.permute.xlu0 %2351 }
 0x3e8   : > { %2073 = vrot.lane.b32.xlu1 %v5390_v43, %s3556_s18  ;;  %2146 = vrot.lane.b32.xlu0 %v4978_v26, %s3558_s20  ;;  %v2614_v26 = vsel %vm2607_vm12, %v2589_v35, %v2277_v5  ;;  %v1801_v35 = vld [vmem:[#allocation2 + $0xa2] sm:$0xff] }
 0x3e9   : > { %v2639_v56 = vsel %vm2632_vm13, %v2614_v26, %v2352_v19  ;;  %v2494_v19 = vsel %vm1167_vm2, %v5117_v4, %v5141_v54 }
 0x3ea   : > { %v5406_v28 = vpop.permute.xlu1 %2057  ;;  %v2131_v55 = vpop.permute.xlu0 %2130  ;;  %v2518_v17 = vsel %vm1225_vm4, %v2494_v19, %v5376_v15 }
 0x3eb   : > { %v2542_v50 = vsel %vm1283_vm6, %v2518_v17, %v2056_v3  ;;  %v1808_v17 = vld [vmem:[#allocation2 + $0xb9] sm:$0xff] }
 0x3ec   : > { %2369 = vrot.lane.b32.xlu1 %v4988_v12, %s3561_s25  ;;  %2442 = vrot.lane.b32.xlu0 %v1799_v38, %s3562_s29 }
 0x3ee   : > { %v2354_v52 = vpop.permute.xlu1 %2353  ;;  %v2427_v36 = vpop.permute.xlu0 %2426 }
 0x3ef   : > { %v2664_v18 = vsel %vm2657_vm14, %v2639_v56, %v2427_v36 }
 0x3f0   : > { %2148 = vrot.lane.b32.xlu1 %v4988_v12, %s3558_s20  ;;  %2221 = vrot.lane.b32.xlu0 %v1799_v38, %s3559_s7  ;;  %v2615_v12 = vsel %vm2607_vm12, %v2590_v53, %v2279_v32 }
 0x3f1   : > { %3467 = vmatprep.mubr.msk.f32.mxu1 %vm2698_vm15, %v2664_v18  ;;  %v2640_v27 = vsel %vm2632_vm13, %v2615_v12, %v2354_v52  ;;  %v1805_v12 = vld [vmem:[#allocation2 + $0xb8] sm:$0xff] }
 0x3f2   : > { %v2133_v58 = vpop.permute.xlu1 %2132  ;;  %v2206_v51 = vpop.permute.xlu0 %2205 }
 0x3f4   : > { %2444 = vrot.lane.b32.xlu1 %v1800_v8, %s3562_s29  ;;  %1979 = vrot.lane.b32.xlu0 %v1799_v38, %s3554_s30  ;;  %v2566_v38 = vsel %vm1341_vm8, %v2542_v50, %v2131_v55  ;;  %v2495_v55 = vsel %vm1167_vm2, %v5133_v14, %v5147_v13  ;;  %v1803_v50 = vld [vmem:[#allocation2 + $0xb2] sm:$0xff] }
 0x3f5   : > { %v2591_v26 = vsel %vm2582_vm11, %v2566_v38, %v2206_v51  ;;  %v2519_v56 = vsel %vm1225_vm4, %v2495_v55, %v5388_v39  ;;  %v5492_v51 = vld [vmem:[#allocation2 + $0xb0] sm:$0xff] }
 0x3f6   : > { %v2429_v37 = vpop.permute.xlu1 %2428  ;;  %v5433_v2 = vpop.permute.xlu0 %1963  ;;  %v2543_v52 = vsel %vm1283_vm6, %v2519_v56, %v5406_v28 }
 0x3f7   : > { %v2665_v40 = vsel %vm2657_vm14, %v2640_v27, %v2429_v37  ;;  %v2567_v21 = vsel %vm1341_vm8, %v2543_v52, %v2133_v58 }
 0x3f8   : > { %2223 = vrot.lane.b32.xlu1 %v1800_v8, %s3559_s7  ;;  %2296 = vrot.lane.b32.xlu0 %v5435_v41, %s3560_s12 }
 0x3f9   : > { %3468 = vmatmul.mubr.msk.f32.gmra.mrb[6].mxu1 %vm2698_vm15, %v2665_v40  ;;  %v2496_v40 = vsel %vm1167_vm2, %v5171_v1, %v5149_v7 }
 0x3fa   : > { %v2208_v23 = vpop.permute.xlu1 %2207  ;;  %v2281_v10 = vpop.permute.xlu0 %2280 }
 0x3fb   : > { %v2592_v14 = vsel %vm2582_vm11, %v2567_v21, %v2208_v23  ;;  %v2520_v23 = vsel %vm1225_vm4, %v2496_v40, %v5433_v2  ;;  %v1804_v21 = vld [vmem:[#allocation2 + $0xba] sm:$0xf] }
 0x3fc   : > { %1981 = vrot.lane.b32.xlu1 %v1800_v8, %s3554_s30  ;;  %2075 = vrot.lane.b32.xlu0 %v5435_v41, %s3556_s18 }
 0x3fe   : > { %v5445_v46 = vpop.permute.xlu1 %1965  ;;  %v2060_v30 = vpop.permute.xlu0 %2059 }
 0x400   : > { %2298 = vrot.lane.b32.xlu1 %v5447_v42, %s3560_s12  ;;  %2371 = vrot.lane.b32.xlu0 %v4990_v45, %s3561_s25 }
 0x402   : > { %v2283_v5 = vpop.permute.xlu1 %2282  ;;  %v2356_v32 = vpop.permute.xlu0 %2355 }
 0x404   : > { %2077 = vrot.lane.b32.xlu1 %v5447_v42, %s3556_s18  ;;  %2150 = vrot.lane.b32.xlu0 %v4990_v45, %s3558_s20  ;;  %v2616_v45 = vsel %vm2607_vm12, %v2591_v26, %v2281_v10  ;;  %v2544_v10 = vsel %vm1283_vm6, %v2520_v23, %v2060_v30 }
 0x405   : > { %v2641_v4 = vsel %vm2632_vm13, %v2616_v45, %v2356_v32 }
 0x406   : > { %v5463_v34 = vpop.permute.xlu1 %2061  ;;  %v2135_v9 = vpop.permute.xlu0 %2134 }
 0x407   : > { %v2568_v19 = vsel %vm1341_vm8, %v2544_v10, %v2135_v9  ;;  %v2497_v9 = vsel %vm1167_vm2, %v5187_v57, %v5154_v62  ;;  %v1817_v10 = vld [vmem:[#allocation2 + $0xc9] sm:$0xff] }
 0x408   : > { %2373 = vrot.lane.b32.xlu1 %v5000_v22, %s3561_s25  ;;  %2446 = vrot.lane.b32.xlu0 %v1801_v35, %s3562_s29 }
 0x40a   : > { %v2358_v54 = vpop.permute.xlu1 %2357  ;;  %v2431_v15 = vpop.permute.xlu0 %2430 }
 0x40b   : > { %v2666_v3 = vsel %vm2657_vm14, %v2641_v4, %v2431_v15  ;;  %v1811_v15 = vld [vmem:[#allocation2 + $0xba] sm:$0xff] }
 0x40c   : > { %2152 = vrot.lane.b32.xlu1 %v5000_v22, %s3558_s20  ;;  %2225 = vrot.lane.b32.xlu0 %v1801_v35, %s3559_s7  ;;  %v2617_v22 = vsel %vm2607_vm12, %v2592_v14, %v2283_v5 }
 0x40d   : > { %3470 = vmatprep.mubr.msk.f32.mxu1 %vm2698_vm15, %v2666_v3  ;;  %v2642_v13 = vsel %vm2632_vm13, %v2617_v22, %v2358_v54  ;;  %v1780_v3 = vld [vmem:[#allocation2 + $0xb9] sm:$0xf]  ;;  %v1814_v22 = vld [vmem:[#allocation2 + $0xc8] sm:$0xff] }
 0x40e   : > { %v2137_v36 = vpop.permute.xlu1 %2136  ;;  %v2210_v18 = vpop.permute.xlu0 %2209 }
 0x40f   : > { %v2593_v38 = vsel %vm2582_vm11, %v2568_v19, %v2210_v18  ;;  %v1806_v18 = vld [vmem:[#allocation2 + $0xc0] sm:$0xff] }
 0x410   : > { %2448 = vrot.lane.b32.xlu1 %v1802_v11, %s3562_s29  ;;  %1983 = vrot.lane.b32.xlu0 %v1801_v35, %s3554_s30  ;;  %v2521_v35 = vsel %vm1225_vm4, %v2497_v9, %v5445_v46  ;;  %v1820_v9 = vld [vmem:[#allocation2 + $0xca] sm:$0xff] }
 0x411   : > { %v2545_v26 = vsel %vm1283_vm6, %v2521_v35, %v5463_v34 }
 0x412   : > { %v2433_v39 = vpop.permute.xlu1 %2432  ;;  %v5490_v20 = vpop.permute.xlu0 %1967  ;;  %v2569_v54 = vsel %vm1341_vm8, %v2545_v26, %v2137_v36 }
 0x413   : > { %v2667_v28 = vsel %vm2657_vm14, %v2642_v13, %v2433_v39 }
 0x414   : > { %2227 = vrot.lane.b32.xlu1 %v1802_v11, %s3559_s7  ;;  %2300 = vrot.lane.b32.xlu0 %v5492_v51, %s3560_s12 }
 0x415   : > { %3471 = vmatmul.mubr.msk.f32.gmra.mrb[8].mxu1 %vm2698_vm15, %v2667_v28  ;;  %v1809_v28 = vld [vmem:[#allocation2 + $0xc1] sm:$0xff] }
 0x416   : > { %v2212_v58 = vpop.permute.xlu1 %2211  ;;  %v2285_v60 = vpop.permute.xlu0 %2284 }
 0x417   : > { %v2594_v62 = vsel %vm2582_vm11, %v2569_v54, %v2212_v58  ;;  %v1807_v58 = vld [vmem:[#allocation2 + $0xc8] sm:$0xf]  ;;  %v1815_v54 = vld [vmem:[#allocation2 + $0xd0] sm:$0xff] }
 0x418   : > { %1985 = vrot.lane.b32.xlu1 %v1802_v11, %s3554_s30  ;;  %2079 = vrot.lane.b32.xlu0 %v5492_v51, %s3556_s18 }
 0x41a   : > { %v5502_v8 = vpop.permute.xlu1 %1969  ;;  %v5504_v53 = vpop.permute.xlu0 %2063 }
 0x41c   : > { %2302 = vrot.lane.b32.xlu1 %v1805_v12, %s3560_s12  ;;  %2375 = vrot.lane.b32.xlu0 %v5002_v33, %s3561_s25 }
 0x41e   : > { %v2287_v27 = vpop.permute.xlu1 %2286  ;;  %v2360_v37 = vpop.permute.xlu0 %2359 }
 0x41f   : > { %v2619_v57 = vsel %vm2607_vm12, %v2594_v62, %v2287_v27  ;;  %v1818_v62 = vld [vmem:[#allocation2 + $0xd1] sm:$0xff] }
 0x420   : > { %2081 = vrot.lane.b32.xlu1 %v1805_v12, %s3556_s18  ;;  %2154 = vrot.lane.b32.xlu0 %v5002_v33, %s3558_s20  ;;  %v2618_v33 = vsel %vm2607_vm12, %v2593_v38, %v2285_v60  ;;  %v2498_v60 = vsel %vm1167_vm2, %v5211_v59, %v5156_v47  ;;  %v1810_v38 = vld [vmem:[#allocation2 + $0xc9] sm:$0xf] }
 0x421   : > { %v2643_v7 = vsel %vm2632_vm13, %v2618_v33, %v2360_v37  ;;  %v2522_v12 = vsel %vm1225_vm4, %v2498_v60, %v5490_v20 }
 0x422   : > { %v5518_v5 = vpop.permute.xlu1 %2065  ;;  %v2139_v32 = vpop.permute.xlu0 %2138  ;;  %v2546_v27 = vsel %vm1283_vm6, %v2522_v12, %v5504_v53 }
 0x423   : > { %v2570_v23 = vsel %vm1341_vm8, %v2546_v27, %v2139_v32  ;;  %v2499_v32 = vsel %vm1167_vm2, %v5223_v63, %v5161_v44 }
 0x424   : > { %2377 = vrot.lane.b32.xlu1 %v1808_v17, %s3561_s25  ;;  %2450 = vrot.lane.b32.xlu0 %v1803_v50, %s3562_s29  ;;  %v2523_v33 = vsel %vm1225_vm4, %v2499_v32, %v5502_v8 }
 0x426   : > { %v2362_v1 = vpop.permute.xlu1 %2361  ;;  %v2435_v2 = vpop.permute.xlu0 %2434 }
 0x427   : > { %v2668_v30 = vsel %vm2657_vm14, %v2643_v7, %v2435_v2  ;;  %v2644_v46 = vsel %vm2632_vm13, %v2619_v57, %v2362_v1  ;;  %v2547_v7 = vsel %vm1283_vm6, %v2523_v33, %v5518_v5  ;;  %v1813_v5 = vld [vmem:[#allocation2 + $0xca] sm:$0xf] }
 0x428   : > { %2156 = vrot.lane.b32.xlu1 %v1808_v17, %s3558_s20  ;;  %2229 = vrot.lane.b32.xlu0 %v1803_v50, %s3559_s7 }
 0x429   : > { %3473 = vmatprep.mubr.msk.f32.mxu1 %vm2698_vm15, %v2668_v30 }
 0x42a   : > { %v2141_v45 = vpop.permute.xlu1 %2140  ;;  %v2214_v4 = vpop.permute.xlu0 %2213 }
 0x42b   : > { %v2595_v19 = vsel %vm2582_vm11, %v2570_v23, %v2214_v4  ;;  %v2571_v30 = vsel %vm1341_vm8, %v2547_v7, %v2141_v45  ;;  %v2502_v7 = vsel %vm1167_vm2, %v5321_v6, %v5169_v24 }
 0x42c   : > { %2452 = vrot.lane.b32.xlu1 %v1811_v15, %s3562_s29  ;;  %1893 = vrot.lane.b32.xlu0 %v1780_v3, %s3552_s28  ;;  %v1816_v3 = vld [vmem:[#allocation2 + $0xd8] sm:$0xf] }
 0x42e   : > { %v2437_v55 = vpop.permute.xlu1 %2436  ;;  %v5543_v56 = vpop.permute.xlu0 %1971 }
 0x42f   : > { %v2669_v34 = vsel %vm2657_vm14, %v2644_v46, %v2437_v55  ;;  %v1819_v55 = vld [vmem:[#allocation2 + $0xd9] sm:$0xf] }
 0x430   : > { %1987 = vrot.lane.b32.xlu1 %v1803_v50, %s3554_s30  ;;  %2231 = vrot.lane.b32.xlu0 %v1811_v15, %s3559_s7  ;;  %v1812_v50 = vld [vmem:[#allocation2 + $0xc2] sm:$0xff] }
 0x431   : > { %3474 = vmatmul.mubr.msk.f32.gmra.mrb[10].mxu1 %vm2698_vm15, %v2669_v34  ;;  %v1821_v34 = vld [vmem:[#allocation2 + $0xd2] sm:$0xff] }
 0x432   : > { %v2216_v52 = vpop.permute.xlu1 %2215  ;;  %v2289_v36 = vpop.permute.xlu0 %2288 }
 0x433   : > { %v2620_v47 = vsel %vm2607_vm12, %v2595_v19, %v2289_v36  ;;  %v2596_v35 = vsel %vm2582_vm11, %v2571_v30, %v2216_v52 }
 0x434   : > { %2304 = vrot.lane.b32.xlu1 %v1806_v18, %s3560_s12  ;;  %1989 = vrot.lane.b32.xlu0 %v1804_v21, %s3554_s30  ;;  %v2500_v21 = vsel %vm1167_vm2, %v5263_v61, %v5163_v25 }
 0x436   : > { %v5551_v11 = vpop.permute.xlu1 %1973  ;;  %v5553_v14 = vpop.permute.xlu0 %2067 }
 0x438   : > { %2083 = vrot.lane.b32.xlu1 %v1806_v18, %s3556_s18  ;;  %2306 = vrot.lane.b32.xlu0 %v1814_v22, %s3560_s12  ;;  %v1822_v18 = vld [vmem:[#allocation2 + $0xda] sm:$0xf]  ;;  %v2524_v22 = vsel %vm1225_vm4, %v2500_v21, %v5543_v56  ;;  %v2501_v56 = vsel %vm1167_vm2, %v5275_v49, %v5167_v29 }
 0x43a   : > { %v2291_v13 = vpop.permute.xlu1 %2290  ;;  %v2364_v39 = vpop.permute.xlu0 %2363 }
 0x43b   : > { %v2645_v59 = vsel %vm2632_vm13, %v2620_v47, %v2364_v39  ;;  %v2621_v44 = vsel %vm2607_vm12, %v2596_v35, %v2291_v13  ;;  %v2548_v13 = vsel %vm1283_vm6, %v2524_v22, %v5553_v14  ;;  %v2525_v14 = vsel %vm1225_vm4, %v2501_v56, %v5551_v11  ;;  %v5640_v35 = vld [vmem:[%s5868_s4] ss:$0 sm:$0xff] }
 0x43c   : > { %2379 = vrot.lane.b32.xlu1 %v1809_v28, %s3561_s25  ;;  %2085 = vrot.lane.b32.xlu0 %v1807_v58, %s3556_s18  ;;  %s3518_s18 = smul.u32 192, %s6082_s22 }
 0x43e   : > { %v5566_v37 = vpop.permute.xlu1 %2069  ;;  %v2143_v40 = vpop.permute.xlu0 %2142  ;;  %s5665_s8 = scalar_lea.vmem %s5869_s5, %s3518_s18 }
 0x43f   : > { %v2572_v58 = vsel %vm1341_vm8, %v2548_v13, %v2143_v40  ;;  %v2549_v40 = vsel %vm1283_vm6, %v2525_v14, %v5566_v37 }
 0x440   : > { %2158 = vrot.lane.b32.xlu1 %v1809_v28, %s3558_s20  ;;  %2381 = vrot.lane.b32.xlu0 %v1817_v10, %s3561_s25 }
 0x442   : > { %v2366_v20 = vpop.permute.xlu1 %2365  ;;  %v2439_v17 = vpop.permute.xlu0 %2438 }
 0x443   : > { %v2670_v53 = vsel %vm2657_vm14, %v2645_v59, %v2439_v17  ;;  %v2646_v63 = vsel %vm2632_vm13, %v2621_v44, %v2366_v20 }
 0x444   : > { %2454 = vrot.lane.b32.xlu1 %v1812_v50, %s3562_s29  ;;  %2160 = vrot.lane.b32.xlu0 %v1810_v38, %s3558_s20 }
 0x445   : > { %3476 = vmatprep.mubr.msk.f32.mxu1 %vm2698_vm15, %v2670_v53 }
 0x446   : > { %v2145_v1 = vpop.permute.xlu1 %2144  ;;  %v2218_v2 = vpop.permute.xlu0 %2217 }
 0x447   : > { %v2597_v60 = vsel %vm2582_vm11, %v2572_v58, %v2218_v2  ;;  %v2573_v47 = vsel %vm1341_vm8, %v2549_v40, %v2145_v1 }
 0x448   : > { %2233 = vrot.lane.b32.xlu1 %v1812_v50, %s3559_s7  ;;  %2456 = vrot.lane.b32.xlu0 %v1820_v9, %s3562_s29 }
 0x44a   : > { %v2441_v8 = vpop.permute.xlu1 %2440  ;;  %v1976_v26 = vpop.permute.xlu0 %1975 }
 0x44b   : > { %v2671_v4 = vsel %vm2657_vm14, %v2646_v63, %v2441_v8  ;;  %v2526_v1 = vsel %vm1225_vm4, %v2502_v7, %v1976_v26 }
 0x44c   : > { %2235 = vrot.lane.b32.xlu1 %v1813_v5, %s3559_s7  ;;  %2308 = vrot.lane.b32.xlu0 %v1815_v54, %s3560_s12 }
 0x44d   : > { %3477 = vmatmul.mubr.msk.f32.gmra.mrb[12].mxu1 %vm2698_vm15, %v2671_v4 }
 0x44e   : > { %v2220_v45 = vpop.permute.xlu1 %2219  ;;  %v2293_v15 = vpop.permute.xlu0 %2292 }
 0x44f   : > { %v2622_v12 = vsel %vm2607_vm12, %v2597_v60, %v2293_v15  ;;  %v2598_v59 = vsel %vm2582_vm11, %v2573_v47, %v2220_v45 }
 0x450   : > { %2310 = vrot.lane.b32.xlu1 %v1816_v3, %s3560_s12  ;;  %2383 = vrot.lane.b32.xlu0 %v1818_v62, %s3561_s25  ;;  %v2503_v62 = vsel %vm1167_vm2, %v5333_v0, %v5176_v31  ;;  %s5720_s12 = scalar_lea.vmem %s5870_s6, %s3519_s9 }
 0x452   : > { %v5597_v57 = vpop.permute.xlu1 %1977  ;;  %v2072_v46 = vpop.permute.xlu0 %2071 }
 0x453   : > { %v2550_v2 = vsel %vm1283_vm6, %v2526_v1, %v2072_v46 }
 0x454   : > { %2385 = vrot.lane.b32.xlu1 %v1819_v55, %s3561_s25  ;;  %2458 = vrot.lane.b32.xlu0 %v1821_v34, %s3562_s29  ;;  %v2527_v55 = vsel %vm1225_vm4, %v2503_v62, %v5597_v57 }
 0x456   : > { %v2295_v52 = vpop.permute.xlu1 %2294  ;;  %v2368_v36 = vpop.permute.xlu0 %2367 }
 0x457   : > { %v2647_v27 = vsel %vm2632_vm13, %v2622_v12, %v2368_v36  ;;  %v2623_v20 = vsel %vm2607_vm12, %v2598_v59, %v2295_v52 }
 0x458   : > { %2460 = vrot.lane.b32.xlu1 %v1822_v18, %s3562_s29 }
 0x45a   : > { %v2074_v39 = vpop.permute.xlu1 %2073  ;;  %v2147_v28 = vpop.permute.xlu0 %2146 }
 0x45b   : > { %v2574_v44 = vsel %vm1341_vm8, %v2550_v2, %v2147_v28  ;;  %v2551_v34 = vsel %vm1283_vm6, %v2527_v55, %v2074_v39 }
 0x45e   : > { %v2370_v23 = vpop.permute.xlu1 %2369  ;;  %v2443_v25 = vpop.permute.xlu0 %2442 }
 0x45f   : > { %v2672_v61 = vsel %vm2657_vm14, %v2647_v27, %v2443_v25  ;;  %v2648_v17 = vsel %vm2632_vm13, %v2623_v20, %v2370_v23 }
 0x460   : > { %3479 = vmatprep.mubr.msk.f32.mxu1 %vm2698_vm15, %v2672_v61  ;;  %v2504_v61 = vsel %vm1167_vm2, %v5378_v48, %v5178_v16 }
 0x462   : > { %v2149_v10 = vpop.permute.xlu1 %2148  ;;  %v2222_v19 = vpop.permute.xlu0 %2221 }
 0x463   : > { %v2599_v63 = vsel %vm2582_vm11, %v2574_v44, %v2222_v19  ;;  %v2575_v18 = vsel %vm1341_vm8, %v2551_v34, %v2149_v10 }
 0x466   : > { %v2445_v53 = vpop.permute.xlu1 %2444  ;;  %v1980_v29 = vpop.permute.xlu0 %1979 }
 0x467   : > { %v2673_v49 = vsel %vm2657_vm14, %v2648_v17, %v2445_v53  ;;  %v2528_v56 = vsel %vm1225_vm4, %v2504_v61, %v1980_v29 }
 0x468   : > { %3480 = vmatmul.mubr.msk.f32.gmra.mrb[14].mxu1 %vm2698_vm15, %v2673_v49 }
 0x46a   : > { %v2224_v11 = vpop.permute.xlu1 %2223  ;;  %v2297_v50 = vpop.permute.xlu0 %2296 }
 0x46b   : > { %v2624_v24 = vsel %vm2607_vm12, %v2599_v63, %v2297_v50  ;;  %v2600_v21 = vsel %vm2582_vm11, %v2575_v18, %v2224_v11 }
 0x46e   : > { %v5628_v38 = vpop.permute.xlu1 %1981  ;;  %v2076_v37 = vpop.permute.xlu0 %2075 }
 0x46f   : > { %v2552_v14 = vsel %vm1283_vm6, %v2528_v56, %v2076_v37  ;;  %v6077_v37 = vld [vmem:[#allocation48_spill] sm:$0xff] }
 0x472   : > { %v2299_v32 = vpop.permute.xlu1 %2298  ;;  %v2372_v33 = vpop.permute.xlu0 %2371 }
 0x473   : > { %v2649_v4 = vsel %vm2632_vm13, %v2624_v24, %v2372_v33  ;;  %v2625_v31 = vsel %vm2607_vm12, %v2600_v21, %v2299_v32  ;;  %v2505_v32 = vsel %vm1167_vm2, %v5390_v43, %v6077_v37 }
 0x474   : > { %v2529_v7 = vsel %vm1225_vm4, %v2505_v32, %v5628_v38 }
 0x476   : > { %v5635_v30 = vpop.permute.xlu1 %2077  ;;  %v2151_v9 = vpop.permute.xlu0 %2150 }
 0x477   : > { %v2576_v19 = vsel %vm1341_vm8, %v2552_v14, %v2151_v9  ;;  %v2553_v1 = vsel %vm1283_vm6, %v2529_v7, %v5635_v30  ;;  %v6080_v7 = vld [vmem:[#allocation44_spill] sm:$0xff] }
 0x478   : > { %v3460_v8 = vpop.f32.mrb[0].mxu1 }
 0x479   : > { %v2843_v6 = vadd.f32 %v3460_v8, %v5640_v35  ;;  %v2837_v26 = vpop.f32.mrb[1].mxu1 }
 0x47a   : > { %v2838_v5 = vadd.f32 %v5640_v35, %v2837_v26  ;;  %v2374_v54 = vpop.permute.xlu1 %2373  ;;  %v2447_v45 = vpop.permute.xlu0 %2446 }
 0x47b   : > { %v2957_v15 = vmax.f32 %v2843_v6, 0.0  ;;  %v2674_v3 = vsel %vm2657_vm14, %v2649_v4, %v2447_v45  ;;  %v2650_v0 = vsel %vm2632_vm13, %v2625_v31, %v2374_v54 }
 0x47c   : > { %v2956_v46 = vmax.f32 %v2838_v5, 0.0  ;;  %3482 = vmatprep.mubr.msk.f32.mxu1 %vm2698_vm15, %v2674_v3 }
 0x47d   : > { %2981 = vst.msk [vmem:[#allocation3 + $0x8] sm:$0xff] %vm1167_vm2, %v2957_v15 }
 0x47e   : > { %2980 = vst.msk [vmem:[#allocation3] sm:$0xff] %vm1167_vm2, %v2956_v46  ;;  %v2153_v52 = vpop.permute.xlu1 %2152  ;;  %v2226_v36 = vpop.permute.xlu0 %2225 }
 0x47f   : > { %v2601_v47 = vsel %vm2582_vm11, %v2576_v19, %v2226_v36  ;;  %v2577_v43 = vsel %vm1341_vm8, %v2553_v1, %v2153_v52  ;;  %v6079_v19 = vld [vmem:[#allocation51_spill] sm:$0xff]  ;;  %v2508_v1 = vsel %vm1167_vm2, %v5492_v51, %v6080_v7 }
 0x482   : > { %v2449_v57 = vpop.permute.xlu1 %2448  ;;  %v5668_v22 = vpop.permute.xlu0 %1983 }
 0x483   : > { %v2675_v13 = vsel %vm2657_vm14, %v2650_v0, %v2449_v57  ;;  %v6078_v0 = vld [vmem:[#allocation43_spill] sm:$0xff] }
 0x484   : > { %v3006_v39 = vld [vmem:[#allocation3 + $0x8] sm:$0xf]  ;;  %3483 = vmatmul.mubr.msk.f32.gmra.mrb[16].mxu1 %vm2698_vm15, %v2675_v13  ;;  %v2506_v57 = vsel %vm1167_vm2, %v5435_v41, %v6078_v0  ;;  %v2507_v41 = vsel %vm1167_vm2, %v5447_v42, %v6079_v19 }
 0x485   : > { %3008 = vst.msk [vmem:[%s5665_s8 + $0x8] sm:$0xf] %vm3003_vm0, %v3006_v39  ;;  %v3005_v28 = vld [vmem:[#allocation3] sm:$0xff]  ;;  %v2530_v39 = vsel %vm1225_vm4, %v2506_v57, %v5668_v22 }
 0x486   : > { %3007 = vst.msk [vmem:[%s5665_s8] sm:$0xff] %vm1167_vm2, %v3005_v28  ;;  %v2228_v58 = vpop.permute.xlu1 %2227  ;;  %v2301_v60 = vpop.permute.xlu0 %2300  ;;  %v3064_v6 = vld [vmem:[#allocation3] ss:$2 sm:$0x3f] }
 0x487   : > { %v2626_v20 = vsel %vm2607_vm12, %v2601_v47, %v2301_v60  ;;  %v2602_v44 = vsel %vm2582_vm11, %v2577_v43, %v2228_v58  ;;  %v3066_v26 = vld [vmem:[#allocation3 + $0x1] ss:$2 sm:$0x3f] }
 0x488   : > { %v3071_v62 = vmax.f32 %v3064_v6, %v3066_v26 }
 0x48a   : > { %v5676_v12 = vpop.permute.xlu1 %1985  ;;  %v5678_v27 = vpop.permute.xlu0 %2079 }
 0x48b   : > { %v2554_v60 = vsel %vm1283_vm6, %v2530_v39, %v5678_v27 }
 0x48e   : > { %v2303_v23 = vpop.permute.xlu1 %2302  ;;  %v2376_v25 = vpop.permute.xlu0 %2375 }
 0x48f   : > { %v2651_v49 = vsel %vm2632_vm13, %v2626_v20, %v2376_v25  ;;  %v2627_v63 = vsel %vm2607_vm12, %v2602_v44, %v2303_v23 }
 0x492   : > { %v5685_v40 = vpop.permute.xlu1 %2081  ;;  %v2155_v10 = vpop.permute.xlu0 %2154 }
 0x493   : > { %v2578_v56 = vsel %vm1341_vm8, %v2554_v60, %v2155_v10 }
 0x494   : > { %v3463_v59 = vpop.f32.mrb[2].mxu1 }
 0x495   : > { %v2853_v17 = vadd.f32 %v3463_v59, %v5640_v35  ;;  %v2847_v53 = vpop.f32.mrb[3].mxu1  ;;  %v2531_v59 = vsel %vm1225_vm4, %v2507_v41, %v5676_v12 }
 0x496   : > { %v2848_v16 = vadd.f32 %v5640_v35, %v2847_v53  ;;  %v2378_v48 = vpop.permute.xlu1 %2377  ;;  %v2451_v29 = vpop.permute.xlu0 %2450  ;;  %v2555_v27 = vsel %vm1283_vm6, %v2531_v59, %v5685_v40 }
 0x497   : > { %v2959_v11 = vmax.f32 %v2853_v17, 0.0  ;;  %v2676_v50 = vsel %vm2657_vm14, %v2651_v49, %v2451_v29  ;;  %v2652_v38 = vsel %vm2632_vm13, %v2627_v63, %v2378_v48  ;;  %v1756_v63 = vld [vmem:[#allocation2 + $0xb8] sm:$0xf] }
 0x498   : > { %v2958_v33 = vmax.f32 %v2848_v16, 0.0  ;;  %3485 = vmatprep.mubr.msk.f32.mxu1 %vm2698_vm15, %v2676_v50 }
 0x499   : > { %2983 = vst.msk [vmem:[#allocation3 + $0x18] sm:$0xff] %vm1167_vm2, %v2959_v11 }
 0x49a   : > { %2982 = vst.msk [vmem:[#allocation3 + $0x10] sm:$0xff] %vm1167_vm2, %v2958_v33  ;;  %v2157_v2 = vpop.permute.xlu1 %2156  ;;  %v2230_v9 = vpop.permute.xlu0 %2229 }
 0x49b   : > { %v2603_v47 = vsel %vm2582_vm11, %v2578_v56, %v2230_v9  ;;  %v2579_v53 = vsel %vm1341_vm8, %v2555_v27, %v2157_v2 }
 0x49e   : > { %v2453_v8 = vpop.permute.xlu1 %2452  ;;  %v5708_v24 = vpop.permute.xlu0 %1893 }
 0x49f   : > { %v2677_v30 = vsel %vm2657_vm14, %v2652_v38, %v2453_v8  ;;  %v2509_v8 = vsel %vm1167_vm2, %v1756_v63, %v5708_v24 }
 0x4a0   : > { %v3010_v4 = vld [vmem:[#allocation3 + $0x18] sm:$0xf]  ;;  %3486 = vmatmul.mubr.msk.f32.gmra.mrb[18].mxu1 %vm2698_vm15, %v2677_v30 }
 0x4a1   : > { %3293 = vst.msk [vmem:[%s5665_s8 + $0x18] sm:$0xf] %vm3003_vm0, %v3010_v4  ;;  %v3009_v5 = vld [vmem:[#allocation3 + $0x10] sm:$0xff] }
 0x4a2   : > { %v3068_v54 = vld [vmem:[#allocation3 + $0x10] ss:$2 sm:$0x3f]  ;;  %3292 = vst.msk [vmem:[%s5665_s8 + $0x10] sm:$0xff] %vm1167_vm2, %v3009_v5  ;;  %v1988_v15 = vpop.permute.xlu1 %1987  ;;  %v2232_v3 = vpop.permute.xlu0 %2231 }
 0x4a3   : > { %v3070_v45 = vld [vmem:[#allocation3 + $0x11] ss:$2 sm:$0x3f]  ;;  %v2604_v12 = vsel %vm2582_vm11, %v2579_v53, %v2232_v3  ;;  %v2532_v2 = vsel %vm1225_vm4, %v2508_v1, %v1988_v15 }
 0x4a4   : > { %v3072_v46 = vmax.f32 %v3068_v54, %v3070_v45 }
 0x4a6   : > { %v3073_v55 = vmax.f32 %v3071_v62, %v3072_v46  ;;  %v2305_v34 = vpop.permute.xlu1 %2304  ;;  %v1990_v52 = vpop.permute.xlu0 %1989 }
 0x4a7   : > { %v2628_v20 = vsel %vm2607_vm12, %v2603_v47, %v2305_v34  ;;  %v2533_v30 = vsel %vm1225_vm4, %v2509_v8, %v1990_v52 }
 0x4a8   : > { %3074 = vst.msk [vmem:[%s5720_s12] sm:$0x3f] %vm1731_vm10, %v3073_v55 }
 0x4aa   : > { %v2084_v36 = vpop.permute.xlu1 %2083  ;;  %v2307_v18 = vpop.permute.xlu0 %2306 }
 0x4ab   : > { %v2629_v16 = vsel %vm2607_vm12, %v2604_v12, %v2307_v18  ;;  %v2556_v9 = vsel %vm1283_vm6, %v2532_v2, %v2084_v36 }
 0x4ae   : > { %v2380_v21 = vpop.permute.xlu1 %2379  ;;  %v2086_v31 = vpop.permute.xlu0 %2085 }
 0x4af   : > { %v2653_v10 = vsel %vm2632_vm13, %v2628_v20, %v2380_v21  ;;  %v2557_v51 = vsel %vm1283_vm6, %v2533_v30, %v2086_v31 }
 0x4b0   : > { %v3466_v13 = vpop.f32.mrb[4].mxu1 }
 0x4b1   : > { %v2863_v28 = vadd.f32 %v3466_v13, %v5640_v35  ;;  %v2857_v58 = vpop.f32.mrb[5].mxu1 }
 0x4b2   : > { %v2858_v23 = vadd.f32 %v5640_v35, %v2857_v58  ;;  %v2159_v25 = vpop.permute.xlu1 %2158  ;;  %v2382_v61 = vpop.permute.xlu0 %2381 }
 0x4b3   : > { %v2961_v14 = vmax.f32 %v2863_v28, 0.0  ;;  %v2654_v40 = vsel %vm2632_vm13, %v2629_v16, %v2382_v61  ;;  %v2580_v38 = vsel %vm1341_vm8, %v2556_v9, %v2159_v25 }
 0x4b4   : > { %v2960_v22 = vmax.f32 %v2858_v23, 0.0 }
 0x4b5   : > { %2985 = vst.msk [vmem:[#allocation3 + $0x28] sm:$0xff] %vm1167_vm2, %v2961_v14 }
 0x4b6   : > { %2984 = vst.msk [vmem:[#allocation3 + $0x20] sm:$0xff] %vm1167_vm2, %v2960_v22  ;;  %v2455_v42 = vpop.permute.xlu1 %2454  ;;  %v2161_v17 = vpop.permute.xlu0 %2160 }
 0x4b7   : > { %v2678_v49 = vsel %vm2657_vm14, %v2653_v10, %v2455_v42  ;;  %v2581_v45 = vsel %vm1341_vm8, %v2557_v51, %v2161_v17 }
 0x4b8   : > { %3488 = vmatprep.mubr.msk.f32.mxu1 %vm2698_vm15, %v2678_v49 }
 0x4ba   : > { %v2234_v48 = vpop.permute.xlu1 %2233  ;;  %v2457_v29 = vpop.permute.xlu0 %2456 }
 0x4bb   : > { %v2679_v11 = vsel %vm2657_vm14, %v2654_v40, %v2457_v29  ;;  %v2605_v6 = vsel %vm2582_vm11, %v2580_v38, %v2234_v48 }
 0x4bc   : > { %v3015_v50 = vld [vmem:[#allocation3 + $0x28] sm:$0xf]  ;;  %3489 = vmatmul.mubr.msk.f32.gmra.mrb[20].mxu1 %vm2698_vm15, %v2679_v11 }
 0x4bd   : > { %3295 = vst.msk [vmem:[%s5665_s8 + $0x28] sm:$0xf] %vm3003_vm0, %v3015_v50  ;;  %v3014_v37 = vld [vmem:[#allocation3 + $0x20] sm:$0xff] }
 0x4be   : > { %3294 = vst.msk [vmem:[%s5665_s8 + $0x20] sm:$0xff] %vm1167_vm2, %v3014_v37  ;;  %v2236_v32 = vpop.permute.xlu1 %2235  ;;  %v2309_v33 = vpop.permute.xlu0 %2308  ;;  %v3076_v0 = vld [vmem:[#allocation3 + $0x20] ss:$2 sm:$0x3f] }
 0x4bf   : > { %v2630_v26 = vsel %vm2607_vm12, %v2605_v6, %v2309_v33  ;;  %v2606_v3 = vsel %vm2582_vm11, %v2581_v45, %v2236_v32  ;;  %v3078_v57 = vld [vmem:[#allocation3 + $0x21] ss:$2 sm:$0x3f] }
 0x4c0   : > { %v3083_v60 = vmax.f32 %v3076_v0, %v3078_v57 }
 0x4c2   : > { %v2311_v43 = vpop.permute.xlu1 %2310  ;;  %v2384_v44 = vpop.permute.xlu0 %2383 }
 0x4c3   : > { %v2655_v4 = vsel %vm2632_vm13, %v2630_v26, %v2384_v44  ;;  %v2631_v24 = vsel %vm2607_vm12, %v2606_v3, %v2311_v43 }
 0x4c6   : > { %v2386_v5 = vpop.permute.xlu1 %2385  ;;  %v2459_v54 = vpop.permute.xlu0 %2458 }
 0x4c7   : > { %v2680_v15 = vsel %vm2657_vm14, %v2655_v4, %v2459_v54  ;;  %v2656_v62 = vsel %vm2632_vm13, %v2631_v24, %v2386_v5 }
 0x4c8   : > { %3491 = vmatprep.mubr.msk.f32.mxu1 %vm2698_vm15, %v2680_v15 }
 0x4ca   : > { %v2461_v46 = vpop.permute.xlu1 %2460 }
 0x4cb   : > { %v2681_v55 = vsel %vm2657_vm14, %v2656_v62, %v2461_v46 }
 0x4cc   : > { %v3469_v34 = vpop.f32.mrb[6].mxu1  ;;  %3492 = vmatmul.mubr.msk.f32.gmra.mrb[22].mxu1 %vm2698_vm15, %v2681_v55 }
 0x4cd   : > { %v2873_v52 = vadd.f32 %v3469_v34, %v5640_v35  ;;  %v2867_v36 = vpop.f32.mrb[7].mxu1 }
 0x4ce   : > { %v2868_v18 = vadd.f32 %v5640_v35, %v2867_v36 }
 0x4cf   : > { %v2963_v21 = vmax.f32 %v2873_v52, 0.0 }
 0x4d0   : > { %v2962_v31 = vmax.f32 %v2868_v18, 0.0 }
 0x4d1   : > { %2987 = vst.msk [vmem:[#allocation3 + $0x38] sm:$0xff] %vm1167_vm2, %v2963_v21 }
 0x4d2   : > { %2986 = vst.msk [vmem:[#allocation3 + $0x30] sm:$0xff] %vm1167_vm2, %v2962_v31 }
 0x4d8   : > { %v3020_v13 = vld [vmem:[#allocation3 + $0x38] sm:$0xf] }
 0x4d9   : > { %3297 = vst.msk [vmem:[%s5665_s8 + $0x38] sm:$0xf] %vm3003_vm0, %v3020_v13  ;;  %v3019_v39 = vld [vmem:[#allocation3 + $0x30] sm:$0xff] }
 0x4da   : > { %v3080_v28 = vld [vmem:[#allocation3 + $0x30] ss:$2 sm:$0x3f]  ;;  %3296 = vst.msk [vmem:[%s5665_s8 + $0x30] sm:$0xff] %vm1167_vm2, %v3019_v39 }
 0x4db   : > { %v3082_v58 = vld [vmem:[#allocation3 + $0x31] ss:$2 sm:$0x3f] }
 0x4dc   : > { %v3084_v23 = vmax.f32 %v3080_v28, %v3082_v58 }
 0x4de   : > { %v3085_v25 = vmax.f32 %v3083_v60, %v3084_v23 }
 0x4e0   : > { %3314 = vst.msk [vmem:[%s5720_s12 + $0x8] sm:$0x3f] %vm1731_vm10, %v3085_v25 }
 0x4e8   : > { %v3472_v61 = vpop.f32.mrb[8].mxu1 }
 0x4e9   : > { %v2883_v56 = vadd.f32 %v3472_v61, %v5640_v35  ;;  %v2877_v14 = vpop.f32.mrb[9].mxu1 }
 0x4ea   : > { %v2878_v19 = vadd.f32 %v5640_v35, %v2877_v14 }
 0x4eb   : > { %v2965_v41 = vmax.f32 %v2883_v56, 0.0 }
 0x4ec   : > { %v2964_v47 = vmax.f32 %v2878_v19, 0.0 }
 0x4ed   : > { %2989 = vst.msk [vmem:[#allocation3 + $0x48] sm:$0xff] %vm1167_vm2, %v2965_v41 }
 0x4ee   : > { %2988 = vst.msk [vmem:[#allocation3 + $0x40] sm:$0xff] %vm1167_vm2, %v2964_v47 }
 0x4f4   : > { %v3025_v22 = vld [vmem:[#allocation3 + $0x48] sm:$0xf] }
 0x4f5   : > { %3299 = vst.msk [vmem:[%s5665_s8 + $0x48] sm:$0xf] %vm3003_vm0, %v3025_v22  ;;  %v3024_v59 = vld [vmem:[#allocation3 + $0x40] sm:$0xff] }
 0x4f6   : > { %3298 = vst.msk [vmem:[%s5665_s8 + $0x40] sm:$0xff] %vm1167_vm2, %v3024_v59  ;;  %v3089_v49 = vld [vmem:[#allocation3 + $0x40] ss:$2 sm:$0x3f] }
 0x4f7   : > { %v3091_v12 = vld [vmem:[#allocation3 + $0x41] ss:$2 sm:$0x3f] }
 0x4f8   : > { %v3096_v11 = vmax.f32 %v3089_v49, %v3091_v12 }
 0x504   : > { %v3475_v20 = vpop.f32.mrb[10].mxu1 }
 0x505   : > { %v2893_v27 = vadd.f32 %v3475_v20, %v5640_v35  ;;  %v2887_v10 = vpop.f32.mrb[11].mxu1 }
 0x506   : > { %v2888_v42 = vadd.f32 %v5640_v35, %v2887_v10 }
 0x507   : > { %v2967_v17 = vmax.f32 %v2893_v27, 0.0 }
 0x508   : > { %v2966_v53 = vmax.f32 %v2888_v42, 0.0 }
 0x509   : > { %2991 = vst.msk [vmem:[#allocation3 + $0x58] sm:$0xff] %vm1167_vm2, %v2967_v17 }
 0x50a   : > { %2990 = vst.msk [vmem:[#allocation3 + $0x50] sm:$0xff] %vm1167_vm2, %v2966_v53 }
 0x510   : > { %v3030_v16 = vld [vmem:[#allocation3 + $0x58] sm:$0xf] }
 0x511   : > { %3301 = vst.msk [vmem:[%s5665_s8 + $0x58] sm:$0xf] %vm3003_vm0, %v3030_v16  ;;  %v3029_v40 = vld [vmem:[#allocation3 + $0x50] sm:$0xff] }
 0x512   : > { %v3093_v48 = vld [vmem:[#allocation3 + $0x50] ss:$2 sm:$0x3f]  ;;  %3300 = vst.msk [vmem:[%s5665_s8 + $0x50] sm:$0xff] %vm1167_vm2, %v3029_v40 }
 0x513   : > { %v3095_v29 = vld [vmem:[#allocation3 + $0x51] ss:$2 sm:$0x3f] }
 0x514   : > { %v3097_v50 = vmax.f32 %v3093_v48, %v3095_v29 }
 0x516   : > { %v3098_v37 = vmax.f32 %v3096_v11, %v3097_v50 }
 0x518   : > { %3315 = vst.msk [vmem:[%s5720_s12 + $0x10] sm:$0x3f] %vm1731_vm10, %v3098_v37 }
 0x520   : > { %v3478_v32 = vpop.f32.mrb[12].mxu1 }
 0x521   : > { %v2903_v33 = vadd.f32 %v3478_v32, %v5640_v35  ;;  %v2897_v7 = vpop.f32.mrb[13].mxu1 }
 0x522   : > { %v2898_v1 = vadd.f32 %v5640_v35, %v2897_v7 }
 0x523   : > { %v2969_v2 = vmax.f32 %v2903_v33, 0.0 }
 0x524   : > { %v2968_v9 = vmax.f32 %v2898_v1, 0.0 }
 0x525   : > { %2993 = vst.msk [vmem:[#allocation3 + $0x68] sm:$0xff] %vm1167_vm2, %v2969_v2 }
 0x526   : > { %2992 = vst.msk [vmem:[#allocation3 + $0x60] sm:$0xff] %vm1167_vm2, %v2968_v9 }
 0x52c   : > { %v3035_v43 = vld [vmem:[#allocation3 + $0x68] sm:$0xf] }
 0x52d   : > { %3303 = vst.msk [vmem:[%s5665_s8 + $0x68] sm:$0xf] %vm3003_vm0, %v3035_v43  ;;  %v3034_v44 = vld [vmem:[#allocation3 + $0x60] sm:$0xff] }
 0x52e   : > { %3302 = vst.msk [vmem:[%s5665_s8 + $0x60] sm:$0xff] %vm1167_vm2, %v3034_v44  ;;  %v3102_v51 = vld [vmem:[#allocation3 + $0x60] ss:$2 sm:$0x3f] }
 0x52f   : > { %v3104_v4 = vld [vmem:[#allocation3 + $0x61] ss:$2 sm:$0x3f] }
 0x530   : > { %v3109_v3 = vmax.f32 %v3102_v51, %v3104_v4 }
 0x53b   : > { %v3481_v63 = vpop.f32.mrb[14].mxu1 }
 0x53c   : > { %v2913_v38 = vadd.f32 %v3481_v63, %v5640_v35  ;;  %v2907_v8 = vpop.f32.mrb[15].mxu1 }
 0x53d   : > { %v2908_v6 = vadd.f32 %v5640_v35, %v2907_v8 }
 0x53e   : > { %v2971_v30 = vmax.f32 %v2913_v38, 0.0 }
 0x53f   : > { %v2970_v26 = vmax.f32 %v2908_v6, 0.0 }
 0x540   : > { %2995 = vst.msk [vmem:[#allocation3 + $0x78] sm:$0xff] %vm1167_vm2, %v2971_v30 }
 0x541   : > { %2994 = vst.msk [vmem:[#allocation3 + $0x70] sm:$0xff] %vm1167_vm2, %v2970_v26 }
 0x547   : > { %v3040_v5 = vld [vmem:[#allocation3 + $0x78] sm:$0xf] }
 0x548   : > { %3305 = vst.msk [vmem:[%s5665_s8 + $0x78] sm:$0xf] %vm3003_vm0, %v3040_v5  ;;  %v3039_v54 = vld [vmem:[#allocation3 + $0x70] sm:$0xff] }
 0x549   : > { %v3106_v45 = vld [vmem:[#allocation3 + $0x70] ss:$2 sm:$0x3f]  ;;  %3304 = vst.msk [vmem:[%s5665_s8 + $0x70] sm:$0xff] %vm1167_vm2, %v3039_v54 }
 0x54a   : > { %v3108_v15 = vld [vmem:[#allocation3 + $0x71] ss:$2 sm:$0x3f] }
 0x54b   : > { %v3110_v24 = vmax.f32 %v3106_v45, %v3108_v15 }
 0x54d   : > { %v3111_v62 = vmax.f32 %v3109_v3, %v3110_v24 }
 0x54f   : > { %3316 = vst.msk [vmem:[%s5720_s12 + $0x18] sm:$0x3f] %vm1731_vm10, %v3111_v62 }
 0x557   : > { %v3484_v46 = vpop.f32.mrb[16].mxu1 }
 0x558   : > { %v2923_v55 = vadd.f32 %v3484_v46, %v5640_v35  ;;  %v2917_v34 = vpop.f32.mrb[17].mxu1 }
 0x559   : > { %v2918_v52 = vadd.f32 %v5640_v35, %v2917_v34 }
 0x55a   : > { %v2973_v36 = vmax.f32 %v2923_v55, 0.0 }
 0x55b   : > { %v2972_v18 = vmax.f32 %v2918_v52, 0.0 }
 0x55c   : > { %2997 = vst.msk [vmem:[#allocation3 + $0x88] sm:$0xff] %vm1167_vm2, %v2973_v36 }
 0x55d   : > { %2996 = vst.msk [vmem:[#allocation3 + $0x80] sm:$0xff] %vm1167_vm2, %v2972_v18 }
 0x563   : > { %v3045_v21 = vld [vmem:[#allocation3 + $0x88] sm:$0xf] }
 0x564   : > { %3307 = vst.msk [vmem:[%s5665_s8 + $0x88] sm:$0xf] %vm3003_vm0, %v3045_v21  ;;  %v3044_v31 = vld [vmem:[#allocation3 + $0x80] sm:$0xff] }
 0x565   : > { %3306 = vst.msk [vmem:[%s5665_s8 + $0x80] sm:$0xff] %vm1167_vm2, %v3044_v31  ;;  %v3115_v60 = vld [vmem:[#allocation3 + $0x80] ss:$2 sm:$0x3f] }
 0x566   : > { %v3117_v23 = vld [vmem:[#allocation3 + $0x81] ss:$2 sm:$0x3f] }
 0x567   : > { %v3122_v19 = vmax.f32 %v3115_v60, %v3117_v23 }
 0x573   : > { %v3487_v0 = vpop.f32.mrb[18].mxu1 }
 0x574   : > { %v2933_v57 = vadd.f32 %v3487_v0, %v5640_v35  ;;  %v2927_v13 = vpop.f32.mrb[19].mxu1 }
 0x575   : > { %v2928_v39 = vadd.f32 %v5640_v35, %v2927_v13 }
 0x576   : > { %v2975_v28 = vmax.f32 %v2933_v57, 0.0 }
 0x577   : > { %v2974_v58 = vmax.f32 %v2928_v39, 0.0 }
 0x578   : > { %2999 = vst.msk [vmem:[#allocation3 + $0x98] sm:$0xff] %vm1167_vm2, %v2975_v28 }
 0x579   : > { %2998 = vst.msk [vmem:[#allocation3 + $0x90] sm:$0xff] %vm1167_vm2, %v2974_v58 }
 0x57f   : > { %v3050_v25 = vld [vmem:[#allocation3 + $0x98] sm:$0xf] }
 0x580   : > { %3309 = vst.msk [vmem:[%s5665_s8 + $0x98] sm:$0xf] %vm3003_vm0, %v3050_v25  ;;  %v3049_v61 = vld [vmem:[#allocation3 + $0x90] sm:$0xff] }
 0x581   : > { %v3119_v56 = vld [vmem:[#allocation3 + $0x90] ss:$2 sm:$0x3f]  ;;  %3308 = vst.msk [vmem:[%s5665_s8 + $0x90] sm:$0xff] %vm1167_vm2, %v3049_v61 }
 0x582   : > { %v3121_v14 = vld [vmem:[#allocation3 + $0x91] ss:$2 sm:$0x3f] }
 0x583   : > { %v3123_v41 = vmax.f32 %v3119_v56, %v3121_v14 }
 0x585   : > { %v3124_v47 = vmax.f32 %v3122_v19, %v3123_v41 }
 0x587   : > { %3317 = vst.msk [vmem:[%s5720_s12 + $0x20] sm:$0x3f] %vm1731_vm10, %v3124_v47 }
 0x58f   : > { %v3490_v22 = vpop.f32.mrb[20].mxu1 }
 0x590   : > { %v2943_v59 = vadd.f32 %v3490_v22, %v5640_v35  ;;  %v2937_v20 = vpop.f32.mrb[21].mxu1 }
 0x591   : > { %v2938_v27 = vadd.f32 %v5640_v35, %v2937_v20 }
 0x592   : > { %v2977_v10 = vmax.f32 %v2943_v59, 0.0 }
 0x593   : > { %v2976_v42 = vmax.f32 %v2938_v27, 0.0 }
 0x594   : > { %3001 = vst.msk [vmem:[#allocation3 + $0xa8] sm:$0xff] %vm1167_vm2, %v2977_v10 }
 0x595   : > { %3000 = vst.msk [vmem:[#allocation3 + $0xa0] sm:$0xff] %vm1167_vm2, %v2976_v42 }
 0x59b   : > { %v3055_v17 = vld [vmem:[#allocation3 + $0xa8] sm:$0xf] }
 0x59c   : > { %3311 = vst.msk [vmem:[%s5665_s8 + $0xa8] sm:$0xf] %vm3003_vm0, %v3055_v17  ;;  %v3054_v53 = vld [vmem:[#allocation3 + $0xa0] sm:$0xff] }
 0x59d   : > { %3310 = vst.msk [vmem:[%s5665_s8 + $0xa0] sm:$0xff] %vm1167_vm2, %v3054_v53  ;;  %v3128_v11 = vld [vmem:[#allocation3 + $0xa0] ss:$2 sm:$0x3f] }
 0x59e   : > { %v3130_v50 = vld [vmem:[#allocation3 + $0xa1] ss:$2 sm:$0x3f] }
 0x59f   : > { %v3493_v49 = vpop.f32.mrb[22].mxu1  ;;  %v3135_v1 = vmax.f32 %v3128_v11, %v3130_v50 }
 0x5a0   : > { %v2953_v12 = vadd.f32 %v3493_v49, %v5640_v35  ;;  %v2947_v16 = vpop.f32.mrb[23].mxu1 }
 0x5a1   : > { %v2948_v40 = vadd.f32 %v5640_v35, %v2947_v16 }
 0x5a2   : > { %v2979_v48 = vmax.f32 %v2953_v12, 0.0 }
 0x5a3   : > { %v2978_v29 = vmax.f32 %v2948_v40, 0.0 }
 0x5a4   : > { %3004 = vst.msk [vmem:[#allocation3 + $0xb8] sm:$0xf] %vm3003_vm0, %v2979_v48 }
 0x5a5   : > { %3002 = vst.msk [vmem:[#allocation3 + $0xb0] sm:$0xff] %vm1167_vm2, %v2978_v29 }
 0x5ab   : > { %v3060_v37 = vld [vmem:[#allocation3 + $0xb8] sm:$0xf] }
 0x5ac   : > { %3313 = vst.msk [vmem:[%s5665_s8 + $0xb8] sm:$0xf] %vm3003_vm0, %v3060_v37  ;;  %v3059_v32 = vld [vmem:[#allocation3 + $0xb0] sm:$0xff] }
 0x5ad   : > { %v3132_v33 = vld [vmem:[#allocation3 + $0xb0] ss:$2 sm:$0x3f]  ;;  %3312 = vst.msk [vmem:[%s5665_s8 + $0xb0] sm:$0xff] %vm1167_vm2, %v3059_v32 }
 0x5ae   : > { %v3134_v7 = vld [vmem:[#allocation3 + $0xb1] ss:$2 sm:$0x3f] }
 0x5af   : > { %v3136_v2 = vmax.f32 %v3132_v33, %v3134_v7 }
 0x5b1   : > { %v3137_v35 = vmax.f32 %v3135_v1, %v3136_v2 }
 0x5b3   : > { %3318 = vst.msk [vmem:[%s5720_s12 + $0x28] sm:$0x3f] %vm1731_vm10, %v3137_v35 }
 0x5b4 PF: > { %s17_s21 = sadd.s32 1, %s3549_s21  }
 0x5b5   : > { %p14_p4 = scmp.ge.s32.totalorder %s17_s21, 4  }
 0x5b7   :  { %16 = sbr.rel (!%p14_p4) target bundleno = 1 (0x1), region = 121 }

</bundles_post_ra>
